<compile_context>
chip_gen: v5e
topology: v5e:2x2
jax: 0.10.0
libtpu: 0.0.40
codegen_flags: <defaults>
</compile_context>

<pallas_src>
import functools

import jax
import jax.numpy as jnp
from jax import lax
from jax.experimental import pallas as pl
from jax.experimental.pallas import tpu as pltpu

KSIZE = 3
STRIDE = 2
PAD = 1
LRELU_SLOPE = 0.01  # nn.LeakyReLU default

# tile caps (bf16 inputs): 2x(tm*tk + tk*tn)*2B double-buffered + (tm*tn)*4B out x2
# + (tm*tn)*4B acc  ~= 5 MiB  -> fits every generation's scoped VMEM.
TM_MAX = 512
TN_MAX = 256
TK_MAX = 1024
VMEM_LIMIT = 48 * 1024 * 1024


def _rup(x, m):
    return ((x + m - 1) // m) * m


# ---------------- Pallas kernel: tiled matmul + bias + (optional) LeakyReLU ----------------

def _matmul_bias_act_kernel(p_ref, w_ref, b_ref, o_ref, acc_ref, *, apply_act, slope):
    k = pl.program_id(2)

    @pl.when(k == 0)
    def _():
        acc_ref[...] = jnp.zeros_like(acc_ref)

    acc_ref[...] += jnp.dot(p_ref[...], w_ref[...], preferred_element_type=jnp.float32)

    @pl.when(k == pl.num_programs(2) - 1)
    def _():
        y = acc_ref[...] + b_ref[...]
        if apply_act:
            y = jnp.where(y >= 0.0, y, slope * y)
        o_ref[...] = y.astype(o_ref.dtype)


def _pallas_matmul_bias_act(p_bf16, w_bf16, bias_f32, *, apply_act, slope=LRELU_SLOPE):
    M, K = p_bf16.shape
    K2, N = w_bf16.shape
    assert K == K2

    # pick tiles: pad each dim to alignment; single block if it fits, else fixed cap.
    def _tile(dim, align, cap):
        padded = _rup(dim, align)
        if padded <= cap:
            return padded, padded
        return cap, _rup(dim, cap)

    tm, Mp = _tile(M, 8, TM_MAX)
    tn, Np = _tile(N, 128, TN_MAX)
    tk, Kp = _tile(K, 128, TK_MAX)

    p = jnp.pad(p_bf16, ((0, Mp - M), (0, Kp - K)))
    w = jnp.pad(w_bf16, ((0, Kp - K), (0, Np - N)))
    b = jnp.pad(bias_f32.reshape(1, N).astype(jnp.float32), ((0, 0), (0, Np - N)))

    grid = (Mp // tm, Np // tn, Kp // tk)
    kern = functools.partial(_matmul_bias_act_kernel, apply_act=apply_act, slope=slope)

    out = pl.pallas_call(
        kern,
        out_shape=jax.ShapeDtypeStruct((Mp, Np), jnp.float32),
        grid_spec=pltpu.PrefetchScalarGridSpec(
            num_scalar_prefetch=0,
            grid=grid,
            in_specs=[
                pl.BlockSpec((tm, tk), lambda i, j, k: (i, k)),
                pl.BlockSpec((tk, tn), lambda i, j, k: (k, j)),
                pl.BlockSpec((1, tn), lambda i, j, k: (0, j)),
            ],
            out_specs=pl.BlockSpec((tm, tn), lambda i, j, k: (i, j)),
            scratch_shapes=[pltpu.VMEM((tm, tn), jnp.float32)],
        ),
        compiler_params=pltpu.CompilerParams(
            dimension_semantics=("parallel", "parallel", "arbitrary"),
            vmem_limit_bytes=VMEM_LIMIT,
        ),
        cost_estimate=pl.CostEstimate(
            flops=int(2 * Mp * Np * Kp),
            transcendentals=0,
            bytes_accessed=int((Mp * Kp + Kp * Np) * 2 + Mp * Np * 4 + Np * 4),
        ),
    )(p, w, b)
    return out[:M, :N]


# ---------------- glue: spectral norm, reflection-pad im2col ----------------

def _spectral_normalize(w, u, eps=1e-12):
    # one power-iteration step (PyTorch spectral_norm, training-mode forward)
    cout = w.shape[0]
    wm = w.reshape(cout, -1)
    v = wm.T @ u
    v = v / (jnp.linalg.norm(v) + eps)
    u = wm @ v
    u = u / (jnp.linalg.norm(u) + eps)
    sigma = u @ (wm @ v)
    return w / sigma


def _im2col(x_nhwc, k, stride, pad):
    if pad > 0:
        xp = jnp.pad(x_nhwc, ((0, 0), (pad, pad), (pad, pad), (0, 0)), mode="reflect")
    else:
        xp = x_nhwc
    N, Hp, Wp, C = xp.shape
    Ho = (Hp - k) // stride + 1
    Wo = (Wp - k) // stride + 1
    taps = []
    for ky in range(k):
        for kx in range(k):
            taps.append(
                xp[:, ky:ky + stride * (Ho - 1) + 1:stride,
                      kx:kx + stride * (Wo - 1) + 1:stride, :]
            )
    p = jnp.stack(taps, axis=3)  # (N, Ho, Wo, k*k, C): (ky,kx) major, cin minor
    return p.reshape(N * Ho * Wo, k * k * C), N, Ho, Wo


def _conv2d(x_nhwc, w_oihw, bias, *, stride, pad, apply_act):
    cout, cin, k, _ = w_oihw.shape
    p, n, ho, wo = _im2col(x_nhwc, k, stride, pad)
    wr = jnp.transpose(w_oihw, (2, 3, 1, 0)).reshape(k * k * cin, cout)
    y = _pallas_matmul_bias_act(
        p.astype(jnp.bfloat16), wr.astype(jnp.bfloat16), bias,
        apply_act=apply_act, slope=LRELU_SLOPE,
    )
    return y.reshape(n, ho, wo, cout)


# ---------------- Dis_pair module ----------------

def init_dis_pair_params(key, input_dim_a=3, input_dim_b=3, dis_n_layer=5, ch=64):
    dims = []
    tch = ch
    dims.append((input_dim_a + input_dim_b, ch))
    for _ in range(1, dis_n_layer):
        dims.append((tch, tch * 2))
        tch *= 2
    dims.append((tch, tch * 2))
    tch *= 2

    keys = jax.random.split(key, 3 * (len(dims) + 1))
    ki = 0
    convs = []
    for cin, cout in dims:
        w = jax.random.normal(keys[ki], (cout, cin, KSIZE, KSIZE), jnp.float32)
        w = w / jnp.sqrt(cin * KSIZE * KSIZE)
        b = 0.1 * jax.random.normal(keys[ki + 1], (cout,), jnp.float32)
        u = jax.random.normal(keys[ki + 2], (cout,), jnp.float32)
        u = u / jnp.linalg.norm(u)
        convs.append(dict(w=w, b=b, u=u))
        ki += 3
    fw = jax.random.normal(keys[ki], (1, tch, 1, 1), jnp.float32) / jnp.sqrt(tch)
    fb = 0.1 * jax.random.normal(keys[ki + 1], (1,), jnp.float32)
    fu = jax.random.normal(keys[ki + 2], (1,), jnp.float32)
    fu = fu / jnp.linalg.norm(fu)
    return dict(convs=convs, final=dict(w=fw, b=fb, u=fu))


def dis_pair_forward(params, image_a, image_b):
    x = jnp.concatenate([image_a, image_b], axis=1).astype(jnp.float32)  # NCHW
    x = jnp.transpose(x, (0, 2, 3, 1))  # -> NHWC
    for lyr in params["convs"]:
        w = _spectral_normalize(lyr["w"], lyr["u"])
        x = _conv2d(x, w, lyr["b"], stride=STRIDE, pad=PAD, apply_act=True)
    fin = params["final"]
    w = _spectral_normalize(fin["w"], fin["u"])
    x = _conv2d(x, w, fin["b"], stride=1, pad=0, apply_act=False)
    out = jnp.transpose(x, (0, 3, 1, 2)).reshape(-1)  # NHWC -> NCHW -> view(-1)
    return [out]


# ---------------- pure-JAX reference (bf16-matched numerics) ----------------

def _ref_forward(params, image_a, image_b):
    dn = ("NCHW", "OIHW", "NCHW")
    x = jnp.concatenate([image_a, image_b], axis=1).astype(jnp.float32)
    for lyr in params["convs"]:
        w = _spectral_normalize(lyr["w"], lyr["u"])
        xp = jnp.pad(x, ((0, 0), (0, 0), (PAD, PAD), (PAD, PAD)), mode="reflect")
        y = lax.conv_general_dilated(
            xp.astype(jnp.bfloat16), w.astype(jnp.bfloat16),
            (STRIDE, STRIDE), "VALID", dimension_numbers=dn,
            preferred_element_type=jnp.float32)
        y = y + lyr["b"].reshape(1, -1, 1, 1)
        x = jnp.where(y >= 0, y, LRELU_SLOPE * y)
    fin = params["final"]
    w = _spectral_normalize(fin["w"], fin["u"])
    y = lax.conv_general_dilated(
        x.astype(jnp.bfloat16), w.astype(jnp.bfloat16),
        (1, 1), "VALID", dimension_numbers=dn,
        preferred_element_type=jnp.float32)
    y = y + fin["b"].reshape(1, -1, 1, 1)
    return [y.reshape(-1)]


if __name__ == "__main__":
    key = jax.random.PRNGKey(0)
    k_p, k_a, k_b = jax.random.split(key, 3)

    # small but structurally faithful config: 4 strided layers + 1x1 head
    input_dim_a = input_dim_b = 3
    ch = 32
    dis_n_layer = 3
    N, H, W = 2, 32, 32

    params = init_dis_pair_params(k_p, input_dim_a, input_dim_b, dis_n_layer, ch)
    image_a = jax.random.normal(k_a, (N, input_dim_a, H, W), jnp.float32)
    image_b = jax.random.normal(k_b, (N, input_dim_b, H, W), jnp.float32)

    outs = jax.jit(dis_pair_forward)(params, image_a, image_b)
    jax.block_until_ready(outs)

    down = 2 ** (dis_n_layer + 1)
    assert outs[0].shape == (N * (H // down) * (W // down),)

    ref = jax.jit(_ref_forward)(params, image_a, image_b)
    jax.block_until_ready(ref)
    assert jnp.allclose(outs[0], ref[0], rtol=1e-2, atol=1e-3), (
        float(jnp.max(jnp.abs(outs[0] - ref[0]))))

    print("KERNEL_OK")
</pallas_src>

<mosaic_0001>
module attributes {stable_mosaic.version = 11 : i64} {
  func.func @_matmul_bias_act_kernel(%arg0: i32, %arg1: i32, %arg2: i32, %arg3: memref<512x128xbf16, #tpu.memory_space<vmem>>, %arg4: memref<128x128xbf16, #tpu.memory_space<vmem>>, %arg5: memref<1x128xf32, #tpu.memory_space<vmem>>, %arg6: memref<512x128xf32, #tpu.memory_space<vmem>>, %arg7: memref<512x128xf32, #tpu.memory_space<vmem>>) attributes {dimension_semantics = [#tpu.dimension_semantics<parallel>, #tpu.dimension_semantics<parallel>, #tpu.dimension_semantics<arbitrary>], iteration_bounds = array<i64: 1, 1, 1>, scalar_prefetch = 0 : i64, scratch_operands = 1 : i64, tpu.core_type = #tpu.core_type<tc>, window_params = [{transform_indices = @transform_0, window_bounds = array<i64: 512, 128>}, {transform_indices = @transform_1, window_bounds = array<i64: 128, 128>}, {transform_indices = @transform_2, window_bounds = array<i64: 1, 128>}, {transform_indices = @transform_3, window_bounds = array<i64: 512, 128>}]} {
    %c0_i32 = arith.constant 0 : i32
    %0 = arith.cmpi eq, %arg2, %c0_i32 : i32
    %1 = arith.extui %0 : i1 to i32
    %c0_i32_0 = arith.constant 0 : i32
    %2 = arith.cmpi ne, %1, %c0_i32_0 : i32
    scf.if %2 {
      %cst_10 = arith.constant 0.000000e+00 : f32
      %12 = vector.broadcast %cst_10 : f32 to vector<512x128xf32>
      %c0_11 = arith.constant 0 : index
      %c0_12 = arith.constant 0 : index
      %13 = vector.load %arg7[%c0_11, %c0_12] : memref<512x128xf32, #tpu.memory_space<vmem>>, vector<512x128xf32>
      tpu.vector_store %arg7[%c0_11, %c0_12], %12 {strides = array<i32>} : memref<512x128xf32, #tpu.memory_space<vmem>>, vector<512x128xf32>,
    } else {
    }
    %c0 = arith.constant 0 : index
    %c0_1 = arith.constant 0 : index
    %3 = vector.load %arg7[%c0, %c0_1] : memref<512x128xf32, #tpu.memory_space<vmem>>, vector<512x128xf32>
    %c0_2 = arith.constant 0 : index
    %c0_3 = arith.constant 0 : index
    %4 = vector.load %arg3[%c0_2, %c0_3] : memref<512x128xbf16, #tpu.memory_space<vmem>>, vector<512x128xbf16>
    %c0_4 = arith.constant 0 : index
    %c0_5 = arith.constant 0 : index
    %5 = vector.load %arg4[%c0_4, %c0_5] : memref<128x128xbf16, #tpu.memory_space<vmem>>, vector<128x128xbf16>
    %cst = arith.constant dense<0.000000e+00> : vector<512x128xf32>
    %6 = tpu.matmul %4, %5, %cst {dimension_numbers = #tpu.dot_dimension_numbers<[1], [0], [0], [1], [0, 0, 1, 1], [], []>} : vector<512x128xbf16>, vector<128x128xbf16>, vector<512x128xf32> -> vector<512x128xf32>
    %7 = arith.addf %3, %6 : vector<512x128xf32>
    %c0_6 = arith.constant 0 : index
    %c0_7 = arith.constant 0 : index
    %8 = vector.load %arg7[%c0_6, %c0_7] : memref<512x128xf32, #tpu.memory_space<vmem>>, vector<512x128xf32>
    tpu.vector_store %arg7[%c0_6, %c0_7], %7 {strides = array<i32>} : memref<512x128xf32, #tpu.memory_space<vmem>>, vector<512x128xf32>,
    %c0_i32_8 = arith.constant 0 : i32
    %9 = arith.cmpi eq, %arg2, %c0_i32_8 : i32
    %10 = arith.extui %9 : i1 to i32
    %c0_i32_9 = arith.constant 0 : i32
    %11 = arith.cmpi ne, %10, %c0_i32_9 : i32
    scf.if %11 {
      %c0_10 = arith.constant 0 : index
      %c0_11 = arith.constant 0 : index
      %12 = vector.load %arg7[%c0_10, %c0_11] : memref<512x128xf32, #tpu.memory_space<vmem>>, vector<512x128xf32>
      %c0_12 = arith.constant 0 : index
      %c0_13 = arith.constant 0 : index
      %13 = vector.load %arg5[%c0_12, %c0_13] : memref<1x128xf32, #tpu.memory_space<vmem>>, vector<1x128xf32>
      %14 = vector.broadcast %13 : vector<1x128xf32> to vector<512x128xf32>
      %15 = arith.addf %12, %14 : vector<512x128xf32>
      %cst_14 = arith.constant 0.000000e+00 : f32
      %16 = vector.broadcast %cst_14 : f32 to vector<512x128xf32>
      %17 = arith.cmpf oge, %15, %16 : vector<512x128xf32>
      %cst_15 = arith.constant 0.00999999977 : f32
      %18 = vector.broadcast %cst_15 : f32 to vector<512x128xf32>
      %19 = arith.mulf %18, %15 : vector<512x128xf32>
      %20 = arith.select %17, %15, %19 : vector<512x128xi1>, vector<512x128xf32>
      %c0_16 = arith.constant 0 : index
      %c0_17 = arith.constant 0 : index
      %21 = vector.load %arg6[%c0_16, %c0_17] : memref<512x128xf32, #tpu.memory_space<vmem>>, vector<512x128xf32>
      tpu.vector_store %arg6[%c0_16, %c0_17], %20 {strides = array<i32>} : memref<512x128xf32, #tpu.memory_space<vmem>>, vector<512x128xf32>,
    } else {
    }
    return
  }
  func.func @transform_0(%arg0: i32, %arg1: i32, %arg2: i32) -> (i32, i32) {
    %c0_i32 = arith.constant 0 : i32
    return %arg0, %arg2 : i32, i32
  }
  func.func @transform_1(%arg0: i32, %arg1: i32, %arg2: i32) -> (i32, i32) {
    %c0_i32 = arith.constant 0 : i32
    return %arg2, %arg1 : i32, i32
  }
  func.func @transform_2(%arg0: i32, %arg1: i32, %arg2: i32) -> (i32, i32) {
    %c0_i32 = arith.constant 0 : i32
    %c0_i32_0 = arith.constant 0 : i32
    return %c0_i32, %arg1 : i32, i32
  }
  func.func @transform_3(%arg0: i32, %arg1: i32, %arg2: i32) -> (i32, i32) {
    %c0_i32 = arith.constant 0 : i32
    return %arg0, %arg1 : i32, i32
  }
}

module attributes {stable_mosaic.version = 11 : i64} {
  func.func @_matmul_bias_act_kernel(%arg0: i32, %arg1: i32, %arg2: i32, %arg3: memref<128x384xbf16, #tpu.memory_space<vmem>>, %arg4: memref<384x128xbf16, #tpu.memory_space<vmem>>, %arg5: memref<1x128xf32, #tpu.memory_space<vmem>>, %arg6: memref<128x128xf32, #tpu.memory_space<vmem>>, %arg7: memref<128x128xf32, #tpu.memory_space<vmem>>) attributes {dimension_semantics = [#tpu.dimension_semantics<parallel>, #tpu.dimension_semantics<parallel>, #tpu.dimension_semantics<arbitrary>], iteration_bounds = array<i64: 1, 1, 1>, scalar_prefetch = 0 : i64, scratch_operands = 1 : i64, tpu.core_type = #tpu.core_type<tc>, window_params = [{transform_indices = @transform_0, window_bounds = array<i64: 128, 384>}, {transform_indices = @transform_1, window_bounds = array<i64: 384, 128>}, {transform_indices = @transform_2, window_bounds = array<i64: 1, 128>}, {transform_indices = @transform_3, window_bounds = array<i64: 128, 128>}]} {
    %c0_i32 = arith.constant 0 : i32
    %0 = arith.cmpi eq, %arg2, %c0_i32 : i32
    %1 = arith.extui %0 : i1 to i32
    %c0_i32_0 = arith.constant 0 : i32
    %2 = arith.cmpi ne, %1, %c0_i32_0 : i32
    scf.if %2 {
      %cst_10 = arith.constant 0.000000e+00 : f32
      %12 = vector.broadcast %cst_10 : f32 to vector<128x128xf32>
      %c0_11 = arith.constant 0 : index
      %c0_12 = arith.constant 0 : index
      %13 = vector.load %arg7[%c0_11, %c0_12] : memref<128x128xf32, #tpu.memory_space<vmem>>, vector<128x128xf32>
      tpu.vector_store %arg7[%c0_11, %c0_12], %12 {strides = array<i32>} : memref<128x128xf32, #tpu.memory_space<vmem>>, vector<128x128xf32>,
    } else {
    }
    %c0 = arith.constant 0 : index
    %c0_1 = arith.constant 0 : index
    %3 = vector.load %arg7[%c0, %c0_1] : memref<128x128xf32, #tpu.memory_space<vmem>>, vector<128x128xf32>
    %c0_2 = arith.constant 0 : index
    %c0_3 = arith.constant 0 : index
    %4 = vector.load %arg3[%c0_2, %c0_3] : memref<128x384xbf16, #tpu.memory_space<vmem>>, vector<128x384xbf16>
    %c0_4 = arith.constant 0 : index
    %c0_5 = arith.constant 0 : index
    %5 = vector.load %arg4[%c0_4, %c0_5] : memref<384x128xbf16, #tpu.memory_space<vmem>>, vector<384x128xbf16>
    %cst = arith.constant dense<0.000000e+00> : vector<128x128xf32>
    %6 = tpu.matmul %4, %5, %cst {dimension_numbers = #tpu.dot_dimension_numbers<[1], [0], [0], [1], [0, 0, 1, 1], [], []>} : vector<128x384xbf16>, vector<384x128xbf16>, vector<128x128xf32> -> vector<128x128xf32>
    %7 = arith.addf %3, %6 : vector<128x128xf32>
    %c0_6 = arith.constant 0 : index
    %c0_7 = arith.constant 0 : index
    %8 = vector.load %arg7[%c0_6, %c0_7] : memref<128x128xf32, #tpu.memory_space<vmem>>, vector<128x128xf32>
    tpu.vector_store %arg7[%c0_6, %c0_7], %7 {strides = array<i32>} : memref<128x128xf32, #tpu.memory_space<vmem>>, vector<128x128xf32>,
    %c0_i32_8 = arith.constant 0 : i32
    %9 = arith.cmpi eq, %arg2, %c0_i32_8 : i32
    %10 = arith.extui %9 : i1 to i32
    %c0_i32_9 = arith.constant 0 : i32
    %11 = arith.cmpi ne, %10, %c0_i32_9 : i32
    scf.if %11 {
      %c0_10 = arith.constant 0 : index
      %c0_11 = arith.constant 0 : index
      %12 = vector.load %arg7[%c0_10, %c0_11] : memref<128x128xf32, #tpu.memory_space<vmem>>, vector<128x128xf32>
      %c0_12 = arith.constant 0 : index
      %c0_13 = arith.constant 0 : index
      %13 = vector.load %arg5[%c0_12, %c0_13] : memref<1x128xf32, #tpu.memory_space<vmem>>, vector<1x128xf32>
      %14 = vector.broadcast %13 : vector<1x128xf32> to vector<128x128xf32>
      %15 = arith.addf %12, %14 : vector<128x128xf32>
      %cst_14 = arith.constant 0.000000e+00 : f32
      %16 = vector.broadcast %cst_14 : f32 to vector<128x128xf32>
      %17 = arith.cmpf oge, %15, %16 : vector<128x128xf32>
      %cst_15 = arith.constant 0.00999999977 : f32
      %18 = vector.broadcast %cst_15 : f32 to vector<128x128xf32>
      %19 = arith.mulf %18, %15 : vector<128x128xf32>
      %20 = arith.select %17, %15, %19 : vector<128x128xi1>, vector<128x128xf32>
      %c0_16 = arith.constant 0 : index
      %c0_17 = arith.constant 0 : index
      %21 = vector.load %arg6[%c0_16, %c0_17] : memref<128x128xf32, #tpu.memory_space<vmem>>, vector<128x128xf32>
      tpu.vector_store %arg6[%c0_16, %c0_17], %20 {strides = array<i32>} : memref<128x128xf32, #tpu.memory_space<vmem>>, vector<128x128xf32>,
    } else {
    }
    return
  }
  func.func @transform_0(%arg0: i32, %arg1: i32, %arg2: i32) -> (i32, i32) {
    %c0_i32 = arith.constant 0 : i32
    return %arg0, %arg2 : i32, i32
  }
  func.func @transform_1(%arg0: i32, %arg1: i32, %arg2: i32) -> (i32, i32) {
    %c0_i32 = arith.constant 0 : i32
    return %arg2, %arg1 : i32, i32
  }
  func.func @transform_2(%arg0: i32, %arg1: i32, %arg2: i32) -> (i32, i32) {
    %c0_i32 = arith.constant 0 : i32
    %c0_i32_0 = arith.constant 0 : i32
    return %c0_i32, %arg1 : i32, i32
  }
  func.func @transform_3(%arg0: i32, %arg1: i32, %arg2: i32) -> (i32, i32) {
    %c0_i32 = arith.constant 0 : i32
    return %arg0, %arg1 : i32, i32
  }
}

module attributes {stable_mosaic.version = 11 : i64} {
  func.func @_matmul_bias_act_kernel(%arg0: i32, %arg1: i32, %arg2: i32, %arg3: memref<32x640xbf16, #tpu.memory_space<vmem>>, %arg4: memref<640x128xbf16, #tpu.memory_space<vmem>>, %arg5: memref<1x128xf32, #tpu.memory_space<vmem>>, %arg6: memref<32x128xf32, #tpu.memory_space<vmem>>, %arg7: memref<32x128xf32, #tpu.memory_space<vmem>>) attributes {dimension_semantics = [#tpu.dimension_semantics<parallel>, #tpu.dimension_semantics<parallel>, #tpu.dimension_semantics<arbitrary>], iteration_bounds = array<i64: 1, 1, 1>, scalar_prefetch = 0 : i64, scratch_operands = 1 : i64, tpu.core_type = #tpu.core_type<tc>, window_params = [{transform_indices = @transform_0, window_bounds = array<i64: 32, 640>}, {transform_indices = @transform_1, window_bounds = array<i64: 640, 128>}, {transform_indices = @transform_2, window_bounds = array<i64: 1, 128>}, {transform_indices = @transform_3, window_bounds = array<i64: 32, 128>}]} {
    %c0_i32 = arith.constant 0 : i32
    %0 = arith.cmpi eq, %arg2, %c0_i32 : i32
    %1 = arith.extui %0 : i1 to i32
    %c0_i32_0 = arith.constant 0 : i32
    %2 = arith.cmpi ne, %1, %c0_i32_0 : i32
    scf.if %2 {
      %cst_10 = arith.constant 0.000000e+00 : f32
      %12 = vector.broadcast %cst_10 : f32 to vector<32x128xf32>
      %c0_11 = arith.constant 0 : index
      %c0_12 = arith.constant 0 : index
      %13 = vector.load %arg7[%c0_11, %c0_12] : memref<32x128xf32, #tpu.memory_space<vmem>>, vector<32x128xf32>
      tpu.vector_store %arg7[%c0_11, %c0_12], %12 {strides = array<i32>} : memref<32x128xf32, #tpu.memory_space<vmem>>, vector<32x128xf32>,
    } else {
    }
    %c0 = arith.constant 0 : index
    %c0_1 = arith.constant 0 : index
    %3 = vector.load %arg7[%c0, %c0_1] : memref<32x128xf32, #tpu.memory_space<vmem>>, vector<32x128xf32>
    %c0_2 = arith.constant 0 : index
    %c0_3 = arith.constant 0 : index
    %4 = vector.load %arg3[%c0_2, %c0_3] : memref<32x640xbf16, #tpu.memory_space<vmem>>, vector<32x640xbf16>
    %c0_4 = arith.constant 0 : index
    %c0_5 = arith.constant 0 : index
    %5 = vector.load %arg4[%c0_4, %c0_5] : memref<640x128xbf16, #tpu.memory_space<vmem>>, vector<640x128xbf16>
    %cst = arith.constant dense<0.000000e+00> : vector<32x128xf32>
    %6 = tpu.matmul %4, %5, %cst {dimension_numbers = #tpu.dot_dimension_numbers<[1], [0], [0], [1], [0, 0, 1, 1], [], []>} : vector<32x640xbf16>, vector<640x128xbf16>, vector<32x128xf32> -> vector<32x128xf32>
    %7 = arith.addf %3, %6 : vector<32x128xf32>
    %c0_6 = arith.constant 0 : index
    %c0_7 = arith.constant 0 : index
    %8 = vector.load %arg7[%c0_6, %c0_7] : memref<32x128xf32, #tpu.memory_space<vmem>>, vector<32x128xf32>
    tpu.vector_store %arg7[%c0_6, %c0_7], %7 {strides = array<i32>} : memref<32x128xf32, #tpu.memory_space<vmem>>, vector<32x128xf32>,
    %c0_i32_8 = arith.constant 0 : i32
    %9 = arith.cmpi eq, %arg2, %c0_i32_8 : i32
    %10 = arith.extui %9 : i1 to i32
    %c0_i32_9 = arith.constant 0 : i32
    %11 = arith.cmpi ne, %10, %c0_i32_9 : i32
    scf.if %11 {
      %c0_10 = arith.constant 0 : index
      %c0_11 = arith.constant 0 : index
      %12 = vector.load %arg7[%c0_10, %c0_11] : memref<32x128xf32, #tpu.memory_space<vmem>>, vector<32x128xf32>
      %c0_12 = arith.constant 0 : index
      %c0_13 = arith.constant 0 : index
      %13 = vector.load %arg5[%c0_12, %c0_13] : memref<1x128xf32, #tpu.memory_space<vmem>>, vector<1x128xf32>
      %14 = vector.broadcast %13 : vector<1x128xf32> to vector<32x128xf32>
      %15 = arith.addf %12, %14 : vector<32x128xf32>
      %cst_14 = arith.constant 0.000000e+00 : f32
      %16 = vector.broadcast %cst_14 : f32 to vector<32x128xf32>
      %17 = arith.cmpf oge, %15, %16 : vector<32x128xf32>
      %cst_15 = arith.constant 0.00999999977 : f32
      %18 = vector.broadcast %cst_15 : f32 to vector<32x128xf32>
      %19 = arith.mulf %18, %15 : vector<32x128xf32>
      %20 = arith.select %17, %15, %19 : vector<32x128xi1>, vector<32x128xf32>
      %c0_16 = arith.constant 0 : index
      %c0_17 = arith.constant 0 : index
      %21 = vector.load %arg6[%c0_16, %c0_17] : memref<32x128xf32, #tpu.memory_space<vmem>>, vector<32x128xf32>
      tpu.vector_store %arg6[%c0_16, %c0_17], %20 {strides = array<i32>} : memref<32x128xf32, #tpu.memory_space<vmem>>, vector<32x128xf32>,
    } else {
    }
    return
  }
  func.func @transform_0(%arg0: i32, %arg1: i32, %arg2: i32) -> (i32, i32) {
    %c0_i32 = arith.constant 0 : i32
    return %arg0, %arg2 : i32, i32
  }
  func.func @transform_1(%arg0: i32, %arg1: i32, %arg2: i32) -> (i32, i32) {
    %c0_i32 = arith.constant 0 : i32
    return %arg2, %arg1 : i32, i32
  }
  func.func @transform_2(%arg0: i32, %arg1: i32, %arg2: i32) -> (i32, i32) {
    %c0_i32 = arith.constant 0 : i32
    %c0_i32_0 = arith.constant 0 : i32
    return %c0_i32, %arg1 : i32, i32
  }
  func.func @transform_3(%arg0: i32, %arg1: i32, %arg2: i32) -> (i32, i32) {
    %c0_i32 = arith.constant 0 : i32
    return %arg0, %arg1 : i32, i32
  }
}

module attributes {stable_mosaic.version = 11 : i64} {
  func.func @_matmul_bias_act_kernel(%arg0: i32, %arg1: i32, %arg2: i32, %arg3: memref<8x1024xbf16, #tpu.memory_space<vmem>>, %arg4: memref<1024x256xbf16, #tpu.memory_space<vmem>>, %arg5: memref<1x256xf32, #tpu.memory_space<vmem>>, %arg6: memref<8x256xf32, #tpu.memory_space<vmem>>, %arg7: memref<8x256xf32, #tpu.memory_space<vmem>>) attributes {dimension_semantics = [#tpu.dimension_semantics<parallel>, #tpu.dimension_semantics<parallel>, #tpu.dimension_semantics<arbitrary>], iteration_bounds = array<i64: 1, 1, 2>, scalar_prefetch = 0 : i64, scratch_operands = 1 : i64, tpu.core_type = #tpu.core_type<tc>, window_params = [{transform_indices = @transform_0, window_bounds = array<i64: 8, 1024>}, {transform_indices = @transform_1, window_bounds = array<i64: 1024, 256>}, {transform_indices = @transform_2, window_bounds = array<i64: 1, 256>}, {transform_indices = @transform_3, window_bounds = array<i64: 8, 256>}]} {
    %c0_i32 = arith.constant 0 : i32
    %0 = arith.cmpi eq, %arg2, %c0_i32 : i32
    %1 = arith.extui %0 : i1 to i32
    %c0_i32_0 = arith.constant 0 : i32
    %2 = arith.cmpi ne, %1, %c0_i32_0 : i32
    scf.if %2 {
      %cst_9 = arith.constant 0.000000e+00 : f32
      %12 = vector.broadcast %cst_9 : f32 to vector<8x256xf32>
      %c0_10 = arith.constant 0 : index
      %c0_11 = arith.constant 0 : index
      %13 = vector.load %arg7[%c0_10, %c0_11] : memref<8x256xf32, #tpu.memory_space<vmem>>, vector<8x256xf32>
      tpu.vector_store %arg7[%c0_10, %c0_11], %12 {strides = array<i32>} : memref<8x256xf32, #tpu.memory_space<vmem>>, vector<8x256xf32>,
    } else {
    }
    %c0 = arith.constant 0 : index
    %c0_1 = arith.constant 0 : index
    %3 = vector.load %arg7[%c0, %c0_1] : memref<8x256xf32, #tpu.memory_space<vmem>>, vector<8x256xf32>
    %c0_2 = arith.constant 0 : index
    %c0_3 = arith.constant 0 : index
    %4 = vector.load %arg3[%c0_2, %c0_3] : memref<8x1024xbf16, #tpu.memory_space<vmem>>, vector<8x1024xbf16>
    %c0_4 = arith.constant 0 : index
    %c0_5 = arith.constant 0 : index
    %5 = vector.load %arg4[%c0_4, %c0_5] : memref<1024x256xbf16, #tpu.memory_space<vmem>>, vector<1024x256xbf16>
    %cst = arith.constant dense<0.000000e+00> : vector<8x256xf32>
    %6 = tpu.matmul %4, %5, %cst {dimension_numbers = #tpu.dot_dimension_numbers<[1], [0], [0], [1], [0, 0, 1, 1], [], []>} : vector<8x1024xbf16>, vector<1024x256xbf16>, vector<8x256xf32> -> vector<8x256xf32>
    %7 = arith.addf %3, %6 : vector<8x256xf32>
    %c0_6 = arith.constant 0 : index
    %c0_7 = arith.constant 0 : index
    %8 = vector.load %arg7[%c0_6, %c0_7] : memref<8x256xf32, #tpu.memory_space<vmem>>, vector<8x256xf32>
    tpu.vector_store %arg7[%c0_6, %c0_7], %7 {strides = array<i32>} : memref<8x256xf32, #tpu.memory_space<vmem>>, vector<8x256xf32>,
    %c1_i32 = arith.constant 1 : i32
    %9 = arith.cmpi eq, %arg2, %c1_i32 : i32
    %10 = arith.extui %9 : i1 to i32
    %c0_i32_8 = arith.constant 0 : i32
    %11 = arith.cmpi ne, %10, %c0_i32_8 : i32
    scf.if %11 {
      %c0_9 = arith.constant 0 : index
      %c0_10 = arith.constant 0 : index
      %12 = vector.load %arg7[%c0_9, %c0_10] : memref<8x256xf32, #tpu.memory_space<vmem>>, vector<8x256xf32>
      %c0_11 = arith.constant 0 : index
      %c0_12 = arith.constant 0 : index
      %13 = vector.load %arg5[%c0_11, %c0_12] : memref<1x256xf32, #tpu.memory_space<vmem>>, vector<1x256xf32>
      %14 = vector.broadcast %13 : vector<1x256xf32> to vector<8x256xf32>
      %15 = arith.addf %12, %14 : vector<8x256xf32>
      %cst_13 = arith.constant 0.000000e+00 : f32
      %16 = vector.broadcast %cst_13 : f32 to vector<8x256xf32>
      %17 = arith.cmpf oge, %15, %16 : vector<8x256xf32>
      %cst_14 = arith.constant 0.00999999977 : f32
      %18 = vector.broadcast %cst_14 : f32 to vector<8x256xf32>
      %19 = arith.mulf %18, %15 : vector<8x256xf32>
      %20 = arith.select %17, %15, %19 : vector<8x256xi1>, vector<8x256xf32>
      %c0_15 = arith.constant 0 : index
      %c0_16 = arith.constant 0 : index
      %21 = vector.load %arg6[%c0_15, %c0_16] : memref<8x256xf32, #tpu.memory_space<vmem>>, vector<8x256xf32>
      tpu.vector_store %arg6[%c0_15, %c0_16], %20 {strides = array<i32>} : memref<8x256xf32, #tpu.memory_space<vmem>>, vector<8x256xf32>,
    } else {
    }
    return
  }
  func.func @transform_0(%arg0: i32, %arg1: i32, %arg2: i32) -> (i32, i32) {
    %c0_i32 = arith.constant 0 : i32
    return %arg0, %arg2 : i32, i32
  }
  func.func @transform_1(%arg0: i32, %arg1: i32, %arg2: i32) -> (i32, i32) {
    %c0_i32 = arith.constant 0 : i32
    return %arg2, %arg1 : i32, i32
  }
  func.func @transform_2(%arg0: i32, %arg1: i32, %arg2: i32) -> (i32, i32) {
    %c0_i32 = arith.constant 0 : i32
    %c0_i32_0 = arith.constant 0 : i32
    return %c0_i32, %arg1 : i32, i32
  }
  func.func @transform_3(%arg0: i32, %arg1: i32, %arg2: i32) -> (i32, i32) {
    %c0_i32 = arith.constant 0 : i32
    return %arg0, %arg1 : i32, i32
  }
}

module attributes {stable_mosaic.version = 11 : i64} {
  func.func @_matmul_bias_act_kernel(%arg0: i32, %arg1: i32, %arg2: i32, %arg3: memref<8x256xbf16, #tpu.memory_space<vmem>>, %arg4: memref<256x128xbf16, #tpu.memory_space<vmem>>, %arg5: memref<1x128xf32, #tpu.memory_space<vmem>>, %arg6: memref<8x128xf32, #tpu.memory_space<vmem>>, %arg7: memref<8x128xf32, #tpu.memory_space<vmem>>) attributes {dimension_semantics = [#tpu.dimension_semantics<parallel>, #tpu.dimension_semantics<parallel>, #tpu.dimension_semantics<arbitrary>], iteration_bounds = array<i64: 1, 1, 1>, scalar_prefetch = 0 : i64, scratch_operands = 1 : i64, tpu.core_type = #tpu.core_type<tc>, window_params = [{transform_indices = @transform_0, window_bounds = array<i64: 8, 256>}, {transform_indices = @transform_1, window_bounds = array<i64: 256, 128>}, {transform_indices = @transform_2, window_bounds = array<i64: 1, 128>}, {transform_indices = @transform_3, window_bounds = array<i64: 8, 128>}]} {
    %c0_i32 = arith.constant 0 : i32
    %0 = arith.cmpi eq, %arg2, %c0_i32 : i32
    %1 = arith.extui %0 : i1 to i32
    %c0_i32_0 = arith.constant 0 : i32
    %2 = arith.cmpi ne, %1, %c0_i32_0 : i32
    scf.if %2 {
      %cst_10 = arith.constant 0.000000e+00 : f32
      %12 = vector.broadcast %cst_10 : f32 to vector<8x128xf32>
      %c0_11 = arith.constant 0 : index
      %c0_12 = arith.constant 0 : index
      %13 = vector.load %arg7[%c0_11, %c0_12] : memref<8x128xf32, #tpu.memory_space<vmem>>, vector<8x128xf32>
      tpu.vector_store %arg7[%c0_11, %c0_12], %12 {strides = array<i32>} : memref<8x128xf32, #tpu.memory_space<vmem>>, vector<8x128xf32>,
    } else {
    }
    %c0 = arith.constant 0 : index
    %c0_1 = arith.constant 0 : index
    %3 = vector.load %arg7[%c0, %c0_1] : memref<8x128xf32, #tpu.memory_space<vmem>>, vector<8x128xf32>
    %c0_2 = arith.constant 0 : index
    %c0_3 = arith.constant 0 : index
    %4 = vector.load %arg3[%c0_2, %c0_3] : memref<8x256xbf16, #tpu.memory_space<vmem>>, vector<8x256xbf16>
    %c0_4 = arith.constant 0 : index
    %c0_5 = arith.constant 0 : index
    %5 = vector.load %arg4[%c0_4, %c0_5] : memref<256x128xbf16, #tpu.memory_space<vmem>>, vector<256x128xbf16>
    %cst = arith.constant dense<0.000000e+00> : vector<8x128xf32>
    %6 = tpu.matmul %4, %5, %cst {dimension_numbers = #tpu.dot_dimension_numbers<[1], [0], [0], [1], [0, 0, 1, 1], [], []>} : vector<8x256xbf16>, vector<256x128xbf16>, vector<8x128xf32> -> vector<8x128xf32>
    %7 = arith.addf %3, %6 : vector<8x128xf32>
    %c0_6 = arith.constant 0 : index
    %c0_7 = arith.constant 0 : index
    %8 = vector.load %arg7[%c0_6, %c0_7] : memref<8x128xf32, #tpu.memory_space<vmem>>, vector<8x128xf32>
    tpu.vector_store %arg7[%c0_6, %c0_7], %7 {strides = array<i32>} : memref<8x128xf32, #tpu.memory_space<vmem>>, vector<8x128xf32>,
    %c0_i32_8 = arith.constant 0 : i32
    %9 = arith.cmpi eq, %arg2, %c0_i32_8 : i32
    %10 = arith.extui %9 : i1 to i32
    %c0_i32_9 = arith.constant 0 : i32
    %11 = arith.cmpi ne, %10, %c0_i32_9 : i32
    scf.if %11 {
      %c0_10 = arith.constant 0 : index
      %c0_11 = arith.constant 0 : index
      %12 = vector.load %arg7[%c0_10, %c0_11] : memref<8x128xf32, #tpu.memory_space<vmem>>, vector<8x128xf32>
      %c0_12 = arith.constant 0 : index
      %c0_13 = arith.constant 0 : index
      %13 = vector.load %arg5[%c0_12, %c0_13] : memref<1x128xf32, #tpu.memory_space<vmem>>, vector<1x128xf32>
      %14 = vector.broadcast %13 : vector<1x128xf32> to vector<8x128xf32>
      %15 = arith.addf %12, %14 : vector<8x128xf32>
      %c0_14 = arith.constant 0 : index
      %c0_15 = arith.constant 0 : index
      %16 = vector.load %arg6[%c0_14, %c0_15] : memref<8x128xf32, #tpu.memory_space<vmem>>, vector<8x128xf32>
      tpu.vector_store %arg6[%c0_14, %c0_15], %15 {strides = array<i32>} : memref<8x128xf32, #tpu.memory_space<vmem>>, vector<8x128xf32>,
    } else {
    }
    return
  }
  func.func @transform_0(%arg0: i32, %arg1: i32, %arg2: i32) -> (i32, i32) {
    %c0_i32 = arith.constant 0 : i32
    return %arg0, %arg2 : i32, i32
  }
  func.func @transform_1(%arg0: i32, %arg1: i32, %arg2: i32) -> (i32, i32) {
    %c0_i32 = arith.constant 0 : i32
    return %arg2, %arg1 : i32, i32
  }
  func.func @transform_2(%arg0: i32, %arg1: i32, %arg2: i32) -> (i32, i32) {
    %c0_i32 = arith.constant 0 : i32
    %c0_i32_0 = arith.constant 0 : i32
    return %c0_i32, %arg1 : i32, i32
  }
  func.func @transform_3(%arg0: i32, %arg1: i32, %arg2: i32) -> (i32, i32) {
    %c0_i32 = arith.constant 0 : i32
    return %arg0, %arg1 : i32, i32
  }
}

</mosaic_0001>

<bundles_post_ra>
// kernel: dis_pair_forward.5
= control target key start
LH: loop header
LB: loop body
LE: loop exit
PB: predicated region body
PF: predicated region fallthrough
CT: control target
= control target key end

     0   :  { %s1784_s1 = inlined_call_operand.vmem [shape: bf16[128,128], index: 1, kind: input, shape index: {}]   ;;  %s1785_s2 = inlined_call_operand.vmem [shape: f32[1,128], index: 2, kind: input, shape index: {}]   ;;  %s1786_s0 = inlined_call_operand.vmem [shape: bf16[512,128], index: 0, kind: input, shape index: {}]   ;;  %s1787_s3 = inlined_call_operand.vmem [shape: f32[512,128], index: 3, kind: output, shape index: {}]  }
   0x1   :  { %v1357_v0 = vld [vmem:[%s1784_s1 + $0x38] sm:$0xff]  ;;  %v1356_v1 = vld [vmem:[%s1784_s1 + $0x30] sm:$0xff]  ;;  %v1355_v2 = vld [vmem:[%s1784_s1 + $0x28] sm:$0xff] }
   0x2   :  { %466 = vmatpush.bf16.msra.mxu0 %v1357_v0  ;;  %1358 = vmatpush.bf16.msra.mxu1 %v1357_v0  ;;  %v1354_v3 = vld [vmem:[%s1784_s1 + $0x20] sm:$0xff]  ;;  %v1353_v4 = vld [vmem:[%s1784_s1 + $0x18] sm:$0xff]  ;;  %v1352_v5 = vld [vmem:[%s1784_s1 + $0x10] sm:$0xff] }
   0x3   :  { %1359 = vmatpush.bf16.msra.mxu2 %v1357_v0  ;;  %1360 = vmatpush.bf16.msra.mxu3 %v1357_v0  ;;  %v1351_v6 = vld [vmem:[%s1784_s1 + $0x8] sm:$0xff]  ;;  %v1350_v7 = vld [vmem:[%s1784_s1] sm:$0xff]  ;;  %v1320_v16 = vld [vmem:[%s1786_s0 + $0x10] sm:$0xff] }
   0x4   :  { %v1318_v8 = vld [vmem:[%s1786_s0] sm:$0xff]  ;;  %v1319_v12 = vld [vmem:[%s1786_s0 + $0x8] sm:$0xff]  ;;  %v1328_v17 = vld [vmem:[%s1786_s0 + $0x50] sm:$0xff] }
   0x5   :  { %v1326_v9 = vld [vmem:[%s1786_s0 + $0x40] sm:$0xff]  ;;  %v1327_v13 = vld [vmem:[%s1786_s0 + $0x48] sm:$0xff]  ;;  %v1336_v18 = vld [vmem:[%s1786_s0 + $0x90] sm:$0xff] }
   0x6   :  { %467 = vmatpush.bf16.msra.mxu0 %v1356_v1  ;;  %1361 = vmatpush.bf16.msra.mxu1 %v1356_v1  ;;  %v1334_v10 = vld [vmem:[%s1786_s0 + $0x80] sm:$0xff]  ;;  %v1335_v14 = vld [vmem:[%s1786_s0 + $0x88] sm:$0xff]  ;;  %v1344_v19 = vld [vmem:[%s1786_s0 + $0xd0] sm:$0xff] }
   0x7   :  { %1362 = vmatpush.bf16.msra.mxu2 %v1356_v1  ;;  %1363 = vmatpush.bf16.msra.mxu3 %v1356_v1  ;;  %v1342_v11 = vld [vmem:[%s1786_s0 + $0xc0] sm:$0xff]  ;;  %v1343_v15 = vld [vmem:[%s1786_s0 + $0xc8] sm:$0xff]  ;;  %v1321_v20 = vld [vmem:[%s1786_s0 + $0x18] sm:$0xff] }
   0x8   :  { %v1329_v21 = vld [vmem:[%s1786_s0 + $0x58] sm:$0xff]  ;;  %v1322_v24 = vld [vmem:[%s1786_s0 + $0x20] sm:$0xff]  ;;  %v1323_v28 = vld [vmem:[%s1786_s0 + $0x28] sm:$0xff] }
   0x9   :  { %v1337_v22 = vld [vmem:[%s1786_s0 + $0x98] sm:$0xff]  ;;  %v1330_v25 = vld [vmem:[%s1786_s0 + $0x60] sm:$0xff]  ;;  %v1331_v29 = vld [vmem:[%s1786_s0 + $0x68] sm:$0xff] }
   0xa   :  { %468 = vmatpush.bf16.msra.mxu0 %v1355_v2  ;;  %1364 = vmatpush.bf16.msra.mxu1 %v1355_v2  ;;  %v1345_v23 = vld [vmem:[%s1786_s0 + $0xd8] sm:$0xff]  ;;  %v1338_v26 = vld [vmem:[%s1786_s0 + $0xa0] sm:$0xff]  ;;  %v1339_v30 = vld [vmem:[%s1786_s0 + $0xa8] sm:$0xff] }
   0xb   :  { %1365 = vmatpush.bf16.msra.mxu2 %v1355_v2  ;;  %1366 = vmatpush.bf16.msra.mxu3 %v1355_v2  ;;  %v1346_v27 = vld [vmem:[%s1786_s0 + $0xe0] sm:$0xff]  ;;  %v1347_v31 = vld [vmem:[%s1786_s0 + $0xe8] sm:$0xff]  ;;  %v1324_v32 = vld [vmem:[%s1786_s0 + $0x30] sm:$0xff] }
   0xc   :  { %v1332_v33 = vld [vmem:[%s1786_s0 + $0x70] sm:$0xff]  ;;  %v1325_v36 = vld [vmem:[%s1786_s0 + $0x38] sm:$0xff]  ;;  %v1526_v40 = vld [vmem:[%s1785_s2] ss:$0 sm:$0xff] }
   0xd   :  { %v1340_v34 = vld [vmem:[%s1786_s0 + $0xb0] sm:$0xff]  ;;  %v1333_v37 = vld [vmem:[%s1786_s0 + $0x78] sm:$0xff] }
   0xe   :  { %469 = vmatpush.bf16.msra.mxu0 %v1354_v3  ;;  %1367 = vmatpush.bf16.msra.mxu1 %v1354_v3  ;;  %v1348_v35 = vld [vmem:[%s1786_s0 + $0xf0] sm:$0xff]  ;;  %v1341_v38 = vld [vmem:[%s1786_s0 + $0xb8] sm:$0xff] }
   0xf   :  { %1368 = vmatpush.bf16.msra.mxu2 %v1354_v3  ;;  %1369 = vmatpush.bf16.msra.mxu3 %v1354_v3  ;;  %v1349_v39 = vld [vmem:[%s1786_s0 + $0xf8] sm:$0xff] }
  0x12   :  { %470 = vmatpush.bf16.msra.mxu0 %v1353_v4  ;;  %1370 = vmatpush.bf16.msra.mxu1 %v1353_v4 }
  0x13   :  { %1371 = vmatpush.bf16.msra.mxu2 %v1353_v4  ;;  %1372 = vmatpush.bf16.msra.mxu3 %v1353_v4 }
  0x16   :  { %471 = vmatpush.bf16.msra.mxu0 %v1352_v5  ;;  %1373 = vmatpush.bf16.msra.mxu1 %v1352_v5 }
  0x17   :  { %1374 = vmatpush.bf16.msra.mxu2 %v1352_v5  ;;  %1375 = vmatpush.bf16.msra.mxu3 %v1352_v5 }
  0x1a   :  { %472 = vmatpush.bf16.msra.mxu0 %v1351_v6  ;;  %1376 = vmatpush.bf16.msra.mxu1 %v1351_v6 }
  0x1b   :  { %1377 = vmatpush.bf16.msra.mxu2 %v1351_v6  ;;  %1378 = vmatpush.bf16.msra.mxu3 %v1351_v6 }
  0x1e   :  { %473 = vmatpush.bf16.msra.mxu0 %v1350_v7  ;;  %1379 = vmatpush.bf16.msra.mxu1 %v1350_v7 }
  0x1f   :  { %1380 = vmatpush.bf16.msra.mxu2 %v1350_v7  ;;  %1381 = vmatpush.bf16.msra.mxu3 %v1350_v7 }
  0x21   :  { %474 = vmatmul.bf16.vlgmr.msra.gmra.mxu0 %v1318_v8  ;;  %514 = vmatmul.bf16.vlgmr.msra.gmra.mxu1 %v1326_v9 }
  0x22   :  { %554 = vmatmul.bf16.vlgmr.msra.gmra.mxu2 %v1334_v10  ;;  %594 = vmatmul.bf16.vlgmr.msra.gmra.mxu3 %v1342_v11 }
  0x31   :  { %479 = vmatmul.bf16.gmra.mxu0 %v1319_v12  ;;  %519 = vmatmul.bf16.gmra.mxu1 %v1327_v13 }
  0x32   :  { %559 = vmatmul.bf16.gmra.mxu2 %v1335_v14  ;;  %599 = vmatmul.bf16.gmra.mxu3 %v1343_v15 }
  0x41   :  { %484 = vmatmul.bf16.gmra.mxu0 %v1320_v16  ;;  %524 = vmatmul.bf16.gmra.mxu1 %v1328_v17 }
  0x42   :  { %564 = vmatmul.bf16.gmra.mxu2 %v1336_v18  ;;  %604 = vmatmul.bf16.gmra.mxu3 %v1344_v19 }
  0x51   :  { %489 = vmatmul.bf16.gmra.mxu0 %v1321_v20  ;;  %529 = vmatmul.bf16.gmra.mxu1 %v1329_v21 }
  0x52   :  { %569 = vmatmul.bf16.gmra.mxu2 %v1337_v22  ;;  %609 = vmatmul.bf16.gmra.mxu3 %v1345_v23 }
  0x61   :  { %494 = vmatmul.bf16.gmra.mxu0 %v1322_v24  ;;  %534 = vmatmul.bf16.gmra.mxu1 %v1330_v25 }
  0x62   :  { %574 = vmatmul.bf16.gmra.mxu2 %v1338_v26  ;;  %614 = vmatmul.bf16.gmra.mxu3 %v1346_v27 }
  0x71   :  { %499 = vmatmul.bf16.gmra.mxu0 %v1323_v28  ;;  %539 = vmatmul.bf16.gmra.mxu1 %v1331_v29 }
  0x72   :  { %579 = vmatmul.bf16.gmra.mxu2 %v1339_v30  ;;  %619 = vmatmul.bf16.gmra.mxu3 %v1347_v31 }
  0x81   :  { %504 = vmatmul.bf16.gmra.mxu0 %v1324_v32  ;;  %544 = vmatmul.bf16.gmra.mxu1 %v1332_v33 }
  0x82   :  { %584 = vmatmul.bf16.gmra.mxu2 %v1340_v34  ;;  %624 = vmatmul.bf16.gmra.mxu3 %v1348_v35 }
  0x91   :  { %509 = vmatmul.bf16.gmra.mxu0 %v1325_v36  ;;  %549 = vmatmul.bf16.gmra.mxu1 %v1333_v37 }
  0x92   :  { %589 = vmatmul.bf16.gmra.mxu2 %v1341_v38  ;;  %629 = vmatmul.bf16.gmra.mxu3 %v1349_v39 }
  0x9e   :  { %v475_v41 = vpop.f32.mrf.mxu0  ;;  %v515_v42 = vpop.f32.mrf.mxu1 }
  0x9f   :  { %v834_v43 = vadd.f32 %v1526_v40, %v475_v41  ;;  %v850_v44 = vadd.f32 %v1526_v40, %v515_v42 }
  0xa1   :  { %vm898_vm0 = vcmp.ge.f32.partialorder %v834_v43, 0.0  ;;  %v962_v45 = vmul.f32 0.01, %v834_v43  ;;  %vm914_vm1 = vcmp.ge.f32.partialorder %v850_v44, 0.0  ;;  %v978_v46 = vmul.f32 0.01, %v850_v44 }
  0xa3   :  { %v1026_v47 = vsel %vm898_vm0, %v834_v43, %v962_v45  ;;  %v1042_v48 = vsel %vm914_vm1, %v850_v44, %v978_v46 }
  0xa4   :  { %1090 = vst [vmem:[%s1787_s3] sm:$0xff] %v1026_v47 }
  0xa5   :  { %1106 = vst [vmem:[%s1787_s3 + $0x80] sm:$0xff] %v1042_v48  ;;  %v555_v49 = vpop.f32.mrf.mxu2  ;;  %v595_v50 = vpop.f32.mrf.mxu3 }
  0xa6   :  { %v866_v51 = vadd.f32 %v1526_v40, %v555_v49  ;;  %v882_v52 = vadd.f32 %v1526_v40, %v595_v50  ;;  %v477_v53 = vpop.f32.mrf.mxu0  ;;  %v517_v54 = vpop.f32.mrf.mxu1 }
  0xa7   :  { %v835_v55 = vadd.f32 %v1526_v40, %v477_v53  ;;  %v851_v56 = vadd.f32 %v1526_v40, %v517_v54 }
  0xa8   :  { %vm930_vm2 = vcmp.ge.f32.partialorder %v866_v51, 0.0  ;;  %v994_v57 = vmul.f32 0.01, %v866_v51  ;;  %vm946_vm3 = vcmp.ge.f32.partialorder %v882_v52, 0.0  ;;  %v1010_v58 = vmul.f32 0.01, %v882_v52 }
  0xa9   :  { %vm899_vm4 = vcmp.ge.f32.partialorder %v835_v55, 0.0  ;;  %v963_v59 = vmul.f32 0.01, %v835_v55  ;;  %vm915_vm5 = vcmp.ge.f32.partialorder %v851_v56, 0.0  ;;  %v979_v60 = vmul.f32 0.01, %v851_v56 }
  0xaa   :  { %v1058_v61 = vsel %vm930_vm2, %v866_v51, %v994_v57  ;;  %v1074_v62 = vsel %vm946_vm3, %v882_v52, %v1010_v58 }
  0xab   :  { %1122 = vst [vmem:[%s1787_s3 + $0x100] sm:$0xff] %v1058_v61  ;;  %v1027_v63 = vsel %vm899_vm4, %v835_v55, %v963_v59  ;;  %v1043_v0 = vsel %vm915_vm5, %v851_v56, %v979_v60 }
  0xac   :  { %1138 = vst [vmem:[%s1787_s3 + $0x180] sm:$0xff] %v1074_v62 }
  0xad   :  { %1091 = vst [vmem:[%s1787_s3 + $0x8] sm:$0xff] %v1027_v63  ;;  %v557_v1 = vpop.f32.mrf.mxu2  ;;  %v597_v2 = vpop.f32.mrf.mxu3 }
  0xae   :  { %1107 = vst [vmem:[%s1787_s3 + $0x88] sm:$0xff] %v1043_v0  ;;  %v867_v3 = vadd.f32 %v1526_v40, %v557_v1  ;;  %v883_v4 = vadd.f32 %v1526_v40, %v597_v2  ;;  %v480_v5 = vpop.f32.mrf.mxu0  ;;  %v520_v6 = vpop.f32.mrf.mxu1 }
  0xaf   :  { %v836_v7 = vadd.f32 %v1526_v40, %v480_v5  ;;  %v852_v8 = vadd.f32 %v1526_v40, %v520_v6 }
  0xb0   :  { %vm931_vm6 = vcmp.ge.f32.partialorder %v867_v3, 0.0  ;;  %v995_v9 = vmul.f32 0.01, %v867_v3  ;;  %vm947_vm7 = vcmp.ge.f32.partialorder %v883_v4, 0.0  ;;  %v1011_v10 = vmul.f32 0.01, %v883_v4 }
  0xb1   :  { %vm900_vm8 = vcmp.ge.f32.partialorder %v836_v7, 0.0  ;;  %v964_v11 = vmul.f32 0.01, %v836_v7  ;;  %vm916_vm9 = vcmp.ge.f32.partialorder %v852_v8, 0.0  ;;  %v980_v12 = vmul.f32 0.01, %v852_v8 }
  0xb2   :  { %v1059_v13 = vsel %vm931_vm6, %v867_v3, %v995_v9  ;;  %v1075_v14 = vsel %vm947_vm7, %v883_v4, %v1011_v10 }
  0xb3   :  { %1123 = vst [vmem:[%s1787_s3 + $0x108] sm:$0xff] %v1059_v13  ;;  %v1028_v15 = vsel %vm900_vm8, %v836_v7, %v964_v11  ;;  %v1044_v16 = vsel %vm916_vm9, %v852_v8, %v980_v12 }
  0xb4   :  { %1139 = vst [vmem:[%s1787_s3 + $0x188] sm:$0xff] %v1075_v14 }
  0xb5   :  { %1092 = vst [vmem:[%s1787_s3 + $0x10] sm:$0xff] %v1028_v15  ;;  %v560_v17 = vpop.f32.mrf.mxu2  ;;  %v600_v18 = vpop.f32.mrf.mxu3 }
  0xb6   :  { %1108 = vst [vmem:[%s1787_s3 + $0x90] sm:$0xff] %v1044_v16  ;;  %v868_v19 = vadd.f32 %v1526_v40, %v560_v17  ;;  %v884_v20 = vadd.f32 %v1526_v40, %v600_v18  ;;  %v482_v21 = vpop.f32.mrf.mxu0  ;;  %v522_v22 = vpop.f32.mrf.mxu1 }
  0xb7   :  { %v837_v23 = vadd.f32 %v1526_v40, %v482_v21  ;;  %v853_v24 = vadd.f32 %v1526_v40, %v522_v22 }
  0xb8   :  { %vm932_vm10 = vcmp.ge.f32.partialorder %v868_v19, 0.0  ;;  %v996_v25 = vmul.f32 0.01, %v868_v19  ;;  %vm948_vm11 = vcmp.ge.f32.partialorder %v884_v20, 0.0  ;;  %v1012_v26 = vmul.f32 0.01, %v884_v20 }
  0xb9   :  { %vm901_vm12 = vcmp.ge.f32.partialorder %v837_v23, 0.0  ;;  %v965_v27 = vmul.f32 0.01, %v837_v23  ;;  %vm917_vm13 = vcmp.ge.f32.partialorder %v853_v24, 0.0  ;;  %v981_v28 = vmul.f32 0.01, %v853_v24 }
  0xba   :  { %v1060_v29 = vsel %vm932_vm10, %v868_v19, %v996_v25  ;;  %v1076_v30 = vsel %vm948_vm11, %v884_v20, %v1012_v26 }
  0xbb   :  { %1124 = vst [vmem:[%s1787_s3 + $0x110] sm:$0xff] %v1060_v29  ;;  %v1029_v31 = vsel %vm901_vm12, %v837_v23, %v965_v27  ;;  %v1045_v32 = vsel %vm917_vm13, %v853_v24, %v981_v28 }
  0xbc   :  { %1140 = vst [vmem:[%s1787_s3 + $0x190] sm:$0xff] %v1076_v30 }
  0xbd   :  { %1093 = vst [vmem:[%s1787_s3 + $0x18] sm:$0xff] %v1029_v31  ;;  %v562_v33 = vpop.f32.mrf.mxu2  ;;  %v602_v34 = vpop.f32.mrf.mxu3 }
  0xbe   :  { %1109 = vst [vmem:[%s1787_s3 + $0x98] sm:$0xff] %v1045_v32  ;;  %v869_v35 = vadd.f32 %v1526_v40, %v562_v33  ;;  %v885_v36 = vadd.f32 %v1526_v40, %v602_v34  ;;  %v485_v37 = vpop.f32.mrf.mxu0  ;;  %v525_v38 = vpop.f32.mrf.mxu1 }
  0xbf   :  { %v838_v39 = vadd.f32 %v1526_v40, %v485_v37  ;;  %v854_v41 = vadd.f32 %v1526_v40, %v525_v38 }
  0xc0   :  { %vm933_vm14 = vcmp.ge.f32.partialorder %v869_v35, 0.0  ;;  %v997_v42 = vmul.f32 0.01, %v869_v35  ;;  %vm949_vm15 = vcmp.ge.f32.partialorder %v885_v36, 0.0  ;;  %v1013_v43 = vmul.f32 0.01, %v885_v36 }
  0xc1   :  { %vm902_vm0 = vcmp.ge.f32.partialorder %v838_v39, 0.0  ;;  %v966_v44 = vmul.f32 0.01, %v838_v39  ;;  %vm918_vm1 = vcmp.ge.f32.partialorder %v854_v41, 0.0  ;;  %v982_v45 = vmul.f32 0.01, %v854_v41 }
  0xc2   :  { %v1061_v46 = vsel %vm933_vm14, %v869_v35, %v997_v42  ;;  %v1077_v47 = vsel %vm949_vm15, %v885_v36, %v1013_v43 }
  0xc3   :  { %1125 = vst [vmem:[%s1787_s3 + $0x118] sm:$0xff] %v1061_v46  ;;  %v1030_v48 = vsel %vm902_vm0, %v838_v39, %v966_v44  ;;  %v1046_v49 = vsel %vm918_vm1, %v854_v41, %v982_v45 }
  0xc4   :  { %1141 = vst [vmem:[%s1787_s3 + $0x198] sm:$0xff] %v1077_v47 }
  0xc5   :  { %1094 = vst [vmem:[%s1787_s3 + $0x20] sm:$0xff] %v1030_v48  ;;  %v565_v50 = vpop.f32.mrf.mxu2  ;;  %v605_v51 = vpop.f32.mrf.mxu3 }
  0xc6   :  { %1110 = vst [vmem:[%s1787_s3 + $0xa0] sm:$0xff] %v1046_v49  ;;  %v870_v52 = vadd.f32 %v1526_v40, %v565_v50  ;;  %v886_v53 = vadd.f32 %v1526_v40, %v605_v51  ;;  %v487_v54 = vpop.f32.mrf.mxu0  ;;  %v527_v55 = vpop.f32.mrf.mxu1 }
  0xc7   :  { %v839_v56 = vadd.f32 %v1526_v40, %v487_v54  ;;  %v855_v57 = vadd.f32 %v1526_v40, %v527_v55 }
  0xc8   :  { %vm934_vm2 = vcmp.ge.f32.partialorder %v870_v52, 0.0  ;;  %v998_v58 = vmul.f32 0.01, %v870_v52  ;;  %vm950_vm3 = vcmp.ge.f32.partialorder %v886_v53, 0.0  ;;  %v1014_v59 = vmul.f32 0.01, %v886_v53 }
  0xc9   :  { %vm903_vm4 = vcmp.ge.f32.partialorder %v839_v56, 0.0  ;;  %v967_v60 = vmul.f32 0.01, %v839_v56  ;;  %vm919_vm5 = vcmp.ge.f32.partialorder %v855_v57, 0.0  ;;  %v983_v61 = vmul.f32 0.01, %v855_v57 }
  0xca   :  { %v1062_v62 = vsel %vm934_vm2, %v870_v52, %v998_v58  ;;  %v1078_v63 = vsel %vm950_vm3, %v886_v53, %v1014_v59 }
  0xcb   :  { %1126 = vst [vmem:[%s1787_s3 + $0x120] sm:$0xff] %v1062_v62  ;;  %v1031_v0 = vsel %vm903_vm4, %v839_v56, %v967_v60  ;;  %v1047_v1 = vsel %vm919_vm5, %v855_v57, %v983_v61 }
  0xcc   :  { %1142 = vst [vmem:[%s1787_s3 + $0x1a0] sm:$0xff] %v1078_v63 }
  0xcd   :  { %1095 = vst [vmem:[%s1787_s3 + $0x28] sm:$0xff] %v1031_v0  ;;  %v567_v2 = vpop.f32.mrf.mxu2  ;;  %v607_v3 = vpop.f32.mrf.mxu3 }
  0xce   :  { %1111 = vst [vmem:[%s1787_s3 + $0xa8] sm:$0xff] %v1047_v1  ;;  %v871_v4 = vadd.f32 %v1526_v40, %v567_v2  ;;  %v887_v5 = vadd.f32 %v1526_v40, %v607_v3  ;;  %v490_v6 = vpop.f32.mrf.mxu0  ;;  %v530_v7 = vpop.f32.mrf.mxu1 }
  0xcf   :  { %v840_v8 = vadd.f32 %v1526_v40, %v490_v6  ;;  %v856_v9 = vadd.f32 %v1526_v40, %v530_v7 }
  0xd0   :  { %vm935_vm6 = vcmp.ge.f32.partialorder %v871_v4, 0.0  ;;  %v999_v10 = vmul.f32 0.01, %v871_v4  ;;  %vm951_vm7 = vcmp.ge.f32.partialorder %v887_v5, 0.0  ;;  %v1015_v11 = vmul.f32 0.01, %v887_v5 }
  0xd1   :  { %vm904_vm8 = vcmp.ge.f32.partialorder %v840_v8, 0.0  ;;  %v968_v12 = vmul.f32 0.01, %v840_v8  ;;  %vm920_vm9 = vcmp.ge.f32.partialorder %v856_v9, 0.0  ;;  %v984_v13 = vmul.f32 0.01, %v856_v9 }
  0xd2   :  { %v1063_v14 = vsel %vm935_vm6, %v871_v4, %v999_v10  ;;  %v1079_v15 = vsel %vm951_vm7, %v887_v5, %v1015_v11 }
  0xd3   :  { %1127 = vst [vmem:[%s1787_s3 + $0x128] sm:$0xff] %v1063_v14  ;;  %v1032_v16 = vsel %vm904_vm8, %v840_v8, %v968_v12  ;;  %v1048_v17 = vsel %vm920_vm9, %v856_v9, %v984_v13 }
  0xd4   :  { %1143 = vst [vmem:[%s1787_s3 + $0x1a8] sm:$0xff] %v1079_v15 }
  0xd5   :  { %1096 = vst [vmem:[%s1787_s3 + $0x30] sm:$0xff] %v1032_v16  ;;  %v570_v18 = vpop.f32.mrf.mxu2  ;;  %v610_v19 = vpop.f32.mrf.mxu3 }
  0xd6   :  { %1112 = vst [vmem:[%s1787_s3 + $0xb0] sm:$0xff] %v1048_v17  ;;  %v872_v20 = vadd.f32 %v1526_v40, %v570_v18  ;;  %v888_v21 = vadd.f32 %v1526_v40, %v610_v19  ;;  %v492_v22 = vpop.f32.mrf.mxu0  ;;  %v532_v23 = vpop.f32.mrf.mxu1 }
  0xd7   :  { %v841_v24 = vadd.f32 %v1526_v40, %v492_v22  ;;  %v857_v25 = vadd.f32 %v1526_v40, %v532_v23 }
  0xd8   :  { %vm936_vm10 = vcmp.ge.f32.partialorder %v872_v20, 0.0  ;;  %v1000_v26 = vmul.f32 0.01, %v872_v20  ;;  %vm952_vm11 = vcmp.ge.f32.partialorder %v888_v21, 0.0  ;;  %v1016_v27 = vmul.f32 0.01, %v888_v21 }
  0xd9   :  { %vm905_vm12 = vcmp.ge.f32.partialorder %v841_v24, 0.0  ;;  %v969_v28 = vmul.f32 0.01, %v841_v24  ;;  %vm921_vm13 = vcmp.ge.f32.partialorder %v857_v25, 0.0  ;;  %v985_v29 = vmul.f32 0.01, %v857_v25 }
  0xda   :  { %v1064_v30 = vsel %vm936_vm10, %v872_v20, %v1000_v26  ;;  %v1080_v31 = vsel %vm952_vm11, %v888_v21, %v1016_v27 }
  0xdb   :  { %1128 = vst [vmem:[%s1787_s3 + $0x130] sm:$0xff] %v1064_v30  ;;  %v1033_v32 = vsel %vm905_vm12, %v841_v24, %v969_v28  ;;  %v1049_v33 = vsel %vm921_vm13, %v857_v25, %v985_v29 }
  0xdc   :  { %1144 = vst [vmem:[%s1787_s3 + $0x1b0] sm:$0xff] %v1080_v31 }
  0xdd   :  { %1097 = vst [vmem:[%s1787_s3 + $0x38] sm:$0xff] %v1033_v32  ;;  %v572_v34 = vpop.f32.mrf.mxu2  ;;  %v612_v35 = vpop.f32.mrf.mxu3 }
  0xde   :  { %1113 = vst [vmem:[%s1787_s3 + $0xb8] sm:$0xff] %v1049_v33  ;;  %v873_v36 = vadd.f32 %v1526_v40, %v572_v34  ;;  %v889_v37 = vadd.f32 %v1526_v40, %v612_v35  ;;  %v495_v38 = vpop.f32.mrf.mxu0  ;;  %v535_v39 = vpop.f32.mrf.mxu1 }
  0xdf   :  { %v842_v41 = vadd.f32 %v1526_v40, %v495_v38  ;;  %v858_v42 = vadd.f32 %v1526_v40, %v535_v39 }
  0xe0   :  { %vm937_vm14 = vcmp.ge.f32.partialorder %v873_v36, 0.0  ;;  %v1001_v43 = vmul.f32 0.01, %v873_v36  ;;  %vm953_vm15 = vcmp.ge.f32.partialorder %v889_v37, 0.0  ;;  %v1017_v44 = vmul.f32 0.01, %v889_v37 }
  0xe1   :  { %vm906_vm0 = vcmp.ge.f32.partialorder %v842_v41, 0.0  ;;  %v970_v45 = vmul.f32 0.01, %v842_v41  ;;  %vm922_vm1 = vcmp.ge.f32.partialorder %v858_v42, 0.0  ;;  %v986_v46 = vmul.f32 0.01, %v858_v42 }
  0xe2   :  { %v1065_v47 = vsel %vm937_vm14, %v873_v36, %v1001_v43  ;;  %v1081_v48 = vsel %vm953_vm15, %v889_v37, %v1017_v44 }
  0xe3   :  { %1129 = vst [vmem:[%s1787_s3 + $0x138] sm:$0xff] %v1065_v47  ;;  %v1034_v49 = vsel %vm906_vm0, %v842_v41, %v970_v45  ;;  %v1050_v50 = vsel %vm922_vm1, %v858_v42, %v986_v46 }
  0xe4   :  { %1145 = vst [vmem:[%s1787_s3 + $0x1b8] sm:$0xff] %v1081_v48 }
  0xe5   :  { %1098 = vst [vmem:[%s1787_s3 + $0x40] sm:$0xff] %v1034_v49  ;;  %v575_v51 = vpop.f32.mrf.mxu2  ;;  %v615_v52 = vpop.f32.mrf.mxu3 }
  0xe6   :  { %1114 = vst [vmem:[%s1787_s3 + $0xc0] sm:$0xff] %v1050_v50  ;;  %v874_v53 = vadd.f32 %v1526_v40, %v575_v51  ;;  %v890_v54 = vadd.f32 %v1526_v40, %v615_v52  ;;  %v497_v55 = vpop.f32.mrf.mxu0  ;;  %v537_v56 = vpop.f32.mrf.mxu1 }
  0xe7   :  { %v843_v57 = vadd.f32 %v1526_v40, %v497_v55  ;;  %v859_v58 = vadd.f32 %v1526_v40, %v537_v56 }
  0xe8   :  { %vm938_vm2 = vcmp.ge.f32.partialorder %v874_v53, 0.0  ;;  %v1002_v59 = vmul.f32 0.01, %v874_v53  ;;  %vm954_vm3 = vcmp.ge.f32.partialorder %v890_v54, 0.0  ;;  %v1018_v60 = vmul.f32 0.01, %v890_v54 }
  0xe9   :  { %vm907_vm4 = vcmp.ge.f32.partialorder %v843_v57, 0.0  ;;  %v971_v61 = vmul.f32 0.01, %v843_v57  ;;  %vm923_vm5 = vcmp.ge.f32.partialorder %v859_v58, 0.0  ;;  %v987_v62 = vmul.f32 0.01, %v859_v58 }
  0xea   :  { %v1066_v63 = vsel %vm938_vm2, %v874_v53, %v1002_v59  ;;  %v1082_v0 = vsel %vm954_vm3, %v890_v54, %v1018_v60 }
  0xeb   :  { %1130 = vst [vmem:[%s1787_s3 + $0x140] sm:$0xff] %v1066_v63  ;;  %v1035_v1 = vsel %vm907_vm4, %v843_v57, %v971_v61  ;;  %v1051_v2 = vsel %vm923_vm5, %v859_v58, %v987_v62 }
  0xec   :  { %1146 = vst [vmem:[%s1787_s3 + $0x1c0] sm:$0xff] %v1082_v0 }
  0xed   :  { %1099 = vst [vmem:[%s1787_s3 + $0x48] sm:$0xff] %v1035_v1  ;;  %v577_v3 = vpop.f32.mrf.mxu2  ;;  %v617_v4 = vpop.f32.mrf.mxu3 }
  0xee   :  { %1115 = vst [vmem:[%s1787_s3 + $0xc8] sm:$0xff] %v1051_v2  ;;  %v875_v5 = vadd.f32 %v1526_v40, %v577_v3  ;;  %v891_v6 = vadd.f32 %v1526_v40, %v617_v4  ;;  %v500_v7 = vpop.f32.mrf.mxu0  ;;  %v540_v8 = vpop.f32.mrf.mxu1 }
  0xef   :  { %v844_v9 = vadd.f32 %v1526_v40, %v500_v7  ;;  %v860_v10 = vadd.f32 %v1526_v40, %v540_v8 }
  0xf0   :  { %vm939_vm6 = vcmp.ge.f32.partialorder %v875_v5, 0.0  ;;  %v1003_v11 = vmul.f32 0.01, %v875_v5  ;;  %vm955_vm7 = vcmp.ge.f32.partialorder %v891_v6, 0.0  ;;  %v1019_v12 = vmul.f32 0.01, %v891_v6 }
  0xf1   :  { %vm908_vm8 = vcmp.ge.f32.partialorder %v844_v9, 0.0  ;;  %v972_v13 = vmul.f32 0.01, %v844_v9  ;;  %vm924_vm9 = vcmp.ge.f32.partialorder %v860_v10, 0.0  ;;  %v988_v14 = vmul.f32 0.01, %v860_v10 }
  0xf2   :  { %v1067_v15 = vsel %vm939_vm6, %v875_v5, %v1003_v11  ;;  %v1083_v16 = vsel %vm955_vm7, %v891_v6, %v1019_v12 }
  0xf3   :  { %1131 = vst [vmem:[%s1787_s3 + $0x148] sm:$0xff] %v1067_v15  ;;  %v1036_v17 = vsel %vm908_vm8, %v844_v9, %v972_v13  ;;  %v1052_v18 = vsel %vm924_vm9, %v860_v10, %v988_v14 }
  0xf4   :  { %1147 = vst [vmem:[%s1787_s3 + $0x1c8] sm:$0xff] %v1083_v16 }
  0xf5   :  { %1100 = vst [vmem:[%s1787_s3 + $0x50] sm:$0xff] %v1036_v17  ;;  %v580_v19 = vpop.f32.mrf.mxu2  ;;  %v620_v20 = vpop.f32.mrf.mxu3 }
  0xf6   :  { %1116 = vst [vmem:[%s1787_s3 + $0xd0] sm:$0xff] %v1052_v18  ;;  %v876_v21 = vadd.f32 %v1526_v40, %v580_v19  ;;  %v892_v22 = vadd.f32 %v1526_v40, %v620_v20  ;;  %v502_v23 = vpop.f32.mrf.mxu0  ;;  %v542_v24 = vpop.f32.mrf.mxu1 }
  0xf7   :  { %v845_v25 = vadd.f32 %v1526_v40, %v502_v23  ;;  %v861_v26 = vadd.f32 %v1526_v40, %v542_v24 }
  0xf8   :  { %vm940_vm10 = vcmp.ge.f32.partialorder %v876_v21, 0.0  ;;  %v1004_v27 = vmul.f32 0.01, %v876_v21  ;;  %vm956_vm11 = vcmp.ge.f32.partialorder %v892_v22, 0.0  ;;  %v1020_v28 = vmul.f32 0.01, %v892_v22 }
  0xf9   :  { %vm909_vm12 = vcmp.ge.f32.partialorder %v845_v25, 0.0  ;;  %v973_v29 = vmul.f32 0.01, %v845_v25  ;;  %vm925_vm13 = vcmp.ge.f32.partialorder %v861_v26, 0.0  ;;  %v989_v30 = vmul.f32 0.01, %v861_v26 }
  0xfa   :  { %v1068_v31 = vsel %vm940_vm10, %v876_v21, %v1004_v27  ;;  %v1084_v32 = vsel %vm956_vm11, %v892_v22, %v1020_v28 }
  0xfb   :  { %1132 = vst [vmem:[%s1787_s3 + $0x150] sm:$0xff] %v1068_v31  ;;  %v1037_v33 = vsel %vm909_vm12, %v845_v25, %v973_v29  ;;  %v1053_v34 = vsel %vm925_vm13, %v861_v26, %v989_v30 }
  0xfc   :  { %1148 = vst [vmem:[%s1787_s3 + $0x1d0] sm:$0xff] %v1084_v32 }
  0xfd   :  { %1101 = vst [vmem:[%s1787_s3 + $0x58] sm:$0xff] %v1037_v33  ;;  %v582_v35 = vpop.f32.mrf.mxu2  ;;  %v622_v36 = vpop.f32.mrf.mxu3 }
  0xfe   :  { %1117 = vst [vmem:[%s1787_s3 + $0xd8] sm:$0xff] %v1053_v34  ;;  %v877_v37 = vadd.f32 %v1526_v40, %v582_v35  ;;  %v893_v38 = vadd.f32 %v1526_v40, %v622_v36  ;;  %v505_v39 = vpop.f32.mrf.mxu0  ;;  %v545_v41 = vpop.f32.mrf.mxu1 }
  0xff   :  { %v846_v42 = vadd.f32 %v1526_v40, %v505_v39  ;;  %v862_v43 = vadd.f32 %v1526_v40, %v545_v41 }
 0x100   :  { %vm941_vm14 = vcmp.ge.f32.partialorder %v877_v37, 0.0  ;;  %v1005_v44 = vmul.f32 0.01, %v877_v37  ;;  %vm957_vm15 = vcmp.ge.f32.partialorder %v893_v38, 0.0  ;;  %v1021_v45 = vmul.f32 0.01, %v893_v38 }
 0x101   :  { %vm910_vm0 = vcmp.ge.f32.partialorder %v846_v42, 0.0  ;;  %v974_v46 = vmul.f32 0.01, %v846_v42  ;;  %vm926_vm1 = vcmp.ge.f32.partialorder %v862_v43, 0.0  ;;  %v990_v47 = vmul.f32 0.01, %v862_v43 }
 0x102   :  { %v1069_v48 = vsel %vm941_vm14, %v877_v37, %v1005_v44  ;;  %v1085_v49 = vsel %vm957_vm15, %v893_v38, %v1021_v45 }
 0x103   :  { %1133 = vst [vmem:[%s1787_s3 + $0x158] sm:$0xff] %v1069_v48  ;;  %v1038_v50 = vsel %vm910_vm0, %v846_v42, %v974_v46  ;;  %v1054_v51 = vsel %vm926_vm1, %v862_v43, %v990_v47 }
 0x104   :  { %1149 = vst [vmem:[%s1787_s3 + $0x1d8] sm:$0xff] %v1085_v49 }
 0x105   :  { %1102 = vst [vmem:[%s1787_s3 + $0x60] sm:$0xff] %v1038_v50  ;;  %v585_v52 = vpop.f32.mrf.mxu2  ;;  %v625_v53 = vpop.f32.mrf.mxu3 }
 0x106   :  { %1118 = vst [vmem:[%s1787_s3 + $0xe0] sm:$0xff] %v1054_v51  ;;  %v878_v54 = vadd.f32 %v1526_v40, %v585_v52  ;;  %v894_v55 = vadd.f32 %v1526_v40, %v625_v53  ;;  %v507_v56 = vpop.f32.mrf.mxu0  ;;  %v547_v57 = vpop.f32.mrf.mxu1 }
 0x107   :  { %v847_v58 = vadd.f32 %v1526_v40, %v507_v56  ;;  %v863_v59 = vadd.f32 %v1526_v40, %v547_v57 }
 0x108   :  { %vm942_vm2 = vcmp.ge.f32.partialorder %v878_v54, 0.0  ;;  %v1006_v60 = vmul.f32 0.01, %v878_v54  ;;  %vm958_vm3 = vcmp.ge.f32.partialorder %v894_v55, 0.0  ;;  %v1022_v61 = vmul.f32 0.01, %v894_v55 }
 0x109   :  { %vm911_vm4 = vcmp.ge.f32.partialorder %v847_v58, 0.0  ;;  %v975_v62 = vmul.f32 0.01, %v847_v58  ;;  %vm927_vm5 = vcmp.ge.f32.partialorder %v863_v59, 0.0  ;;  %v991_v63 = vmul.f32 0.01, %v863_v59 }
 0x10a   :  { %v1070_v0 = vsel %vm942_vm2, %v878_v54, %v1006_v60  ;;  %v1086_v1 = vsel %vm958_vm3, %v894_v55, %v1022_v61 }
 0x10b   :  { %1134 = vst [vmem:[%s1787_s3 + $0x160] sm:$0xff] %v1070_v0  ;;  %v1039_v2 = vsel %vm911_vm4, %v847_v58, %v975_v62  ;;  %v1055_v3 = vsel %vm927_vm5, %v863_v59, %v991_v63 }
 0x10c   :  { %1150 = vst [vmem:[%s1787_s3 + $0x1e0] sm:$0xff] %v1086_v1 }
 0x10d   :  { %1103 = vst [vmem:[%s1787_s3 + $0x68] sm:$0xff] %v1039_v2  ;;  %v587_v4 = vpop.f32.mrf.mxu2  ;;  %v627_v5 = vpop.f32.mrf.mxu3 }
 0x10e   :  { %1119 = vst [vmem:[%s1787_s3 + $0xe8] sm:$0xff] %v1055_v3  ;;  %v879_v6 = vadd.f32 %v1526_v40, %v587_v4  ;;  %v895_v7 = vadd.f32 %v1526_v40, %v627_v5  ;;  %v510_v8 = vpop.f32.mrf.mxu0  ;;  %v550_v9 = vpop.f32.mrf.mxu1 }
 0x10f   :  { %v848_v10 = vadd.f32 %v1526_v40, %v510_v8  ;;  %v864_v11 = vadd.f32 %v1526_v40, %v550_v9 }
 0x110   :  { %vm943_vm6 = vcmp.ge.f32.partialorder %v879_v6, 0.0  ;;  %v1007_v12 = vmul.f32 0.01, %v879_v6  ;;  %vm959_vm7 = vcmp.ge.f32.partialorder %v895_v7, 0.0  ;;  %v1023_v13 = vmul.f32 0.01, %v895_v7 }
 0x111   :  { %vm912_vm8 = vcmp.ge.f32.partialorder %v848_v10, 0.0  ;;  %v976_v14 = vmul.f32 0.01, %v848_v10  ;;  %vm928_vm9 = vcmp.ge.f32.partialorder %v864_v11, 0.0  ;;  %v992_v15 = vmul.f32 0.01, %v864_v11 }
 0x112   :  { %v1071_v16 = vsel %vm943_vm6, %v879_v6, %v1007_v12  ;;  %v1087_v17 = vsel %vm959_vm7, %v895_v7, %v1023_v13 }
 0x113   :  { %1135 = vst [vmem:[%s1787_s3 + $0x168] sm:$0xff] %v1071_v16  ;;  %v1040_v18 = vsel %vm912_vm8, %v848_v10, %v976_v14  ;;  %v1056_v19 = vsel %vm928_vm9, %v864_v11, %v992_v15 }
 0x114   :  { %1151 = vst [vmem:[%s1787_s3 + $0x1e8] sm:$0xff] %v1087_v17 }
 0x115   :  { %1104 = vst [vmem:[%s1787_s3 + $0x70] sm:$0xff] %v1040_v18  ;;  %v590_v20 = vpop.f32.mrf.mxu2  ;;  %v630_v21 = vpop.f32.mrf.mxu3 }
 0x116   :  { %1120 = vst [vmem:[%s1787_s3 + $0xf0] sm:$0xff] %v1056_v19  ;;  %v880_v22 = vadd.f32 %v1526_v40, %v590_v20  ;;  %v896_v23 = vadd.f32 %v1526_v40, %v630_v21  ;;  %v512_v24 = vpop.f32.mrf.mxu0  ;;  %v552_v25 = vpop.f32.mrf.mxu1 }
 0x117   :  { %v849_v26 = vadd.f32 %v1526_v40, %v512_v24  ;;  %v865_v27 = vadd.f32 %v1526_v40, %v552_v25 }
 0x118   :  { %vm944_vm10 = vcmp.ge.f32.partialorder %v880_v22, 0.0  ;;  %v1008_v28 = vmul.f32 0.01, %v880_v22  ;;  %vm960_vm11 = vcmp.ge.f32.partialorder %v896_v23, 0.0  ;;  %v1024_v29 = vmul.f32 0.01, %v896_v23 }
 0x119   :  { %vm913_vm12 = vcmp.ge.f32.partialorder %v849_v26, 0.0  ;;  %v977_v30 = vmul.f32 0.01, %v849_v26  ;;  %vm929_vm13 = vcmp.ge.f32.partialorder %v865_v27, 0.0  ;;  %v993_v31 = vmul.f32 0.01, %v865_v27 }
 0x11a   :  { %v1072_v32 = vsel %vm944_vm10, %v880_v22, %v1008_v28  ;;  %v1088_v33 = vsel %vm960_vm11, %v896_v23, %v1024_v29 }
 0x11b   :  { %1136 = vst [vmem:[%s1787_s3 + $0x170] sm:$0xff] %v1072_v32  ;;  %v1041_v34 = vsel %vm913_vm12, %v849_v26, %v977_v30  ;;  %v1057_v35 = vsel %vm929_vm13, %v865_v27, %v993_v31 }
 0x11c   :  { %1152 = vst [vmem:[%s1787_s3 + $0x1f0] sm:$0xff] %v1088_v33 }
 0x11d   :  { %1105 = vst [vmem:[%s1787_s3 + $0x78] sm:$0xff] %v1041_v34  ;;  %v592_v36 = vpop.f32.mrf.mxu2  ;;  %v632_v37 = vpop.f32.mrf.mxu3 }
 0x11e   :  { %1121 = vst [vmem:[%s1787_s3 + $0xf8] sm:$0xff] %v1057_v35  ;;  %v881_v38 = vadd.f32 %v1526_v40, %v592_v36  ;;  %v897_v39 = vadd.f32 %v1526_v40, %v632_v37 }
 0x120   :  { %vm945_vm14 = vcmp.ge.f32.partialorder %v881_v38, 0.0  ;;  %v1009_v41 = vmul.f32 0.01, %v881_v38  ;;  %vm961_vm15 = vcmp.ge.f32.partialorder %v897_v39, 0.0  ;;  %v1025_v42 = vmul.f32 0.01, %v897_v39 }
 0x122   :  { %v1073_v43 = vsel %vm945_vm14, %v881_v38, %v1009_v41  ;;  %v1089_v44 = vsel %vm961_vm15, %v897_v39, %v1025_v42 }
 0x123   :  { %1137 = vst [vmem:[%s1787_s3 + $0x178] sm:$0xff] %v1073_v43 }
 0x124   :  { %1153 = vst [vmem:[%s1787_s3 + $0x1f8] sm:$0xff] %v1089_v44 }

// kernel: dis_pair_forward.6
= control target key start
LH: loop header
LB: loop body
LE: loop exit
PB: predicated region body
PF: predicated region fallthrough
CT: control target
= control target key end

     0   :  { %s1310_s1 = inlined_call_operand.vmem [shape: bf16[384,128], index: 1, kind: input, shape index: {}]   ;;  %s1311_s0 = inlined_call_operand.vmem [shape: bf16[128,384], index: 0, kind: input, shape index: {}]   ;;  %s1312_s2 = inlined_call_operand.vmem [shape: f32[1,128], index: 2, kind: input, shape index: {}]   ;;  %s1313_s3 = inlined_call_operand.vmem [shape: f32[128,128], index: 3, kind: output, shape index: {}]  }
   0x1   :  { %v911_v0 = vld [vmem:[%s1310_s1 + $0x38] sm:$0xff]  ;;  %v910_v3 = vld [vmem:[%s1310_s1 + $0x30] sm:$0xff]  ;;  %v909_v6 = vld [vmem:[%s1310_s1 + $0x28] sm:$0xff] }
   0x2   :  { %v979_v1 = vld [vmem:[%s1310_s1 + $0x78] sm:$0xff]  ;;  %402 = vmatpush.bf16.msra.mxu0 %v911_v0  ;;  %928 = vmatpush.bf16.msra.mxu3 %v911_v0  ;;  %v994_v4 = vld [vmem:[%s1310_s1 + $0x70] sm:$0xff]  ;;  %v917_v7 = vld [vmem:[%s1310_s1 + $0x68] sm:$0xff] }
   0x3   :  { %v984_v2 = vld [vmem:[%s1310_s1 + $0xb8] sm:$0xff]  ;;  %451 = vmatpush.bf16.msra.mxu1 %v979_v1  ;;  %v999_v5 = vld [vmem:[%s1310_s1 + $0xb0] sm:$0xff]  ;;  %v1012_v8 = vld [vmem:[%s1310_s1 + $0xa8] sm:$0xff] }
   0x4   :  { %500 = vmatpush.bf16.msra.mxu2 %v984_v2  ;;  %v908_v9 = vld [vmem:[%s1310_s1 + $0x20] sm:$0xff]  ;;  %v907_v12 = vld [vmem:[%s1310_s1 + $0x18] sm:$0xff]  ;;  %v906_v15 = vld [vmem:[%s1310_s1 + $0x10] sm:$0xff] }
   0x5   :  { %v916_v10 = vld [vmem:[%s1310_s1 + $0x60] sm:$0xff]  ;;  %v915_v13 = vld [vmem:[%s1310_s1 + $0x58] sm:$0xff]  ;;  %v914_v16 = vld [vmem:[%s1310_s1 + $0x50] sm:$0xff] }
   0x6   :  { %403 = vmatpush.bf16.msra.mxu0 %v910_v3  ;;  %929 = vmatpush.bf16.msra.mxu3 %v910_v3  ;;  %v1024_v11 = vld [vmem:[%s1310_s1 + $0xa0] sm:$0xff]  ;;  %v1036_v14 = vld [vmem:[%s1310_s1 + $0x98] sm:$0xff]  ;;  %v1048_v17 = vld [vmem:[%s1310_s1 + $0x90] sm:$0xff] }
   0x7   :  { %452 = vmatpush.bf16.msra.mxu1 %v994_v4  ;;  %v905_v18 = vld [vmem:[%s1310_s1 + $0x8] sm:$0xff]  ;;  %v904_v21 = vld [vmem:[%s1310_s1] sm:$0xff]  ;;  %v762_v26 = vld [vmem:[%s1311_s0 + $0x90] sm:$0xf] }
   0x8   :  { %501 = vmatpush.bf16.msra.mxu2 %v999_v5  ;;  %v913_v19 = vld [vmem:[%s1310_s1 + $0x48] sm:$0xff]  ;;  %v912_v22 = vld [vmem:[%s1310_s1 + $0x40] sm:$0xff]  ;;  %v899_v27 = vld [vmem:[%s1311_s0 + $0x98] sm:$0xf0] }
   0x9   :  { %v1060_v20 = vld [vmem:[%s1310_s1 + $0x88] sm:$0xff]  ;;  %v1071_v23 = vld [vmem:[%s1310_s1 + $0x80] sm:$0xff]  ;;  %v692_v29 = vld [vmem:[%s1311_s0 + $0xc] sm:$0xf0]  ;;  %v763_v33 = vor.u32 %v899_v27, %v762_v26 }
   0xa   :  { %404 = vmatpush.bf16.msra.mxu0 %v909_v6  ;;  %930 = vmatpush.bf16.msra.mxu3 %v909_v6  ;;  %v690_v24 = vld [vmem:[%s1311_s0] sm:$0xf]  ;;  %v881_v25 = vld [vmem:[%s1311_s0 + $0x8] sm:$0xf0]  ;;  %v880_v28 = vld [vmem:[%s1311_s0 + $0x4] sm:$0xf] }
   0xb   :  { %453 = vmatpush.bf16.msra.mxu1 %v917_v7  ;;  %v698_v30 = vld [vmem:[%s1311_s0 + $0x8] sm:$0xf]  ;;  %v882_v31 = vld [vmem:[%s1311_s0 + $0x10] sm:$0xf0]  ;;  %v691_v32 = vor.u32 %v881_v25, %v690_v24  ;;  %v695_v34 = vor.u32 %v880_v28, %v692_v29  ;;  %v702_v36 = vld [vmem:[%s1311_s0 + $0x18] sm:$0xf] }
   0xc   :  { %502 = vmatpush.bf16.msra.mxu2 %v1012_v8  ;;  %v699_v35 = vor.u32 %v882_v31, %v698_v30  ;;  %v884_v37 = vld [vmem:[%s1311_s0 + $0x20] sm:$0xf0]  ;;  %v774_v38 = vld [vmem:[%s1311_s0 + $0xa8] sm:$0xf]  ;;  %v902_v39 = vld [vmem:[%s1311_s0 + $0xb0] sm:$0xf0] }
   0xd   :  { %v883_v40 = vld [vmem:[%s1311_s0 + $0x1c] sm:$0xf]  ;;  %v704_v41 = vld [vmem:[%s1311_s0 + $0x24] sm:$0xf0]  ;;  %v710_v42 = vld [vmem:[%s1311_s0 + $0x20] sm:$0xf]  ;;  %v703_v44 = vor.u32 %v884_v37, %v702_v36  ;;  %v775_v45 = vor.u32 %v902_v39, %v774_v38 }
   0xe   :  { %405 = vmatpush.bf16.msra.mxu0 %v908_v9  ;;  %931 = vmatpush.bf16.msra.mxu3 %v908_v9  ;;  %v885_v43 = vld [vmem:[%s1311_s0 + $0x28] sm:$0xf0]  ;;  %v707_v46 = vor.u32 %v883_v40, %v704_v41  ;;  %v714_v48 = vld [vmem:[%s1311_s0 + $0x30] sm:$0xf]  ;;  %v887_v49 = vld [vmem:[%s1311_s0 + $0x38] sm:$0xf0] }
   0xf   :  { %454 = vmatpush.bf16.msra.mxu1 %v916_v10  ;;  %v711_v47 = vor.u32 %v885_v43, %v710_v42  ;;  %v886_v50 = vld [vmem:[%s1311_s0 + $0x34] sm:$0xf]  ;;  %v764_v52 = vld [vmem:[%s1311_s0 + $0x9c] sm:$0xf0]  ;;  %v722_v54 = vld [vmem:[%s1311_s0 + $0x38] sm:$0xf]  ;;  %v715_v56 = vor.u32 %v887_v49, %v714_v48 }
  0x10   :  { %503 = vmatpush.bf16.msra.mxu2 %v1024_v11  ;;  %v898_v51 = vld [vmem:[%s1311_s0 + $0x94] sm:$0xf]  ;;  %v716_v53 = vld [vmem:[%s1311_s0 + $0x3c] sm:$0xf0]  ;;  %v888_v55 = vld [vmem:[%s1311_s0 + $0x40] sm:$0xf0] }
  0x11   :  { %v767_v57 = vor.u32 %v898_v51, %v764_v52  ;;  %v719_v58 = vor.u32 %v886_v50, %v716_v53  ;;  %v723_v59 = vor.u32 %v888_v55, %v722_v54  ;;  %v726_v60 = vld [vmem:[%s1311_s0 + $0x48] sm:$0xf]  ;;  %v890_v61 = vld [vmem:[%s1311_s0 + $0x50] sm:$0xf0]  ;;  %v889_v62 = vld [vmem:[%s1311_s0 + $0x4c] sm:$0xf] }
  0x12   :  { %406 = vmatpush.bf16.msra.mxu0 %v907_v12  ;;  %932 = vmatpush.bf16.msra.mxu3 %v907_v12  ;;  %v901_v63 = vld [vmem:[%s1311_s0 + $0xac] sm:$0xf]  ;;  %v776_v0 = vld [vmem:[%s1311_s0 + $0xb4] sm:$0xf0]  ;;  %v891_v3 = vld [vmem:[%s1311_s0 + $0x58] sm:$0xf0] }
  0x13   :  { %455 = vmatpush.bf16.msra.mxu1 %v915_v13  ;;  %v893_v9 = vld [vmem:[%s1311_s0 + $0x68] sm:$0xf0]  ;;  %v900_v12 = vld [vmem:[%s1311_s0 + $0xa0] sm:$0xf0]  ;;  %v903_v24 = vld [vmem:[%s1311_s0 + $0xb8] sm:$0xf0] }
  0x14   :  { %504 = vmatpush.bf16.msra.mxu2 %v1036_v14  ;;  %v752_v25 = vld [vmem:[%s1311_s0 + $0x84] sm:$0xf0]  ;;  %v758_v26 = vld [vmem:[%s1311_s0 + $0x80] sm:$0xf]  ;;  %v897_v27 = vld [vmem:[%s1311_s0 + $0x88] sm:$0xf0] }
  0x15   :  { %v759_v31 = vor.u32 %v897_v27, %v758_v26  ;;  %v1234_v36 = vld [vmem:[%s1312_s2] ss:$0 sm:$0xff] }
  0x16   :  { %407 = vmatpush.bf16.msra.mxu0 %v906_v15  ;;  %933 = vmatpush.bf16.msra.mxu3 %v906_v15  ;;  %v894_v15 = vld [vmem:[%s1311_s0 + $0x70] sm:$0xf0] }
  0x17   :  { %456 = vmatpush.bf16.msra.mxu1 %v914_v16 }
  0x18   :  { %505 = vmatpush.bf16.msra.mxu2 %v1048_v17 }
  0x1a   :  { %408 = vmatpush.bf16.msra.mxu0 %v905_v18  ;;  %934 = vmatpush.bf16.msra.mxu3 %v905_v18 }
  0x1b   :  { %457 = vmatpush.bf16.msra.mxu1 %v913_v19 }
  0x1c   :  { %506 = vmatpush.bf16.msra.mxu2 %v1060_v20 }
  0x1e   :  { %409 = vmatpush.bf16.msra.mxu0 %v904_v21  ;;  %935 = vmatpush.bf16.msra.mxu3 %v904_v21  ;;  %v896_v21 = vld [vmem:[%s1311_s0 + $0x80] sm:$0xf0] }
  0x1f   :  { %458 = vmatpush.bf16.msra.mxu1 %v912_v22 }
  0x20   :  { %507 = vmatpush.bf16.msra.mxu2 %v1071_v23 }
  0x21   :  { %410 = vmatmul.bf16.vlgmr.msra.gmra.mxu0 %v691_v32  ;;  %440 = vmatmul.bf16.vlgmr.msra.gmra.mxu3 %v763_v33 }
  0x22   :  { %936 = vmatpush.bf16.msrb.mxu3 %v979_v1  ;;  %459 = vmatmul.bf16.vlgmr.msra.gmra.mxu1 %v695_v34  ;;  %v728_v1 = vld [vmem:[%s1311_s0 + $0x54] sm:$0xf0] }
  0x23   :  { %508 = vmatmul.bf16.vlgmr.msra.gmra.mxu2 %v699_v35  ;;  %v731_v6 = vor.u32 %v889_v62, %v728_v1 }
  0x26   :  { %937 = vmatpush.bf16.msrb.mxu3 %v994_v4  ;;  %v727_v4 = vor.u32 %v890_v61, %v726_v60 }
  0x2a   :  { %938 = vmatpush.bf16.msrb.mxu3 %v917_v7 }
  0x2e   :  { %939 = vmatpush.bf16.msrb.mxu3 %v916_v10  ;;  %v892_v10 = vld [vmem:[%s1311_s0 + $0x64] sm:$0xf] }
  0x31   :  { %415 = vmatmul.bf16.gmra.mxu0 %v703_v44  ;;  %445 = vmatmul.bf16.gmra.mxu3 %v775_v45 }
  0x32   :  { %940 = vmatpush.bf16.msrb.mxu3 %v915_v13  ;;  %464 = vmatmul.bf16.gmra.mxu1 %v707_v46  ;;  %v740_v13 = vld [vmem:[%s1311_s0 + $0x6c] sm:$0xf0] }
  0x33   :  { %513 = vmatmul.bf16.gmra.mxu2 %v711_v47  ;;  %v743_v18 = vor.u32 %v892_v10, %v740_v13 }
  0x36   :  { %941 = vmatpush.bf16.msrb.mxu3 %v914_v16 }
  0x3a   :  { %942 = vmatpush.bf16.msrb.mxu3 %v913_v19 }
  0x3e   :  { %943 = vmatpush.bf16.msrb.mxu3 %v912_v22  ;;  %v895_v22 = vld [vmem:[%s1311_s0 + $0x7c] sm:$0xf] }
  0x3f   :  { %v755_v30 = vor.u32 %v895_v22, %v752_v25 }
  0x41   :  { %420 = vmatmul.bf16.gmra.mxu0 %v715_v56  ;;  %489 = vmatmul.bf16.vlgmr.msrb.gmra.mxu3 %v767_v57 }
  0x42   :  { %944 = vmatpush.bf16.msra.mxu3 %v984_v2  ;;  %469 = vmatmul.bf16.gmra.mxu1 %v719_v58  ;;  %v734_v2 = vld [vmem:[%s1311_s0 + $0x50] sm:$0xf] }
  0x43   :  { %518 = vmatmul.bf16.gmra.mxu2 %v723_v59  ;;  %v735_v7 = vor.u32 %v891_v3, %v734_v2 }
  0x46   :  { %945 = vmatpush.bf16.msra.mxu3 %v999_v5  ;;  %v779_v5 = vor.u32 %v901_v63, %v776_v0 }
  0x4a   :  { %946 = vmatpush.bf16.msra.mxu3 %v1012_v8  ;;  %v738_v8 = vld [vmem:[%s1311_s0 + $0x60] sm:$0xf] }
  0x4b   :  { %v739_v16 = vor.u32 %v893_v9, %v738_v8 }
  0x4e   :  { %947 = vmatpush.bf16.msra.mxu3 %v1024_v11  ;;  %v770_v11 = vld [vmem:[%s1311_s0 + $0x98] sm:$0xf] }
  0x51   :  { %425 = vmatmul.bf16.gmra.mxu0 %v727_v4  ;;  %494 = vmatmul.bf16.gmra.mxu3 %v779_v5 }
  0x52   :  { %948 = vmatpush.bf16.msra.mxu3 %v1036_v14  ;;  %474 = vmatmul.bf16.gmra.mxu1 %v731_v6  ;;  %v746_v14 = vld [vmem:[%s1311_s0 + $0x68] sm:$0xf] }
  0x53   :  { %523 = vmatmul.bf16.gmra.mxu2 %v735_v7  ;;  %v747_v19 = vor.u32 %v894_v15, %v746_v14 }
  0x56   :  { %949 = vmatpush.bf16.msra.mxu3 %v1048_v17  ;;  %v771_v17 = vor.u32 %v900_v12, %v770_v11 }
  0x5a   :  { %950 = vmatpush.bf16.msra.mxu3 %v1060_v20  ;;  %v750_v20 = vld [vmem:[%s1311_s0 + $0x78] sm:$0xf] }
  0x5b   :  { %v751_v28 = vor.u32 %v896_v21, %v750_v20 }
  0x5e   :  { %951 = vmatpush.bf16.msra.mxu3 %v1071_v23  ;;  %v782_v23 = vld [vmem:[%s1311_s0 + $0xb0] sm:$0xf] }
  0x5f   :  { %v783_v29 = vor.u32 %v903_v24, %v782_v23 }
  0x61   :  { %430 = vmatmul.bf16.gmra.mxu0 %v739_v16  ;;  %538 = vmatmul.bf16.vlgmr.msra.gmra.mxu3 %v771_v17 }
  0x62   :  { %479 = vmatmul.bf16.gmra.mxu1 %v743_v18 }
  0x63   :  { %528 = vmatmul.bf16.gmra.mxu2 %v747_v19 }
  0x71   :  { %435 = vmatmul.bf16.gmra.mxu0 %v751_v28  ;;  %543 = vmatmul.bf16.gmra.mxu3 %v783_v29 }
  0x72   :  { %484 = vmatmul.bf16.gmra.mxu1 %v755_v30 }
  0x73   :  { %533 = vmatmul.bf16.gmra.mxu2 %v759_v31 }
  0x9e   :  { %v411_v32 = vpop.f32.mrf.mxu0 }
  0x9f   :  { %v460_v33 = vpop.f32.mrf.mxu1 }
  0xa0   :  { %v461_v34 = vadd.f32 %v460_v33, %v411_v32 }
  0xa4   :  { %v1229_v35 = vpop.f32.mrf.mxu3 }
  0xa6   :  { %v509_v37 = vpop.f32.mrf.mxu2  ;;  %v413_v39 = vpop.f32.mrf.mxu0 }
  0xa7   :  { %v510_v38 = vadd.f32 %v509_v37, %v461_v34  ;;  %v462_v40 = vpop.f32.mrf.mxu1 }
  0xa8   :  { %v463_v44 = vadd.f32 %v462_v40, %v413_v39 }
  0xa9   :  { %v604_v41 = vadd.f32 %v1234_v36, %v510_v38 }
  0xab   :  { %vm620_vm0 = vcmp.ge.f32.partialorder %v604_v41, 0.0  ;;  %v636_v42 = vmul.f32 0.01, %v604_v41 }
  0xac   :  { %v1237_v45 = vpop.f32.mrf.mxu3 }
  0xad   :  { %v652_v43 = vsel %vm620_vm0, %v604_v41, %v636_v42 }
  0xae   :  { %668 = vst [vmem:[%s1313_s3] sm:$0xff] %v652_v43  ;;  %v511_v46 = vpop.f32.mrf.mxu2  ;;  %v416_v48 = vpop.f32.mrf.mxu0 }
  0xaf   :  { %v512_v47 = vadd.f32 %v511_v46, %v463_v44  ;;  %v465_v49 = vpop.f32.mrf.mxu1 }
  0xb0   :  { %v466_v52 = vadd.f32 %v465_v49, %v416_v48 }
  0xb1   :  { %v605_v50 = vadd.f32 %v1234_v36, %v512_v47 }
  0xb3   :  { %vm621_vm1 = vcmp.ge.f32.partialorder %v605_v50, 0.0  ;;  %v637_v51 = vmul.f32 0.01, %v605_v50 }
  0xb4   :  { %v1243_v54 = vpop.f32.mrf.mxu3 }
  0xb5   :  { %v653_v53 = vsel %vm621_vm1, %v605_v50, %v637_v51 }
  0xb6   :  { %669 = vst [vmem:[%s1313_s3 + $0x8] sm:$0xff] %v653_v53  ;;  %v514_v55 = vpop.f32.mrf.mxu2  ;;  %v418_v57 = vpop.f32.mrf.mxu0 }
  0xb7   :  { %v515_v56 = vadd.f32 %v514_v55, %v466_v52  ;;  %v467_v58 = vpop.f32.mrf.mxu1 }
  0xb8   :  { %v468_v62 = vadd.f32 %v467_v58, %v418_v57 }
  0xb9   :  { %v606_v59 = vadd.f32 %v1234_v36, %v515_v56 }
  0xbb   :  { %vm622_vm2 = vcmp.ge.f32.partialorder %v606_v59, 0.0  ;;  %v638_v60 = vmul.f32 0.01, %v606_v59 }
  0xbc   :  { %v1249_v63 = vpop.f32.mrf.mxu3 }
  0xbd   :  { %v654_v61 = vsel %vm622_vm2, %v606_v59, %v638_v60 }
  0xbe   :  { %670 = vst [vmem:[%s1313_s3 + $0x10] sm:$0xff] %v654_v61  ;;  %v516_v0 = vpop.f32.mrf.mxu2  ;;  %v421_v2 = vpop.f32.mrf.mxu0 }
  0xbf   :  { %v517_v1 = vadd.f32 %v516_v0, %v468_v62  ;;  %v470_v3 = vpop.f32.mrf.mxu1 }
  0xc0   :  { %v471_v6 = vadd.f32 %v470_v3, %v421_v2 }
  0xc1   :  { %v607_v4 = vadd.f32 %v1234_v36, %v517_v1 }
  0xc3   :  { %vm623_vm3 = vcmp.ge.f32.partialorder %v607_v4, 0.0  ;;  %v639_v5 = vmul.f32 0.01, %v607_v4 }
  0xc4   :  { %v490_v8 = vpop.f32.mrf.mxu3 }
  0xc5   :  { %v655_v7 = vsel %vm623_vm3, %v607_v4, %v639_v5  ;;  %v491_v46 = vadd.f32 %v490_v8, %v1229_v35 }
  0xc6   :  { %671 = vst [vmem:[%s1313_s3 + $0x18] sm:$0xff] %v655_v7  ;;  %v519_v9 = vpop.f32.mrf.mxu2  ;;  %v423_v11 = vpop.f32.mrf.mxu0 }
  0xc7   :  { %v520_v10 = vadd.f32 %v519_v9, %v471_v6  ;;  %v472_v12 = vpop.f32.mrf.mxu1 }
  0xc8   :  { %v473_v16 = vadd.f32 %v472_v12, %v423_v11 }
  0xc9   :  { %v608_v13 = vadd.f32 %v1234_v36, %v520_v10 }
  0xcb   :  { %vm624_vm4 = vcmp.ge.f32.partialorder %v608_v13, 0.0  ;;  %v640_v14 = vmul.f32 0.01, %v608_v13 }
  0xcc   :  { %v492_v17 = vpop.f32.mrf.mxu3 }
  0xcd   :  { %v656_v15 = vsel %vm624_vm4, %v608_v13, %v640_v14  ;;  %v493_v35 = vadd.f32 %v492_v17, %v1237_v45 }
  0xce   :  { %672 = vst [vmem:[%s1313_s3 + $0x20] sm:$0xff] %v656_v15  ;;  %v521_v18 = vpop.f32.mrf.mxu2  ;;  %v426_v20 = vpop.f32.mrf.mxu0 }
  0xcf   :  { %v522_v19 = vadd.f32 %v521_v18, %v473_v16  ;;  %v475_v21 = vpop.f32.mrf.mxu1 }
  0xd0   :  { %v476_v24 = vadd.f32 %v475_v21, %v426_v20 }
  0xd1   :  { %v609_v22 = vadd.f32 %v1234_v36, %v522_v19 }
  0xd3   :  { %vm625_vm5 = vcmp.ge.f32.partialorder %v609_v22, 0.0  ;;  %v641_v23 = vmul.f32 0.01, %v609_v22 }
  0xd4   :  { %v495_v26 = vpop.f32.mrf.mxu3 }
  0xd5   :  { %v657_v25 = vsel %vm625_vm5, %v609_v22, %v641_v23  ;;  %v496_v9 = vadd.f32 %v495_v26, %v1243_v54 }
  0xd6   :  { %673 = vst [vmem:[%s1313_s3 + $0x28] sm:$0xff] %v657_v25  ;;  %v524_v27 = vpop.f32.mrf.mxu2  ;;  %v428_v29 = vpop.f32.mrf.mxu0 }
  0xd7   :  { %v525_v28 = vadd.f32 %v524_v27, %v476_v24  ;;  %v477_v30 = vpop.f32.mrf.mxu1 }
  0xd8   :  { %v478_v34 = vadd.f32 %v477_v30, %v428_v29 }
  0xd9   :  { %v610_v31 = vadd.f32 %v1234_v36, %v525_v28 }
  0xdb   :  { %vm626_vm6 = vcmp.ge.f32.partialorder %v610_v31, 0.0  ;;  %v642_v32 = vmul.f32 0.01, %v610_v31 }
  0xdc   :  { %v497_v37 = vpop.f32.mrf.mxu3 }
  0xdd   :  { %v658_v33 = vsel %vm626_vm6, %v610_v31, %v642_v32  ;;  %v498_v21 = vadd.f32 %v497_v37, %v1249_v63 }
  0xde   :  { %674 = vst [vmem:[%s1313_s3 + $0x30] sm:$0xff] %v658_v33  ;;  %v526_v38 = vpop.f32.mrf.mxu2  ;;  %v431_v40 = vpop.f32.mrf.mxu0 }
  0xdf   :  { %v527_v39 = vadd.f32 %v526_v38, %v478_v34  ;;  %v480_v41 = vpop.f32.mrf.mxu1 }
  0xe0   :  { %v481_v44 = vadd.f32 %v480_v41, %v431_v40 }
  0xe1   :  { %v611_v42 = vadd.f32 %v1234_v36, %v527_v39 }
  0xe3   :  { %vm627_vm7 = vcmp.ge.f32.partialorder %v611_v42, 0.0  ;;  %v643_v43 = vmul.f32 0.01, %v611_v42 }
  0xe4   :  { %v539_v48 = vpop.f32.mrf.mxu3 }
  0xe5   :  { %v659_v47 = vsel %vm627_vm7, %v611_v42, %v643_v43  ;;  %v540_v50 = vadd.f32 %v539_v48, %v491_v46 }
  0xe6   :  { %675 = vst [vmem:[%s1313_s3 + $0x38] sm:$0xff] %v659_v47  ;;  %v529_v49 = vpop.f32.mrf.mxu2  ;;  %v433_v52 = vpop.f32.mrf.mxu0 }
  0xe7   :  { %v530_v51 = vadd.f32 %v529_v49, %v481_v44  ;;  %v616_v53 = vadd.f32 %v1234_v36, %v540_v50  ;;  %v482_v55 = vpop.f32.mrf.mxu1 }
  0xe8   :  { %v483_v61 = vadd.f32 %v482_v55, %v433_v52 }
  0xe9   :  { %v612_v56 = vadd.f32 %v1234_v36, %v530_v51  ;;  %vm632_vm8 = vcmp.ge.f32.partialorder %v616_v53, 0.0  ;;  %v648_v57 = vmul.f32 0.01, %v616_v53 }
  0xeb   :  { %vm628_vm9 = vcmp.ge.f32.partialorder %v612_v56, 0.0  ;;  %v644_v58 = vmul.f32 0.01, %v612_v56  ;;  %v664_v59 = vsel %vm632_vm8, %v616_v53, %v648_v57 }
  0xec   :  { %680 = vst [vmem:[%s1313_s3 + $0x60] sm:$0xff] %v664_v59  ;;  %v541_v62 = vpop.f32.mrf.mxu3 }
  0xed   :  { %v660_v60 = vsel %vm628_vm9, %v612_v56, %v644_v58  ;;  %v542_v1 = vadd.f32 %v541_v62, %v493_v35 }
  0xee   :  { %676 = vst [vmem:[%s1313_s3 + $0x40] sm:$0xff] %v660_v60  ;;  %v531_v0 = vpop.f32.mrf.mxu2  ;;  %v436_v4 = vpop.f32.mrf.mxu0 }
  0xef   :  { %v532_v2 = vadd.f32 %v531_v0, %v483_v61  ;;  %v617_v3 = vadd.f32 %v1234_v36, %v542_v1  ;;  %v485_v5 = vpop.f32.mrf.mxu1 }
  0xf0   :  { %v486_v8 = vadd.f32 %v485_v5, %v436_v4 }
  0xf1   :  { %v613_v45 = vadd.f32 %v1234_v36, %v532_v2  ;;  %vm633_vm10 = vcmp.ge.f32.partialorder %v617_v3, 0.0  ;;  %v649_v6 = vmul.f32 0.01, %v617_v3 }
  0xf3   :  { %vm629_vm11 = vcmp.ge.f32.partialorder %v613_v45, 0.0  ;;  %v645_v7 = vmul.f32 0.01, %v613_v45  ;;  %v665_v10 = vsel %vm633_vm10, %v617_v3, %v649_v6 }
  0xf4   :  { %681 = vst [vmem:[%s1313_s3 + $0x68] sm:$0xff] %v665_v10  ;;  %v544_v12 = vpop.f32.mrf.mxu3 }
  0xf5   :  { %v661_v11 = vsel %vm629_vm11, %v613_v45, %v645_v7  ;;  %v545_v14 = vadd.f32 %v544_v12, %v496_v9 }
  0xf6   :  { %677 = vst [vmem:[%s1313_s3 + $0x48] sm:$0xff] %v661_v11  ;;  %v534_v13 = vpop.f32.mrf.mxu2  ;;  %v438_v18 = vpop.f32.mrf.mxu0 }
  0xf7   :  { %v535_v15 = vadd.f32 %v534_v13, %v486_v8  ;;  %v618_v16 = vadd.f32 %v1234_v36, %v545_v14  ;;  %v487_v19 = vpop.f32.mrf.mxu1 }
  0xf8   :  { %v488_v24 = vadd.f32 %v487_v19, %v438_v18 }
  0xf9   :  { %v614_v17 = vadd.f32 %v1234_v36, %v535_v15  ;;  %vm634_vm12 = vcmp.ge.f32.partialorder %v618_v16, 0.0  ;;  %v650_v54 = vmul.f32 0.01, %v618_v16 }
  0xfb   :  { %vm630_vm13 = vcmp.ge.f32.partialorder %v614_v17, 0.0  ;;  %v646_v20 = vmul.f32 0.01, %v614_v17  ;;  %v666_v22 = vsel %vm634_vm12, %v618_v16, %v650_v54 }
  0xfc   :  { %682 = vst [vmem:[%s1313_s3 + $0x70] sm:$0xff] %v666_v22  ;;  %v546_v25 = vpop.f32.mrf.mxu3 }
  0xfd   :  { %v662_v23 = vsel %vm630_vm13, %v614_v17, %v646_v20  ;;  %v547_v27 = vadd.f32 %v546_v25, %v498_v21 }
  0xfe   :  { %678 = vst [vmem:[%s1313_s3 + $0x50] sm:$0xff] %v662_v23  ;;  %v536_v26 = vpop.f32.mrf.mxu2 }
  0xff   :  { %v537_v28 = vadd.f32 %v536_v26, %v488_v24  ;;  %v619_v29 = vadd.f32 %v1234_v36, %v547_v27 }
 0x101   :  { %v615_v30 = vadd.f32 %v1234_v36, %v537_v28  ;;  %vm635_vm14 = vcmp.ge.f32.partialorder %v619_v29, 0.0  ;;  %v651_v63 = vmul.f32 0.01, %v619_v29 }
 0x103   :  { %vm631_vm15 = vcmp.ge.f32.partialorder %v615_v30, 0.0  ;;  %v647_v31 = vmul.f32 0.01, %v615_v30  ;;  %v667_v32 = vsel %vm635_vm14, %v619_v29, %v651_v63 }
 0x104   :  { %683 = vst [vmem:[%s1313_s3 + $0x78] sm:$0xff] %v667_v32 }
 0x105   :  { %v663_v33 = vsel %vm631_vm15, %v615_v30, %v647_v31 }
 0x106   :  { %679 = vst [vmem:[%s1313_s3 + $0x58] sm:$0xff] %v663_v33 }

// kernel: dis_pair_forward.7
= control target key start
LH: loop header
LB: loop body
LE: loop exit
PB: predicated region body
PF: predicated region fallthrough
CT: control target
= control target key end

     0   :  { %s1022_s1 = inlined_call_operand.vmem [shape: bf16[640,128], index: 1, kind: input, shape index: {}]   ;;  %s1023_s0 = inlined_call_operand.vmem [shape: bf16[32,640], index: 0, kind: input, shape index: {}]   ;;  %s1024_s2 = inlined_call_operand.vmem [shape: f32[1,128], index: 2, kind: input, shape index: {}]   ;;  %s1025_s3 = inlined_call_operand.vmem [shape: f32[32,128], index: 3, kind: output, shape index: {}]  }
   0x1   :  { %v765_v0 = vld [vmem:[%s1022_s1 + $0x38] sm:$0xff]  ;;  %v764_v4 = vld [vmem:[%s1022_s1 + $0x30] sm:$0xff]  ;;  %v763_v8 = vld [vmem:[%s1022_s1 + $0x28] sm:$0xff] }
   0x2   :  { %v773_v1 = vld [vmem:[%s1022_s1 + $0x78] sm:$0xff]  ;;  %410 = vmatpush.bf16.msra.mxu0 %v765_v0  ;;  %v772_v5 = vld [vmem:[%s1022_s1 + $0x70] sm:$0xff]  ;;  %v771_v9 = vld [vmem:[%s1022_s1 + $0x68] sm:$0xff] }
   0x3   :  { %v781_v2 = vld [vmem:[%s1022_s1 + $0xb8] sm:$0xff]  ;;  %429 = vmatpush.bf16.msra.mxu1 %v773_v1  ;;  %v780_v6 = vld [vmem:[%s1022_s1 + $0xb0] sm:$0xff]  ;;  %v779_v10 = vld [vmem:[%s1022_s1 + $0xa8] sm:$0xff] }
   0x4   :  { %v789_v3 = vld [vmem:[%s1022_s1 + $0xf8] sm:$0xff]  ;;  %448 = vmatpush.bf16.msra.mxu2 %v781_v2  ;;  %v788_v7 = vld [vmem:[%s1022_s1 + $0xf0] sm:$0xff]  ;;  %v787_v11 = vld [vmem:[%s1022_s1 + $0xe8] sm:$0xff] }
   0x5   :  { %467 = vmatpush.bf16.msra.mxu3 %v789_v3  ;;  %v762_v12 = vld [vmem:[%s1022_s1 + $0x20] sm:$0xff]  ;;  %v761_v16 = vld [vmem:[%s1022_s1 + $0x18] sm:$0xff]  ;;  %v760_v20 = vld [vmem:[%s1022_s1 + $0x10] sm:$0xff] }
   0x6   :  { %411 = vmatpush.bf16.msra.mxu0 %v764_v4  ;;  %v770_v13 = vld [vmem:[%s1022_s1 + $0x60] sm:$0xff]  ;;  %v769_v17 = vld [vmem:[%s1022_s1 + $0x58] sm:$0xff]  ;;  %v768_v21 = vld [vmem:[%s1022_s1 + $0x50] sm:$0xff] }
   0x7   :  { %430 = vmatpush.bf16.msra.mxu1 %v772_v5  ;;  %v778_v14 = vld [vmem:[%s1022_s1 + $0xa0] sm:$0xff]  ;;  %v777_v18 = vld [vmem:[%s1022_s1 + $0x98] sm:$0xff]  ;;  %v776_v22 = vld [vmem:[%s1022_s1 + $0x90] sm:$0xff] }
   0x8   :  { %449 = vmatpush.bf16.msra.mxu2 %v780_v6  ;;  %v786_v15 = vld [vmem:[%s1022_s1 + $0xe0] sm:$0xff]  ;;  %v785_v19 = vld [vmem:[%s1022_s1 + $0xd8] sm:$0xff]  ;;  %v784_v23 = vld [vmem:[%s1022_s1 + $0xd0] sm:$0xff] }
   0x9   :  { %468 = vmatpush.bf16.msra.mxu3 %v788_v7  ;;  %v759_v24 = vld [vmem:[%s1022_s1 + $0x8] sm:$0xff]  ;;  %v758_v28 = vld [vmem:[%s1022_s1] sm:$0xff]  ;;  %v750_v33 = vld [vmem:[%s1023_s0 + $0x10] sm:$0xf0] }
   0xa   :  { %412 = vmatpush.bf16.msra.mxu0 %v763_v8  ;;  %v767_v25 = vld [vmem:[%s1022_s1 + $0x48] sm:$0xff]  ;;  %v766_v29 = vld [vmem:[%s1022_s1 + $0x40] sm:$0xff]  ;;  %v552_v35 = vld [vmem:[%s1023_s0 + $0x14] sm:$0xf0] }
   0xb   :  { %431 = vmatpush.bf16.msra.mxu1 %v771_v9  ;;  %v775_v26 = vld [vmem:[%s1022_s1 + $0x88] sm:$0xff]  ;;  %v774_v30 = vld [vmem:[%s1022_s1 + $0x80] sm:$0xff]  ;;  %v751_v37 = vld [vmem:[%s1023_s0 + $0x18] sm:$0xf0] }
   0xc   :  { %450 = vmatpush.bf16.msra.mxu2 %v779_v10  ;;  %v783_v27 = vld [vmem:[%s1022_s1 + $0xc8] sm:$0xff]  ;;  %v782_v31 = vld [vmem:[%s1022_s1 + $0xc0] sm:$0xff]  ;;  %v797_v40 = vld [vmem:[%s1022_s1 + $0x138] sm:$0xff] }
   0xd   :  { %469 = vmatpush.bf16.msra.mxu3 %v787_v11  ;;  %v550_v32 = vld [vmem:[%s1023_s0] sm:$0xf]  ;;  %v748_v34 = vld [vmem:[%s1023_s0 + $0x4] sm:$0xf]  ;;  %v558_v36 = vld [vmem:[%s1023_s0 + $0x8] sm:$0xf] }
   0xe   :  { %413 = vmatpush.bf16.msra.mxu0 %v762_v12  ;;  %v749_v38 = vld [vmem:[%s1023_s0 + $0xc] sm:$0xf]  ;;  %v560_v39 = vld [vmem:[%s1023_s0 + $0x1c] sm:$0xf0]  ;;  %v551_v41 = vor.u32 %v750_v33, %v550_v32  ;;  %v555_v42 = vor.u32 %v748_v34, %v552_v35  ;;  %v559_v43 = vor.u32 %v751_v37, %v558_v36  ;;  %v796_v45 = vld [vmem:[%s1022_s1 + $0x130] sm:$0xff] }
   0xf   :  { %432 = vmatpush.bf16.msra.mxu1 %v770_v13  ;;  %v563_v44 = vor.u32 %v749_v38, %v560_v39  ;;  %v795_v46 = vld [vmem:[%s1022_s1 + $0x128] sm:$0xff]  ;;  %v794_v47 = vld [vmem:[%s1022_s1 + $0x120] sm:$0xff]  ;;  %v755_v49 = vld [vmem:[%s1023_s0 + $0x38] sm:$0xf0] }
  0x10   :  { %451 = vmatpush.bf16.msra.mxu2 %v778_v14  ;;  %v570_v48 = vld [vmem:[%s1023_s0 + $0x28] sm:$0xf]  ;;  %v753_v50 = vld [vmem:[%s1023_s0 + $0x2c] sm:$0xf]  ;;  %v572_v51 = vld [vmem:[%s1023_s0 + $0x3c] sm:$0xf0] }
  0x11   :  { %470 = vmatpush.bf16.msra.mxu3 %v786_v15  ;;  %v578_v52 = vld [vmem:[%s1023_s0 + $0x30] sm:$0xf]  ;;  %v756_v53 = vld [vmem:[%s1023_s0 + $0x40] sm:$0xf0]  ;;  %v754_v54 = vld [vmem:[%s1023_s0 + $0x34] sm:$0xf]  ;;  %v571_v57 = vor.u32 %v755_v49, %v570_v48  ;;  %v575_v58 = vor.u32 %v753_v50, %v572_v51 }
  0x12   :  { %414 = vmatpush.bf16.msra.mxu0 %v761_v16  ;;  %v580_v55 = vld [vmem:[%s1023_s0 + $0x44] sm:$0xf0]  ;;  %v793_v56 = vld [vmem:[%s1022_s1 + $0x118] sm:$0xff]  ;;  %v579_v59 = vor.u32 %v756_v53, %v578_v52  ;;  %v792_v61 = vld [vmem:[%s1022_s1 + $0x110] sm:$0xff] }
  0x13   :  { %433 = vmatpush.bf16.msra.mxu1 %v769_v17  ;;  %v583_v60 = vor.u32 %v754_v54, %v580_v55  ;;  %v791_v62 = vld [vmem:[%s1022_s1 + $0x108] sm:$0xff]  ;;  %v790_v63 = vld [vmem:[%s1022_s1 + $0x100] sm:$0xff]  ;;  %v566_v0 = vld [vmem:[%s1023_s0 + $0x10] sm:$0xf] }
  0x14   :  { %452 = vmatpush.bf16.msra.mxu2 %v777_v18  ;;  %v752_v1 = vld [vmem:[%s1023_s0 + $0x20] sm:$0xf0]  ;;  %v586_v2 = vld [vmem:[%s1023_s0 + $0x38] sm:$0xf]  ;;  %v757_v3 = vld [vmem:[%s1023_s0 + $0x48] sm:$0xf0] }
  0x15   :  { %471 = vmatpush.bf16.msra.mxu3 %v785_v19  ;;  %v567_v4 = vor.u32 %v752_v1, %v566_v0  ;;  %v587_v5 = vor.u32 %v757_v3, %v586_v2 }
  0x16   :  { %415 = vmatpush.bf16.msra.mxu0 %v760_v20 }
  0x17   :  { %434 = vmatpush.bf16.msra.mxu1 %v768_v21 }
  0x18   :  { %453 = vmatpush.bf16.msra.mxu2 %v776_v22 }
  0x19   :  { %472 = vmatpush.bf16.msra.mxu3 %v784_v23 }
  0x1a   :  { %416 = vmatpush.bf16.msra.mxu0 %v759_v24 }
  0x1b   :  { %435 = vmatpush.bf16.msra.mxu1 %v767_v25 }
  0x1c   :  { %454 = vmatpush.bf16.msra.mxu2 %v775_v26 }
  0x1d   :  { %473 = vmatpush.bf16.msra.mxu3 %v783_v27  ;;  %v806_v27 = vld [vmem:[%s1024_s2] ss:$0 sm:$0xff] }
  0x1e   :  { %417 = vmatpush.bf16.msra.mxu0 %v758_v28 }
  0x1f   :  { %436 = vmatpush.bf16.msra.mxu1 %v766_v29 }
  0x20   :  { %455 = vmatpush.bf16.msra.mxu2 %v774_v30 }
  0x21   :  { %474 = vmatpush.bf16.msra.mxu3 %v782_v31  ;;  %418 = vmatmul.bf16.vlgmr.msra.gmra.mxu0 %v551_v41 }
  0x22   :  { %486 = vmatpush.bf16.msrb.mxu0 %v797_v40  ;;  %437 = vmatmul.bf16.vlgmr.msra.gmra.mxu1 %v555_v42 }
  0x23   :  { %798 = vmatpush.bf16.msrb.mxu1 %v797_v40  ;;  %456 = vmatmul.bf16.vlgmr.msra.gmra.mxu2 %v559_v43 }
  0x24   :  { %475 = vmatmul.bf16.vlgmr.msra.gmra.mxu3 %v563_v44 }
  0x26   :  { %487 = vmatpush.bf16.msrb.mxu0 %v796_v45 }
  0x27   :  { %799 = vmatpush.bf16.msrb.mxu1 %v796_v45 }
  0x2a   :  { %488 = vmatpush.bf16.msrb.mxu0 %v795_v46 }
  0x2b   :  { %800 = vmatpush.bf16.msrb.mxu1 %v795_v46 }
  0x2e   :  { %489 = vmatpush.bf16.msrb.mxu0 %v794_v47 }
  0x2f   :  { %801 = vmatpush.bf16.msrb.mxu1 %v794_v47 }
  0x31   :  { %423 = vmatmul.bf16.gmra.mxu0 %v571_v57 }
  0x32   :  { %490 = vmatpush.bf16.msrb.mxu0 %v793_v56  ;;  %442 = vmatmul.bf16.gmra.mxu1 %v575_v58 }
  0x33   :  { %802 = vmatpush.bf16.msrb.mxu1 %v793_v56  ;;  %461 = vmatmul.bf16.gmra.mxu2 %v579_v59 }
  0x34   :  { %480 = vmatmul.bf16.gmra.mxu3 %v583_v60 }
  0x36   :  { %491 = vmatpush.bf16.msrb.mxu0 %v792_v61 }
  0x37   :  { %803 = vmatpush.bf16.msrb.mxu1 %v792_v61 }
  0x3a   :  { %492 = vmatpush.bf16.msrb.mxu0 %v791_v62 }
  0x3b   :  { %804 = vmatpush.bf16.msrb.mxu1 %v791_v62 }
  0x3e   :  { %493 = vmatpush.bf16.msrb.mxu0 %v790_v63 }
  0x3f   :  { %805 = vmatpush.bf16.msrb.mxu1 %v790_v63 }
  0x41   :  { %494 = vmatmul.bf16.vlgmr.msrb.gmra.mxu0 %v567_v4 }
  0x42   :  { %499 = vmatmul.bf16.vlgmr.msrb.gmra.mxu1 %v587_v5 }
  0x9e   :  { %v419_v6 = vpop.f32.mrf.mxu0 }
  0x9f   :  { %v438_v7 = vpop.f32.mrf.mxu1 }
  0xa0   :  { %v439_v19 = vadd.f32 %v438_v7, %v419_v6 }
  0xa6   :  { %v457_v8 = vpop.f32.mrf.mxu2  ;;  %v421_v10 = vpop.f32.mrf.mxu0 }
  0xa7   :  { %v476_v9 = vpop.f32.mrf.mxu3  ;;  %v440_v11 = vpop.f32.mrf.mxu1  ;;  %v458_v21 = vadd.f32 %v457_v8, %v439_v19 }
  0xa8   :  { %v441_v30 = vadd.f32 %v440_v11, %v421_v10 }
  0xa9   :  { %v477_v24 = vadd.f32 %v476_v9, %v458_v21 }
  0xae   :  { %v459_v12 = vpop.f32.mrf.mxu2  ;;  %v424_v13 = vpop.f32.mrf.mxu0 }
  0xaf   :  { %v443_v14 = vpop.f32.mrf.mxu1  ;;  %v478_v15 = vpop.f32.mrf.mxu3  ;;  %v460_v34 = vadd.f32 %v459_v12, %v441_v30 }
  0xb0   :  { %v444_v20 = vadd.f32 %v443_v14, %v424_v13 }
  0xb1   :  { %v479_v41 = vadd.f32 %v478_v15, %v460_v34 }
  0xb6   :  { %v462_v16 = vpop.f32.mrf.mxu2  ;;  %v426_v17 = vpop.f32.mrf.mxu0 }
  0xb7   :  { %v445_v18 = vpop.f32.mrf.mxu1  ;;  %v463_v22 = vadd.f32 %v462_v16, %v444_v20  ;;  %v481_v23 = vpop.f32.mrf.mxu3 }
  0xb8   :  { %v446_v31 = vadd.f32 %v445_v18, %v426_v17 }
  0xb9   :  { %v482_v25 = vadd.f32 %v481_v23, %v463_v22 }
  0xbe   :  { %v464_v26 = vpop.f32.mrf.mxu2  ;;  %v495_v28 = vpop.f32.mrf.mxu0 }
  0xbf   :  { %v500_v29 = vpop.f32.mrf.mxu1  ;;  %v496_v32 = vadd.f32 %v495_v28, %v477_v24  ;;  %v465_v35 = vadd.f32 %v464_v26, %v446_v31  ;;  %v483_v40 = vpop.f32.mrf.mxu3 }
  0xc0   :  { %v501_v33 = vadd.f32 %v500_v29, %v482_v25 }
  0xc1   :  { %v524_v36 = vadd.f32 %v806_v27, %v496_v32  ;;  %v484_v42 = vadd.f32 %v483_v40, %v465_v35 }
  0xc2   :  { %v526_v37 = vadd.f32 %v806_v27, %v501_v33 }
  0xc3   :  { %vm528_vm0 = vcmp.ge.f32.partialorder %v524_v36, 0.0  ;;  %v532_v38 = vmul.f32 0.01, %v524_v36 }
  0xc4   :  { %vm530_vm1 = vcmp.ge.f32.partialorder %v526_v37, 0.0  ;;  %v534_v39 = vmul.f32 0.01, %v526_v37 }
  0xc5   :  { %v536_v43 = vsel %vm528_vm0, %v524_v36, %v532_v38 }
  0xc6   :  { %v538_v44 = vsel %vm530_vm1, %v526_v37, %v534_v39  ;;  %540 = vst [vmem:[%s1025_s3] sm:$0xff] %v536_v43  ;;  %v497_v45 = vpop.f32.mrf.mxu0 }
  0xc7   :  { %v502_v46 = vpop.f32.mrf.mxu1  ;;  %542 = vst [vmem:[%s1025_s3 + $0x10] sm:$0xff] %v538_v44  ;;  %v498_v47 = vadd.f32 %v497_v45, %v479_v41 }
  0xc8   :  { %v503_v48 = vadd.f32 %v502_v46, %v484_v42 }
  0xc9   :  { %v525_v49 = vadd.f32 %v806_v27, %v498_v47 }
  0xca   :  { %v527_v50 = vadd.f32 %v806_v27, %v503_v48 }
  0xcb   :  { %vm529_vm2 = vcmp.ge.f32.partialorder %v525_v49, 0.0  ;;  %v533_v51 = vmul.f32 0.01, %v525_v49 }
  0xcc   :  { %vm531_vm3 = vcmp.ge.f32.partialorder %v527_v50, 0.0  ;;  %v535_v52 = vmul.f32 0.01, %v527_v50 }
  0xcd   :  { %v537_v53 = vsel %vm529_vm2, %v525_v49, %v533_v51 }
  0xce   :  { %v539_v54 = vsel %vm531_vm3, %v527_v50, %v535_v52  ;;  %541 = vst [vmem:[%s1025_s3 + $0x8] sm:$0xff] %v537_v53 }
  0xcf   :  { %543 = vst [vmem:[%s1025_s3 + $0x18] sm:$0xff] %v539_v54 }

// kernel: dis_pair_forward.9
= control target key start
LH: loop header
LB: loop body
LE: loop exit
PB: predicated region body
PF: predicated region fallthrough
CT: control target
= control target key end

     0   :  { %s356_s1 = inlined_call_operand.vmem [shape: bf16[256,128], index: 1, kind: input, shape index: {}]   ;;  %s357_s0 = inlined_call_operand.vmem [shape: bf16[8,256], index: 0, kind: input, shape index: {}]   ;;  %s358_s2 = inlined_call_operand.vmem [shape: f32[1,128], index: 2, kind: input, shape index: {}]   ;;  %s359_s3 = inlined_call_operand.vmem [shape: f32[8,128], index: 3, kind: output, shape index: {}]  }
   0x1   :  { %v269_v0 = vld [vmem:[%s356_s1 + $0x38] sm:$0xff]  ;;  %v268_v2 = vld [vmem:[%s356_s1 + $0x30] sm:$0xff]  ;;  %v267_v4 = vld [vmem:[%s356_s1 + $0x28] sm:$0xff] }
   0x2   :  { %v277_v1 = vld [vmem:[%s356_s1 + $0x78] sm:$0xff]  ;;  %156 = vmatpush.bf16.msra.mxu0 %v269_v0  ;;  %v276_v3 = vld [vmem:[%s356_s1 + $0x70] sm:$0xff]  ;;  %v275_v5 = vld [vmem:[%s356_s1 + $0x68] sm:$0xff] }
   0x3   :  { %169 = vmatpush.bf16.msra.mxu1 %v277_v1  ;;  %v266_v6 = vld [vmem:[%s356_s1 + $0x20] sm:$0xff]  ;;  %v265_v8 = vld [vmem:[%s356_s1 + $0x18] sm:$0xff]  ;;  %v264_v10 = vld [vmem:[%s356_s1 + $0x10] sm:$0xff] }
   0x4   :  { %v274_v7 = vld [vmem:[%s356_s1 + $0x60] sm:$0xff]  ;;  %v273_v9 = vld [vmem:[%s356_s1 + $0x58] sm:$0xff]  ;;  %v272_v11 = vld [vmem:[%s356_s1 + $0x50] sm:$0xff] }
   0x5   :  { %v263_v12 = vld [vmem:[%s356_s1 + $0x8] sm:$0xff]  ;;  %v20_v14 = vld [vmem:[%s357_s0] sm:$0xff] }
   0x6   :  { %157 = vmatpush.bf16.msra.mxu0 %v268_v2  ;;  %v271_v13 = vld [vmem:[%s356_s1 + $0x48] sm:$0xff]  ;;  %v54_v15 = vunpack.c.l.b16 %v20_v14  ;;  %v55_v16 = vunpack.c.h.b16 %v20_v14  ;;  %v262_v17 = vld [vmem:[%s356_s1] sm:$0xff] }
   0x7   :  { %170 = vmatpush.bf16.msra.mxu1 %v276_v3  ;;  %v270_v18 = vld [vmem:[%s356_s1 + $0x40] sm:$0xff] }
   0x8   :  { %v56_v19 = vpack.c.b16 %v54_v15, %v54_v15  ;;  %v57_v20 = vpack.c.b16 %v55_v16, %v55_v16  ;;  %v278_v21 = vld [vmem:[%s358_s2] ss:$0 sm:$0xff] }
   0xa   :  { %158 = vmatpush.bf16.msra.mxu0 %v267_v4 }
   0xb   :  { %171 = vmatpush.bf16.msra.mxu1 %v275_v5 }
   0xe   :  { %159 = vmatpush.bf16.msra.mxu0 %v266_v6 }
   0xf   :  { %172 = vmatpush.bf16.msra.mxu1 %v274_v7 }
  0x12   :  { %160 = vmatpush.bf16.msra.mxu0 %v265_v8 }
  0x13   :  { %173 = vmatpush.bf16.msra.mxu1 %v273_v9 }
  0x16   :  { %161 = vmatpush.bf16.msra.mxu0 %v264_v10 }
  0x17   :  { %174 = vmatpush.bf16.msra.mxu1 %v272_v11 }
  0x1a   :  { %162 = vmatpush.bf16.msra.mxu0 %v263_v12 }
  0x1b   :  { %175 = vmatpush.bf16.msra.mxu1 %v271_v13 }
  0x1e   :  { %163 = vmatpush.bf16.msra.mxu0 %v262_v17 }
  0x1f   :  { %176 = vmatpush.bf16.msra.mxu1 %v270_v18 }
  0x21   :  { %164 = vmatmul.bf16.vlgmr.msra.gmra.mxu0 %v56_v19 }
  0x22   :  { %177 = vmatmul.bf16.vlgmr.msra.gmra.mxu1 %v57_v20 }
  0x9e   :  { %v165_v22 = vpop.f32.mrf.mxu0 }
  0x9f   :  { %v178_v23 = vpop.f32.mrf.mxu1 }
  0xa0   :  { %v179_v24 = vadd.f32 %v178_v23, %v165_v22 }
  0xa2   :  { %v192_v25 = vadd.f32 %v278_v21, %v179_v24 }
  0xa4   :  { %193 = vst [vmem:[%s359_s3] sm:$0xff] %v192_v25 }
  0xa6   :  { %v167_v26 = vpop.f32.mrf.mxu0 }
  0xa7   :  { %v180_v27 = vpop.f32.mrf.mxu1 }

// kernel: dis_pair_forward.8
= control target key start
LH: loop header
LB: loop body
LE: loop exit
PB: predicated region body
PF: predicated region fallthrough
CT: control target
= control target key end

     0   :  { %s2163_s12 = smov 0   ;;  %s2165_s13 = smov 0   ;;  %s2507_s0 = inlined_call_operand.vmem [shape: bf16[8,2048], index: 0, kind: input, shape index: {}]   ;;  %s2508_s1 = inlined_call_operand.vmem [shape: bf16[2048,256], index: 1, kind: input, shape index: {}]   ;;  %s2509_s2 = inlined_call_operand.vmem [shape: f32[1,256], index: 2, kind: input, shape index: {}]   ;;  %s2510_s3 = inlined_call_operand.vmem [shape: f32[8,256], index: 3, kind: output, shape index: {}]  }
   0x1   :  { %s2167_s14 = smov 0  }
   0x2 LB: > { %s25_s15 = sadd.s32 1, %s2136_s13  ;;  %p1440_p0 = scmp.ge.s32.totalorder %s2140_s14, 1  ;;  %s2140_s14 = sphi %s2167_s14, %s13_s14   ;;  %s2136_s13 = sphi %s2165_s13, %s2512_s13   ;;  %s2132_s12 = sphi %s2163_s12, %s2511_s12  }
   0x3   : > { %p26_p1 = scmp.ge.s32.totalorder %s25_s15, 2  ;;  %p194_p2 = scmp.lt.s32.totalorder %s2140_s14, 3 }
   0x5   : > { %s2514_s15 = smov (%p26_p1, %s25_s15), 0  ;;  %p195_p3 = pnand %p1440_p0, %p194_p2 }
   0x6   : > { %s1441_s16 = sshll.u32 (!%p195_p3), %s2132_s12, 3  ;;  %s1443_s17 = sshll.u32 (!%p195_p3), %s2132_s12, 7 }
   0x7   : > { %198 = sbr.rel (%p195_p3) target bundleno = 307 (0x133), region = 32  ;;  %p243_p4 = scmp.lt.s32.totalorder (!%p195_p3), %s1441_s16, 15 }
   0x8   : > { %p252_p5 = scmp.lt.s32.totalorder (!%p195_p3), %s1443_s17, 255  ;;  %p1446_p6 = scmp.ne.s32.totalorder (!%p195_p3), %s2132_s12, 0 }
   0xc   : > { %s2516_s16 = smov (!%p243_p4, %s1441_s16), 15  ;;  %s2518_s17 = smov (!%p252_p5, %s1443_s17), 255 }
   0xd   : > { %s1442_s18 = sshll.u32 %s2516_s16, 2  ;;  %s1964_s22 = sshll.u32 %s2518_s17, 3 }
   0xe   : > { %s2188_s21 = scalar_lea.vmem %s2507_s0, %s1442_s18  ;;  %s2193_s25 = scalar_lea.vmem %s2508_s1, %s1964_s22 }
   0xf   : > { %280 = sbr.rel (%p1446_p6) target bundleno = 23 (0x17), region = 36 }
  0x14   : > { %v2142_v0 = vmov 0.0  }
  0x15   : > { %281 = vst [vmem:[#allocation2] sm:$0xff] %v2142_v0 }
  0x16   : > { %282 = vst [vmem:[#allocation2 + $0x8] sm:$0xff] %v2142_v0 }
  0x17 PF: > { %v1505_v1 = vld [vmem:[%s2193_s25 + $0x70] sm:$0xf]  ;;  %v1980_v2 = vld [vmem:[%s2193_s25 + $0x74] sm:$0xf0]  ;;  %v1497_v12 = vld [vmem:[%s2193_s25 + $0x60] sm:$0xf] }
  0x18   : > { %v1569_v3 = vld [vmem:[%s2193_s25 + $0xf0] sm:$0xf]  ;;  %v1506_v4 = vor.u32 %v1980_v2, %v1505_v1  ;;  %v1996_v5 = vld [vmem:[%s2193_s25 + $0xf4] sm:$0xf0]  ;;  %v1978_v14 = vld [vmem:[%s2193_s25 + $0x64] sm:$0xf0] }
  0x19   : > { %v1633_v6 = vld [vmem:[%s2193_s25 + $0x170] sm:$0xf]  ;;  %v2012_v7 = vld [vmem:[%s2193_s25 + $0x174] sm:$0xf0]  ;;  %v1570_v8 = vor.u32 %v1996_v5, %v1569_v3  ;;  %v1561_v15 = vld [vmem:[%s2193_s25 + $0xe0] sm:$0xf]  ;;  %v1498_v17 = vor.u32 %v1978_v14, %v1497_v12 }
  0x1a   : > { %v1634_v9 = vor.u32 %v2012_v7, %v1633_v6  ;;  %v1697_v10 = vld [vmem:[%s2193_s25 + $0x1f0] sm:$0xf]  ;;  %v2028_v11 = vld [vmem:[%s2193_s25 + $0x1f4] sm:$0xf0]  ;;  %1085 = vmatpush.bf16.msra.mxu0 %v1506_v4  ;;  %v1994_v16 = vld [vmem:[%s2193_s25 + $0xe4] sm:$0xf0] }
  0x1b   : > { %v1698_v13 = vor.u32 %v2028_v11, %v1697_v10  ;;  %1098 = vmatpush.bf16.msra.mxu1 %v1570_v8  ;;  %v1562_v18 = vor.u32 %v1994_v16, %v1561_v15  ;;  %v1625_v19 = vld [vmem:[%s2193_s25 + $0x160] sm:$0xf]  ;;  %v2010_v20 = vld [vmem:[%s2193_s25 + $0x164] sm:$0xf0]  ;;  %v1489_v24 = vld [vmem:[%s2193_s25 + $0x50] sm:$0xf] }
  0x1c   : > { %1111 = vmatpush.bf16.msra.mxu2 %v1634_v9  ;;  %v1689_v21 = vld [vmem:[%s2193_s25 + $0x1e0] sm:$0xf]  ;;  %v1626_v22 = vor.u32 %v2010_v20, %v1625_v19  ;;  %v2026_v23 = vld [vmem:[%s2193_s25 + $0x1e4] sm:$0xf0]  ;;  %v1976_v25 = vld [vmem:[%s2193_s25 + $0x54] sm:$0xf0] }
  0x1d   : > { %1124 = vmatpush.bf16.msra.mxu3 %v1698_v13  ;;  %v1690_v26 = vor.u32 %v2026_v23, %v1689_v21  ;;  %v1553_v27 = vld [vmem:[%s2193_s25 + $0xd0] sm:$0xf]  ;;  %v1992_v28 = vld [vmem:[%s2193_s25 + $0xd4] sm:$0xf0]  ;;  %v1490_v30 = vor.u32 %v1976_v25, %v1489_v24  ;;  %v1481_v36 = vld [vmem:[%s2193_s25 + $0x40] sm:$0xf] }
  0x1e   : > { %v1617_v29 = vld [vmem:[%s2193_s25 + $0x150] sm:$0xf]  ;;  %1086 = vmatpush.bf16.msra.mxu0 %v1498_v17  ;;  %v2008_v31 = vld [vmem:[%s2193_s25 + $0x154] sm:$0xf0]  ;;  %v1554_v34 = vor.u32 %v1992_v28, %v1553_v27  ;;  %v1974_v37 = vld [vmem:[%s2193_s25 + $0x44] sm:$0xf0] }
  0x1f   : > { %v1681_v32 = vld [vmem:[%s2193_s25 + $0x1d0] sm:$0xf]  ;;  %v2024_v33 = vld [vmem:[%s2193_s25 + $0x1d4] sm:$0xf0]  ;;  %1099 = vmatpush.bf16.msra.mxu1 %v1562_v18  ;;  %v1618_v35 = vor.u32 %v2008_v31, %v1617_v29  ;;  %v1545_v38 = vld [vmem:[%s2193_s25 + $0xc0] sm:$0xf]  ;;  %v1482_v45 = vor.u32 %v1974_v37, %v1481_v36 }
  0x20   : > { %1112 = vmatpush.bf16.msra.mxu2 %v1626_v22  ;;  %v1682_v39 = vor.u32 %v2024_v33, %v1681_v32  ;;  %v1990_v40 = vld [vmem:[%s2193_s25 + $0xc4] sm:$0xf0]  ;;  %v1609_v41 = vld [vmem:[%s2193_s25 + $0x140] sm:$0xf]  ;;  %v1473_v48 = vld [vmem:[%s2193_s25 + $0x30] sm:$0xf] }
  0x21   : > { %1125 = vmatpush.bf16.msra.mxu3 %v1690_v26  ;;  %v2006_v42 = vld [vmem:[%s2193_s25 + $0x144] sm:$0xf0]  ;;  %v1673_v43 = vld [vmem:[%s2193_s25 + $0x1c0] sm:$0xf]  ;;  %v1546_v46 = vor.u32 %v1990_v40, %v1545_v38  ;;  %v1972_v49 = vld [vmem:[%s2193_s25 + $0x34] sm:$0xf0] }
  0x22   : > { %v2022_v44 = vld [vmem:[%s2193_s25 + $0x1c4] sm:$0xf0]  ;;  %1087 = vmatpush.bf16.msra.mxu0 %v1490_v30  ;;  %v1610_v47 = vor.u32 %v2006_v42, %v1609_v41  ;;  %v1537_v50 = vld [vmem:[%s2193_s25 + $0xb0] sm:$0xf]  ;;  %v1988_v52 = vld [vmem:[%s2193_s25 + $0xb4] sm:$0xf0]  ;;  %v1474_v57 = vor.u32 %v1972_v49, %v1473_v48 }
  0x23   : > { %1100 = vmatpush.bf16.msra.mxu1 %v1554_v34  ;;  %v1674_v51 = vor.u32 %v2022_v44, %v1673_v43  ;;  %v1601_v53 = vld [vmem:[%s2193_s25 + $0x130] sm:$0xf]  ;;  %v2004_v54 = vld [vmem:[%s2193_s25 + $0x134] sm:$0xf0]  ;;  %v1538_v58 = vor.u32 %v1988_v52, %v1537_v50  ;;  %v1465_v60 = vld [vmem:[%s2193_s25 + $0x20] sm:$0xf] }
  0x24   : > { %1113 = vmatpush.bf16.msra.mxu2 %v1618_v35  ;;  %v1665_v55 = vld [vmem:[%s2193_s25 + $0x1b0] sm:$0xf]  ;;  %v2020_v56 = vld [vmem:[%s2193_s25 + $0x1b4] sm:$0xf0]  ;;  %v1602_v59 = vor.u32 %v2004_v54, %v1601_v53  ;;  %v1970_v61 = vld [vmem:[%s2193_s25 + $0x24] sm:$0xf0] }
  0x25   : > { %1126 = vmatpush.bf16.msra.mxu3 %v1682_v39  ;;  %v1529_v62 = vld [vmem:[%s2193_s25 + $0xa0] sm:$0xf]  ;;  %v1666_v63 = vor.u32 %v2020_v56, %v1665_v55  ;;  %v1986_v0 = vld [vmem:[%s2193_s25 + $0xa4] sm:$0xf0]  ;;  %v1466_v5 = vor.u32 %v1970_v61, %v1465_v60  ;;  %v1457_v8 = vld [vmem:[%s2193_s25 + $0x10] sm:$0xf] }
  0x26   : > { %1088 = vmatpush.bf16.msra.mxu0 %v1482_v45  ;;  %v1593_v1 = vld [vmem:[%s2193_s25 + $0x120] sm:$0xf]  ;;  %v2002_v2 = vld [vmem:[%s2193_s25 + $0x124] sm:$0xf0]  ;;  %v1530_v6 = vor.u32 %v1986_v0, %v1529_v62  ;;  %v1968_v9 = vld [vmem:[%s2193_s25 + $0x14] sm:$0xf0] }
  0x27   : > { %1101 = vmatpush.bf16.msra.mxu1 %v1546_v46  ;;  %v1657_v3 = vld [vmem:[%s2193_s25 + $0x1a0] sm:$0xf]  ;;  %v2018_v4 = vld [vmem:[%s2193_s25 + $0x1a4] sm:$0xf0]  ;;  %v1594_v7 = vor.u32 %v2002_v2, %v1593_v1  ;;  %v1521_v10 = vld [vmem:[%s2193_s25 + $0x90] sm:$0xf]  ;;  %v1458_v17 = vor.u32 %v1968_v9, %v1457_v8 }
  0x28   : > { %1114 = vmatpush.bf16.msra.mxu2 %v1610_v47  ;;  %v1658_v11 = vor.u32 %v2018_v4, %v1657_v3  ;;  %v1984_v12 = vld [vmem:[%s2193_s25 + $0x94] sm:$0xf0]  ;;  %v1585_v13 = vld [vmem:[%s2193_s25 + $0x110] sm:$0xf]  ;;  %v1449_v18 = vld [vmem:[%s2193_s25] sm:$0xf] }
  0x29   : > { %1127 = vmatpush.bf16.msra.mxu3 %v1674_v51  ;;  %v2000_v14 = vld [vmem:[%s2193_s25 + $0x114] sm:$0xf0]  ;;  %v1649_v15 = vld [vmem:[%s2193_s25 + $0x190] sm:$0xf]  ;;  %v1966_v19 = vld [vmem:[%s2193_s25 + $0x4] sm:$0xf0]  ;;  %v1522_v20 = vor.u32 %v1984_v12, %v1521_v10 }
  0x2a   : > { %1089 = vmatpush.bf16.msra.mxu0 %v1474_v57  ;;  %v2016_v16 = vld [vmem:[%s2193_s25 + $0x194] sm:$0xf0]  ;;  %v1586_v21 = vor.u32 %v2000_v14, %v1585_v13  ;;  %v1513_v22 = vld [vmem:[%s2193_s25 + $0x80] sm:$0xf]  ;;  %v1982_v23 = vld [vmem:[%s2193_s25 + $0x84] sm:$0xf0]  ;;  %v1450_v32 = vor.u32 %v1966_v19, %v1449_v18 }
  0x2b   : > { %1102 = vmatpush.bf16.msra.mxu1 %v1538_v58  ;;  %v1577_v24 = vld [vmem:[%s2193_s25 + $0x100] sm:$0xf]  ;;  %v1650_v25 = vor.u32 %v2016_v16, %v1649_v15  ;;  %v1998_v26 = vld [vmem:[%s2193_s25 + $0x104] sm:$0xf0]  ;;  %v1761_v29 = vld [vmem:[%s2193_s25 + $0x270] sm:$0xf]  ;;  %v1514_v36 = vor.u32 %v1982_v23, %v1513_v22 }
  0x2c   : > { %1115 = vmatpush.bf16.msra.mxu2 %v1602_v59  ;;  %v1641_v27 = vld [vmem:[%s2193_s25 + $0x180] sm:$0xf]  ;;  %v2014_v28 = vld [vmem:[%s2193_s25 + $0x184] sm:$0xf0]  ;;  %v2044_v30 = vld [vmem:[%s2193_s25 + $0x274] sm:$0xf0]  ;;  %v1578_v37 = vor.u32 %v1998_v26, %v1577_v24 }
  0x2d   : > { %1128 = vmatpush.bf16.msra.mxu3 %v1666_v63  ;;  %v1825_v31 = vld [vmem:[%s2193_s25 + $0x2f0] sm:$0xf]  ;;  %v2060_v33 = vld [vmem:[%s2193_s25 + $0x2f4] sm:$0xf0]  ;;  %v1642_v40 = vor.u32 %v2014_v28, %v1641_v27  ;;  %v1762_v41 = vor.u32 %v2044_v30, %v1761_v29  ;;  %v1753_v44 = vld [vmem:[%s2193_s25 + $0x260] sm:$0xf] }
  0x2e   : > { %1090 = vmatpush.bf16.msra.mxu0 %v1466_v5  ;;  %v1889_v34 = vld [vmem:[%s2193_s25 + $0x370] sm:$0xf]  ;;  %v2076_v35 = vld [vmem:[%s2193_s25 + $0x374] sm:$0xf0]  ;;  %v1826_v42 = vor.u32 %v2060_v33, %v1825_v31  ;;  %v2042_v45 = vld [vmem:[%s2193_s25 + $0x264] sm:$0xf0] }
  0x2f   : > { %1103 = vmatpush.bf16.msra.mxu1 %v1530_v6  ;;  %v1953_v38 = vld [vmem:[%s2193_s25 + $0x3f0] sm:$0xf]  ;;  %v2092_v39 = vld [vmem:[%s2193_s25 + $0x3f4] sm:$0xf0]  ;;  %v1890_v43 = vor.u32 %v2076_v35, %v1889_v34  ;;  %v1817_v46 = vld [vmem:[%s2193_s25 + $0x2e0] sm:$0xf]  ;;  %v1754_v53 = vor.u32 %v2042_v45, %v1753_v44 }
  0x30   : > { %1116 = vmatpush.bf16.msra.mxu2 %v1594_v7  ;;  %v1954_v47 = vor.u32 %v2092_v39, %v1953_v38  ;;  %v2058_v48 = vld [vmem:[%s2193_s25 + $0x2e4] sm:$0xf0]  ;;  %v1881_v49 = vld [vmem:[%s2193_s25 + $0x360] sm:$0xf]  ;;  %v1745_v54 = vld [vmem:[%s2193_s25 + $0x250] sm:$0xf] }
  0x31   : > { %1129 = vmatpush.bf16.msra.mxu3 %v1658_v11  ;;  %v2074_v50 = vld [vmem:[%s2193_s25 + $0x364] sm:$0xf0]  ;;  %v1945_v51 = vld [vmem:[%s2193_s25 + $0x3e0] sm:$0xf]  ;;  %v1818_v55 = vor.u32 %v2058_v48, %v1817_v46  ;;  %v2040_v57 = vld [vmem:[%s2193_s25 + $0x254] sm:$0xf0] }
  0x32   : > { %1091 = vmatpush.bf16.msra.mxu0 %v1458_v17  ;;  %v2090_v52 = vld [vmem:[%s2193_s25 + $0x3e4] sm:$0xf0]  ;;  %v1882_v56 = vor.u32 %v2074_v50, %v1881_v49  ;;  %v1809_v58 = vld [vmem:[%s2193_s25 + $0x2d0] sm:$0xf]  ;;  %v2056_v61 = vld [vmem:[%s2193_s25 + $0x2d4] sm:$0xf0]  ;;  %v1746_v4 = vor.u32 %v2040_v57, %v1745_v54 }
  0x33   : > { %1104 = vmatpush.bf16.msra.mxu1 %v1522_v20  ;;  %v286_v59 = vld [vmem:[%s2188_s21 + $0x8] sm:$0xff]  ;;  %v1946_v60 = vor.u32 %v2090_v52, %v1945_v51  ;;  %v1873_v62 = vld [vmem:[%s2193_s25 + $0x350] sm:$0xf]  ;;  %v2072_v63 = vld [vmem:[%s2193_s25 + $0x354] sm:$0xf0]  ;;  %v1810_v8 = vor.u32 %v2056_v61, %v1809_v58  ;;  %p1959_p7 = scmp.ne.s32.totalorder %s2132_s12, 1 }
  0x34   : > { %1117 = vmatpush.bf16.msra.mxu2 %v1586_v21  ;;  %v423_v0 = vunpack.c.l.b16 %v286_v59  ;;  %v424_v1 = vunpack.c.h.b16 %v286_v59  ;;  %v1937_v2 = vld [vmem:[%s2193_s25 + $0x3d0] sm:$0xf]  ;;  %v2088_v3 = vld [vmem:[%s2193_s25 + $0x3d4] sm:$0xf0]  ;;  %v285_v6 = vld [vmem:[%s2188_s21] sm:$0xff]  ;;  %v1874_v9 = vor.u32 %v2072_v63, %v1873_v62 }
  0x35   : > { %1130 = vmatpush.bf16.msra.mxu3 %v1650_v25  ;;  %v1737_v10 = vld [vmem:[%s2193_s25 + $0x240] sm:$0xf]  ;;  %v2038_v11 = vld [vmem:[%s2193_s25 + $0x244] sm:$0xf0]  ;;  %v421_v13 = vunpack.c.l.b16 %v285_v6  ;;  %v422_v14 = vunpack.c.h.b16 %v285_v6  ;;  %v1938_v15 = vor.u32 %v2088_v3, %v1937_v2  ;;  %v1729_v26 = vld [vmem:[%s2193_s25 + $0x230] sm:$0xf] }
  0x36   : > { %1092 = vmatpush.bf16.msra.mxu0 %v1450_v32  ;;  %v2285_v5 = vpack.c.b16 %v423_v0, %v423_v0  ;;  %v2288_v7 = vpack.c.b16 %v424_v1, %v424_v1  ;;  %v1801_v12 = vld [vmem:[%s2193_s25 + $0x2c0] sm:$0xf]  ;;  %v2054_v16 = vld [vmem:[%s2193_s25 + $0x2c4] sm:$0xf0]  ;;  %v1738_v23 = vor.u32 %v2038_v11, %v1737_v10  ;;  %v2036_v27 = vld [vmem:[%s2193_s25 + $0x234] sm:$0xf0] }
  0x37   : > { %1105 = vmatpush.bf16.msra.mxu1 %v1514_v36  ;;  %v1865_v17 = vld [vmem:[%s2193_s25 + $0x340] sm:$0xf]  ;;  %v2070_v18 = vld [vmem:[%s2193_s25 + $0x344] sm:$0xf0]  ;;  %v2299_v21 = vpack.c.b16 %v421_v13, %v421_v13  ;;  %v2302_v22 = vpack.c.b16 %v422_v14, %v422_v14  ;;  %v1802_v24 = vor.u32 %v2054_v16, %v1801_v12  ;;  %v1793_v28 = vld [vmem:[%s2193_s25 + $0x2b0] sm:$0xf]  ;;  %v1730_v35 = vor.u32 %v2036_v27, %v1729_v26 }
  0x38   : > { %1118 = vmatpush.bf16.msra.mxu2 %v1578_v37  ;;  %v1929_v19 = vld [vmem:[%s2193_s25 + $0x3c0] sm:$0xf]  ;;  %v2086_v20 = vld [vmem:[%s2193_s25 + $0x3c4] sm:$0xf0]  ;;  %v1866_v25 = vor.u32 %v2070_v18, %v1865_v17  ;;  %v2052_v30 = vld [vmem:[%s2193_s25 + $0x2b4] sm:$0xf0] }
  0x39   : > { %1131 = vmatpush.bf16.msra.mxu3 %v1642_v40  ;;  %v1930_v29 = vor.u32 %v2086_v20, %v1929_v19  ;;  %v1857_v31 = vld [vmem:[%s2193_s25 + $0x330] sm:$0xf]  ;;  %v2068_v32 = vld [vmem:[%s2193_s25 + $0x334] sm:$0xf0]  ;;  %1093 = vmatmul.bf16.vlgmr.msra.gmra.mxu0 %v2299_v21  ;;  %v1794_v36 = vor.u32 %v2052_v30, %v1793_v28  ;;  %v1721_v38 = vld [vmem:[%s2193_s25 + $0x220] sm:$0xf] }
  0x3a   : > { %1137 = vmatpush.bf16.msrb.mxu0 %v1762_v41  ;;  %v1921_v33 = vld [vmem:[%s2193_s25 + $0x3b0] sm:$0xf]  ;;  %v2084_v34 = vld [vmem:[%s2193_s25 + $0x3b4] sm:$0xf0]  ;;  %1106 = vmatmul.bf16.vlgmr.msra.gmra.mxu1 %v2302_v22  ;;  %v1858_v37 = vor.u32 %v2068_v32, %v1857_v31  ;;  %v2034_v39 = vld [vmem:[%s2193_s25 + $0x224] sm:$0xf0] }
  0x3b   : > { %1150 = vmatpush.bf16.msrb.mxu1 %v1826_v42  ;;  %1119 = vmatmul.bf16.vlgmr.msra.gmra.mxu2 %v2285_v5  ;;  %v1785_v40 = vld [vmem:[%s2193_s25 + $0x2a0] sm:$0xf]  ;;  %v1922_v41 = vor.u32 %v2084_v34, %v1921_v33  ;;  %v2050_v42 = vld [vmem:[%s2193_s25 + $0x2a4] sm:$0xf0]  ;;  %v1713_v50 = vld [vmem:[%s2193_s25 + $0x210] sm:$0xf] }
  0x3c   : > { %1163 = vmatpush.bf16.msrb.mxu2 %v1890_v43  ;;  %1132 = vmatmul.bf16.vlgmr.msra.gmra.mxu3 %v2288_v7  ;;  %v1849_v43 = vld [vmem:[%s2193_s25 + $0x320] sm:$0xf]  ;;  %v2066_v44 = vld [vmem:[%s2193_s25 + $0x324] sm:$0xf0]  ;;  %v1786_v48 = vor.u32 %v2050_v42, %v1785_v40  ;;  %v2032_v51 = vld [vmem:[%s2193_s25 + $0x214] sm:$0xf0] }
  0x3d   : > { %1176 = vmatpush.bf16.msrb.mxu3 %v1954_v47  ;;  %v1913_v45 = vld [vmem:[%s2193_s25 + $0x3a0] sm:$0xf]  ;;  %v2082_v46 = vld [vmem:[%s2193_s25 + $0x3a4] sm:$0xf0]  ;;  %v1722_v47 = vor.u32 %v2034_v39, %v1721_v38  ;;  %v1850_v49 = vor.u32 %v2066_v44, %v1849_v43  ;;  %v1777_v52 = vld [vmem:[%s2193_s25 + $0x290] sm:$0xf] }
  0x3e   : > { %1138 = vmatpush.bf16.msrb.mxu0 %v1754_v53  ;;  %v1914_v53 = vor.u32 %v2082_v46, %v1913_v45  ;;  %v2048_v54 = vld [vmem:[%s2193_s25 + $0x294] sm:$0xf0]  ;;  %v1905_v57 = vld [vmem:[%s2193_s25 + $0x390] sm:$0xf]  ;;  %v1705_v59 = vld [vmem:[%s2193_s25 + $0x200] sm:$0xf] }
  0x3f   : > { %1151 = vmatpush.bf16.msrb.mxu1 %v1818_v55  ;;  %v1841_v55 = vld [vmem:[%s2193_s25 + $0x310] sm:$0xf]  ;;  %v2080_v58 = vld [vmem:[%s2193_s25 + $0x394] sm:$0xf0]  ;;  %v2030_v61 = vld [vmem:[%s2193_s25 + $0x204] sm:$0xf0]  ;;  %v1778_v0 = vor.u32 %v2048_v54, %v1777_v52 }
  0x40   : > { %1164 = vmatpush.bf16.msrb.mxu2 %v1882_v56  ;;  %v2064_v56 = vld [vmem:[%s2193_s25 + $0x314] sm:$0xf0]  ;;  %v1769_v62 = vld [vmem:[%s2193_s25 + $0x280] sm:$0xf]  ;;  %v2046_v63 = vld [vmem:[%s2193_s25 + $0x284] sm:$0xf0]  ;;  %v1906_v6 = vor.u32 %v2080_v58, %v1905_v57  ;;  %v1706_v14 = vor.u32 %v2030_v61, %v1705_v59 }
  0x41   : > { %1177 = vmatpush.bf16.msrb.mxu3 %v1946_v60  ;;  %v1714_v60 = vor.u32 %v2032_v51, %v1713_v50  ;;  %v1842_v1 = vor.u32 %v2064_v56, %v1841_v55  ;;  %v1833_v2 = vld [vmem:[%s2193_s25 + $0x300] sm:$0xf]  ;;  %v2062_v3 = vld [vmem:[%s2193_s25 + $0x304] sm:$0xf0]  ;;  %v287_v10 = vld [vmem:[%s2188_s21 + $0x10] sm:$0xff]  ;;  %v1770_v19 = vor.u32 %v2046_v63, %v1769_v62 }
  0x42   : > { %1139 = vmatpush.bf16.msrb.mxu0 %v1746_v4  ;;  %v288_v4 = vld [vmem:[%s2188_s21 + $0x18] sm:$0xff]  ;;  %v1979_v11 = vld [vmem:[%s2193_s25 + $0x74] sm:$0xf]  ;;  %v1834_v20 = vor.u32 %v2062_v3, %v1833_v2  ;;  %v1977_v32 = vld [vmem:[%s2193_s25 + $0x64] sm:$0xf] }
  0x43   : > { %1152 = vmatpush.bf16.msrb.mxu1 %v1810_v8  ;;  %v1897_v8 = vld [vmem:[%s2193_s25 + $0x380] sm:$0xf]  ;;  %v1507_v12 = vld [vmem:[%s2193_s25 + $0x78] sm:$0xf0]  ;;  %v1995_v13 = vld [vmem:[%s2193_s25 + $0xf4] sm:$0xf]  ;;  %v427_v18 = vunpack.c.l.b16 %v288_v4  ;;  %v428_v26 = vunpack.c.h.b16 %v288_v4 }
  0x44   : > { %1165 = vmatpush.bf16.msrb.mxu2 %v1874_v9  ;;  %v2078_v9 = vld [vmem:[%s2193_s25 + $0x384] sm:$0xf0]  ;;  %v2011_v16 = vld [vmem:[%s2193_s25 + $0x174] sm:$0xf]  ;;  %v1635_v17 = vld [vmem:[%s2193_s25 + $0x178] sm:$0xf0]  ;;  %v1510_v28 = vor.u32 %v1979_v11, %v1507_v12 }
  0x45   : > { %1178 = vmatpush.bf16.msrb.mxu3 %v1938_v15  ;;  %v1571_v15 = vld [vmem:[%s2193_s25 + $0xf8] sm:$0xf0]  ;;  %v1898_v27 = vor.u32 %v2078_v9, %v1897_v8  ;;  %v1638_v31 = vor.u32 %v2011_v16, %v1635_v17  ;;  %v1499_v33 = vld [vmem:[%s2193_s25 + $0x68] sm:$0xf0]  ;;  %v1993_v34 = vld [vmem:[%s2193_s25 + $0xe4] sm:$0xf]  ;;  %v2354_v39 = vpack.c.b16 %v427_v18, %v427_v18  ;;  %v2360_v43 = vpack.c.b16 %v428_v26, %v428_v26 }
  0x46   : > { %1140 = vmatpush.bf16.msrb.mxu0 %v1738_v23  ;;  %v2027_v23 = vld [vmem:[%s2193_s25 + $0x1f4] sm:$0xf]  ;;  %v1574_v30 = vor.u32 %v1995_v13, %v1571_v15  ;;  %v1627_v38 = vld [vmem:[%s2193_s25 + $0x168] sm:$0xf0]  ;;  %v2025_v40 = vld [vmem:[%s2193_s25 + $0x1e4] sm:$0xf]  ;;  %v1502_v44 = vor.u32 %v1977_v32, %v1499_v33 }
  0x47   : > { %1153 = vmatpush.bf16.msrb.mxu1 %v1802_v24  ;;  %v1699_v24 = vld [vmem:[%s2193_s25 + $0x1f8] sm:$0xf0]  ;;  %v1991_v50 = vld [vmem:[%s2193_s25 + $0xd4] sm:$0xf]  ;;  %v1483_v61 = vld [vmem:[%s2193_s25 + $0x48] sm:$0xf0] }
  0x48   : > { %1166 = vmatpush.bf16.msrb.mxu2 %v1866_v25  ;;  %v425_v25 = vunpack.c.l.b16 %v287_v10  ;;  %v1555_v52 = vld [vmem:[%s2193_s25 + $0xd8] sm:$0xf0]  ;;  %v2023_v55 = vld [vmem:[%s2193_s25 + $0x1d4] sm:$0xf]  ;;  %v1989_v62 = vld [vmem:[%s2193_s25 + $0xc4] sm:$0xf] }
  0x49   : > { %1179 = vmatpush.bf16.msrb.mxu3 %v1930_v29  ;;  %v426_v29 = vunpack.c.h.b16 %v287_v10  ;;  %v1619_v54 = vld [vmem:[%s2193_s25 + $0x158] sm:$0xf0]  ;;  %v1558_v58 = vor.u32 %v1991_v50, %v1555_v52  ;;  %v1611_v2 = vld [vmem:[%s2193_s25 + $0x148] sm:$0xf0]  ;;  %v2021_v3 = vld [vmem:[%s2193_s25 + $0x1c4] sm:$0xf] }
  0x4a   : > { %1141 = vmatpush.bf16.msrb.mxu0 %v1730_v35  ;;  %v1702_v35 = vor.u32 %v2027_v23, %v1699_v24  ;;  %v2358_v42 = vpack.c.b16 %v425_v25, %v425_v25  ;;  %v1683_v56 = vld [vmem:[%s2193_s25 + $0x1d8] sm:$0xf0]  ;;  %v1675_v4 = vld [vmem:[%s2193_s25 + $0x1c8] sm:$0xf0]  ;;  %v1971_v10 = vld [vmem:[%s2193_s25 + $0x34] sm:$0xf] }
  0x4b   : > { %1154 = vmatpush.bf16.msrb.mxu1 %v1794_v36  ;;  %v1563_v36 = vld [vmem:[%s2193_s25 + $0xe8] sm:$0xf0]  ;;  %v2362_v45 = vpack.c.b16 %v426_v29, %v426_v29  ;;  %v1686_v63 = vor.u32 %v2023_v55, %v1683_v56  ;;  %v1475_v11 = vld [vmem:[%s2193_s25 + $0x38] sm:$0xf0]  ;;  %v1987_v12 = vld [vmem:[%s2193_s25 + $0xb4] sm:$0xf]  ;;  %v1678_v13 = vor.u32 %v2021_v3, %v1675_v4 }
  0x4c   : > { %1167 = vmatpush.bf16.msrb.mxu2 %v1858_v37  ;;  %v2009_v37 = vld [vmem:[%s2193_s25 + $0x164] sm:$0xf]  ;;  %v1566_v46 = vor.u32 %v1993_v34, %v1563_v36  ;;  %v2003_v15 = vld [vmem:[%s2193_s25 + $0x134] sm:$0xf]  ;;  %v1603_v16 = vld [vmem:[%s2193_s25 + $0x138] sm:$0xf0] }
  0x4d   : > { %1180 = vmatpush.bf16.msrb.mxu3 %v1922_v41  ;;  %v1691_v41 = vld [vmem:[%s2193_s25 + $0x1e8] sm:$0xf0]  ;;  %v2019_v17 = vld [vmem:[%s2193_s25 + $0x1b4] sm:$0xf]  ;;  %v1667_v18 = vld [vmem:[%s2193_s25 + $0x1b8] sm:$0xf0]  ;;  %v1606_v23 = vor.u32 %v2003_v15, %v1603_v16 }
  0x4e   : > { %1142 = vmatpush.bf16.msrb.mxu0 %v1722_v47  ;;  %v1630_v47 = vor.u32 %v2009_v37, %v1627_v38  ;;  %v1694_v51 = vor.u32 %v2025_v40, %v1691_v41  ;;  %v1969_v24 = vld [vmem:[%s2193_s25 + $0x24] sm:$0xf]  ;;  %v1467_v25 = vld [vmem:[%s2193_s25 + $0x28] sm:$0xf0]  ;;  %v1967_v36 = vld [vmem:[%s2193_s25 + $0x14] sm:$0xf] }
  0x4f   : > { %1155 = vmatpush.bf16.msrb.mxu1 %v1786_v48  ;;  %v1975_v48 = vld [vmem:[%s2193_s25 + $0x54] sm:$0xf]  ;;  %v1985_v26 = vld [vmem:[%s2193_s25 + $0xa4] sm:$0xf]  ;;  %v1659_v32 = vld [vmem:[%s2193_s25 + $0x1a8] sm:$0xf0]  ;;  %v1470_v33 = vor.u32 %v1969_v24, %v1467_v25 }
  0x50   : > { %1168 = vmatpush.bf16.msrb.mxu2 %v1850_v49  ;;  %v1491_v49 = vld [vmem:[%s2193_s25 + $0x58] sm:$0xf0]  ;;  %v2001_v29 = vld [vmem:[%s2193_s25 + $0x124] sm:$0xf]  ;;  %v1983_v38 = vld [vmem:[%s2193_s25 + $0x94] sm:$0xf] }
  0x51   : > { %1181 = vmatpush.bf16.msrb.mxu3 %v1914_v53  ;;  %v2007_v53 = vld [vmem:[%s2193_s25 + $0x154] sm:$0xf]  ;;  %v1494_v57 = vor.u32 %v1975_v48, %v1491_v49  ;;  %v1459_v37 = vld [vmem:[%s2193_s25 + $0x18] sm:$0xf0]  ;;  %v1965_v50 = vld [vmem:[%s2193_s25 + $0x4] sm:$0xf] }
  0x52   : > { %1143 = vmatpush.bf16.msrb.mxu0 %v1714_v60  ;;  %v1622_v59 = vor.u32 %v2007_v53, %v1619_v54  ;;  %v1973_v60 = vld [vmem:[%s2193_s25 + $0x44] sm:$0xf]  ;;  %v1523_v41 = vld [vmem:[%s2193_s25 + $0x98] sm:$0xf0]  ;;  %v1462_v49 = vor.u32 %v1967_v36, %v1459_v37  ;;  %v1515_v55 = vld [vmem:[%s2193_s25 + $0x88] sm:$0xf0] }
  0x53   : > { %1156 = vmatpush.bf16.msrb.mxu1 %v1778_v0  ;;  %v1547_v0 = vld [vmem:[%s2193_s25 + $0xc8] sm:$0xf0]  ;;  %v1651_v48 = vld [vmem:[%s2193_s25 + $0x198] sm:$0xf0]  ;;  %v1526_v52 = vor.u32 %v1983_v38, %v1523_v41  ;;  %v1981_v54 = vld [vmem:[%s2193_s25 + $0x84] sm:$0xf] }
  0x54   : > { %1169 = vmatpush.bf16.msrb.mxu2 %v1842_v1  ;;  %v2005_v1 = vld [vmem:[%s2193_s25 + $0x144] sm:$0xf]  ;;  %v1550_v8 = vor.u32 %v1989_v62, %v1547_v0  ;;  %v1763_v62 = vld [vmem:[%s2193_s25 + $0x278] sm:$0xf0]  ;;  %v1518_v4 = vor.u32 %v1981_v54, %v1515_v55  ;;  %v1755_v15 = vld [vmem:[%s2193_s25 + $0x268] sm:$0xf0] }
  0x55   : > { %1182 = vmatpush.bf16.msrb.mxu3 %v1906_v6  ;;  %v1486_v6 = vor.u32 %v1973_v60, %v1483_v61  ;;  %v1614_v9 = vor.u32 %v2005_v1, %v1611_v2  ;;  %v1997_v56 = vld [vmem:[%s2193_s25 + $0x104] sm:$0xf]  ;;  %v1643_v60 = vld [vmem:[%s2193_s25 + $0x188] sm:$0xf0]  ;;  %v2043_v61 = vld [vmem:[%s2193_s25 + $0x274] sm:$0xf] }
  0x56   : > { %1144 = vmatpush.bf16.msrb.mxu0 %v1706_v14  ;;  %v1539_v14 = vld [vmem:[%s2193_s25 + $0xb8] sm:$0xf0]  ;;  %v2075_v2 = vld [vmem:[%s2193_s25 + $0x374] sm:$0xf]  ;;  %v2057_v16 = vld [vmem:[%s2193_s25 + $0x2e4] sm:$0xf] }
  0x57   : > { %1157 = vmatpush.bf16.msrb.mxu1 %v1770_v19  ;;  %v1478_v19 = vor.u32 %v1971_v10, %v1475_v11  ;;  %v1827_v1 = vld [vmem:[%s2193_s25 + $0x2f8] sm:$0xf0]  ;;  %v1766_v11 = vor.u32 %v2043_v61, %v1763_v62  ;;  %v1947_v24 = vld [vmem:[%s2193_s25 + $0x3e8] sm:$0xf0]  ;;  %v2053_v41 = vld [vmem:[%s2193_s25 + $0x2c4] sm:$0xf] }
  0x58   : > { %1170 = vmatpush.bf16.msrb.mxu2 %v1834_v20  ;;  %v1542_v20 = vor.u32 %v1987_v12, %v1539_v14  ;;  %v1891_v3 = vld [vmem:[%s2193_s25 + $0x378] sm:$0xf0]  ;;  %v2041_v14 = vld [vmem:[%s2193_s25 + $0x264] sm:$0xf]  ;;  %v2051_v54 = vld [vmem:[%s2193_s25 + $0x2b4] sm:$0xf] }
  0x59   : > { %1183 = vmatpush.bf16.msrb.mxu3 %v1898_v27  ;;  %1145 = vmatmul.bf16.vlgmr.msrb.gmra.mxu0 %v2358_v42  ;;  %v1670_v27 = vor.u32 %v2019_v17, %v1667_v18  ;;  %v1819_v18 = vld [vmem:[%s2193_s25 + $0x2e8] sm:$0xf0]  ;;  %v1758_v25 = vor.u32 %v2041_v14, %v1755_v15  ;;  %v1939_v36 = vld [vmem:[%s2193_s25 + $0x3d8] sm:$0xf0]  ;;  %v2031_v14 = vld [vmem:[%s2193_s25 + $0x214] sm:$0xf] }
  0x5a   : > { %1189 = vmatpush.bf16.msra.mxu0 %v1510_v28  ;;  %1158 = vmatmul.bf16.vlgmr.msrb.gmra.mxu1 %v2362_v45  ;;  %v1531_v28 = vld [vmem:[%s2193_s25 + $0xa8] sm:$0xf0]  ;;  %v1715_v15 = vld [vmem:[%s2193_s25 + $0x218] sm:$0xf0] }
  0x5b   : > { %1202 = vmatpush.bf16.msra.mxu1 %v1574_v30  ;;  %1171 = vmatmul.bf16.vlgmr.msrb.gmra.mxu2 %v2354_v39  ;;  %v1595_v30 = vld [vmem:[%s2193_s25 + $0x128] sm:$0xf0]  ;;  %v1534_v34 = vor.u32 %v1985_v26, %v1531_v28  ;;  %v1822_v26 = vor.u32 %v2057_v16, %v1819_v18  ;;  %v2039_v28 = vld [vmem:[%s2193_s25 + $0x254] sm:$0xf]  ;;  %v1779_v18 = vld [vmem:[%s2193_s25 + $0x298] sm:$0xf0] }
  0x5c   : > { %1215 = vmatpush.bf16.msra.mxu2 %v1638_v31  ;;  %1184 = vmatmul.bf16.vlgmr.msrb.gmra.mxu3 %v2360_v43  ;;  %v2017_v31 = vld [vmem:[%s2193_s25 + $0x1a4] sm:$0xf]  ;;  %v2047_v16 = vld [vmem:[%s2193_s25 + $0x294] sm:$0xf] }
  0x5d   : > { %1228 = vmatpush.bf16.msra.mxu3 %v1702_v35  ;;  %v1598_v35 = vor.u32 %v2001_v29, %v1595_v30  ;;  %v1662_v40 = vor.u32 %v2017_v31, %v1659_v32  ;;  %v1747_v29 = vld [vmem:[%s2193_s25 + $0x258] sm:$0xf0]  ;;  %v2055_v30 = vld [vmem:[%s2193_s25 + $0x2d4] sm:$0xf] }
  0x5e   : > { %1190 = vmatpush.bf16.msra.mxu0 %v1502_v44  ;;  %v1999_v44 = vld [vmem:[%s2193_s25 + $0x114] sm:$0xf]  ;;  %v1811_v32 = vld [vmem:[%s2193_s25 + $0x2d8] sm:$0xf0]  ;;  %v1750_v37 = vor.u32 %v2039_v28, %v1747_v29  ;;  %v2029_v28 = vld [vmem:[%s2193_s25 + $0x204] sm:$0xf] }
  0x5f   : > { %1203 = vmatpush.bf16.msra.mxu1 %v1566_v46  ;;  %v1587_v46 = vld [vmem:[%s2193_s25 + $0x118] sm:$0xf0]  ;;  %v1707_v29 = vld [vmem:[%s2193_s25 + $0x208] sm:$0xf0] }
  0x60   : > { %1216 = vmatpush.bf16.msra.mxu2 %v1630_v47  ;;  %v2015_v47 = vld [vmem:[%s2193_s25 + $0x194] sm:$0xf]  ;;  %v1590_v53 = vor.u32 %v1999_v44, %v1587_v46  ;;  %v1803_v46 = vld [vmem:[%s2193_s25 + $0x2c8] sm:$0xf0] }
  0x61   : > { %1229 = vmatpush.bf16.msra.mxu3 %v1694_v51  ;;  %v1451_v51 = vld [vmem:[%s2193_s25 + $0x8] sm:$0xf0] }
  0x62   : > { %1191 = vmatpush.bf16.msra.mxu0 %v1494_v57  ;;  %v1654_v57 = vor.u32 %v2015_v47, %v1651_v48  ;;  %v1454_v0 = vor.u32 %v1965_v50, %v1451_v51  ;;  %v1867_v47 = vld [vmem:[%s2193_s25 + $0x348] sm:$0xf0]  ;;  %v2085_v48 = vld [vmem:[%s2193_s25 + $0x3c4] sm:$0xf]  ;;  %v1806_v50 = vor.u32 %v2053_v41, %v1803_v46 }
  0x63   : > { %1204 = vmatpush.bf16.msra.mxu1 %v1558_v58  ;;  %v1579_v58 = vld [vmem:[%s2193_s25 + $0x108] sm:$0xf0] }
  0x64   : > { %1217 = vmatpush.bf16.msra.mxu2 %v1622_v59  ;;  %v2013_v59 = vld [vmem:[%s2193_s25 + $0x184] sm:$0xf] }
  0x65   : > { %1230 = vmatpush.bf16.msra.mxu3 %v1686_v63  ;;  %v2059_v63 = vld [vmem:[%s2193_s25 + $0x2f4] sm:$0xf]  ;;  %v1646_v10 = vor.u32 %v2013_v59, %v1643_v60  ;;  %v1923_v60 = vld [vmem:[%s2193_s25 + $0x3b8] sm:$0xf0] }
  0x66   : > { %1192 = vmatpush.bf16.msra.mxu0 %v1486_v6  ;;  %v1582_v6 = vor.u32 %v1997_v56, %v1579_v58  ;;  %v1830_v12 = vor.u32 %v2059_v63, %v1827_v1  ;;  %v1795_v56 = vld [vmem:[%s2193_s25 + $0x2b8] sm:$0xf0]  ;;  %v2083_v59 = vld [vmem:[%s2193_s25 + $0x3b4] sm:$0xf]  ;;  %v1723_v1 = vld [vmem:[%s2193_s25 + $0x228] sm:$0xf0] }
  0x67   : > { %1205 = vmatpush.bf16.msra.mxu1 %v1550_v8  ;;  %v2091_v8 = vld [vmem:[%s2193_s25 + $0x3f4] sm:$0xf]  ;;  %v1859_v58 = vld [vmem:[%s2193_s25 + $0x338] sm:$0xf0]  ;;  %v1798_v62 = vor.u32 %v2051_v54, %v1795_v56  ;;  %v283_v56 = vld [vmem:[#allocation2] sm:$0xff] }
  0x68   : > { %1218 = vmatpush.bf16.msra.mxu2 %v1614_v9  ;;  %v1955_v9 = vld [vmem:[%s2193_s25 + $0x3f8] sm:$0xf0] }
  0x69   : > { %1231 = vmatpush.bf16.msra.mxu3 %v1678_v13  ;;  %v1894_v13 = vor.u32 %v2075_v2, %v1891_v3  ;;  %v1958_v17 = vor.u32 %v2091_v8, %v1955_v9  ;;  %v2049_v2 = vld [vmem:[%s2193_s25 + $0x2a4] sm:$0xf]  ;;  %v1926_v3 = vor.u32 %v2083_v59, %v1923_v60  ;;  %v1851_v8 = vld [vmem:[%s2193_s25 + $0x328] sm:$0xf0] }
  0x6a   : > { %1193 = vmatpush.bf16.msra.mxu0 %v1478_v19  ;;  %v2073_v19 = vld [vmem:[%s2193_s25 + $0x364] sm:$0xf] }
  0x6b   : > { %1206 = vmatpush.bf16.msra.mxu1 %v1542_v20  ;;  %v1883_v20 = vld [vmem:[%s2193_s25 + $0x368] sm:$0xf0]  ;;  %v2081_v9 = vld [vmem:[%s2193_s25 + $0x3a4] sm:$0xf] }
  0x6c   : > { %1219 = vmatpush.bf16.msra.mxu2 %v1606_v23  ;;  %v2089_v23 = vld [vmem:[%s2193_s25 + $0x3e4] sm:$0xf] }
  0x6d   : > { %1232 = vmatpush.bf16.msra.mxu3 %v1670_v27  ;;  %v1886_v27 = vor.u32 %v2073_v19, %v1883_v20  ;;  %v1950_v31 = vor.u32 %v2089_v23, %v1947_v24  ;;  %v2063_v19 = vld [vmem:[%s2193_s25 + $0x314] sm:$0xf]  ;;  %v1843_v20 = vld [vmem:[%s2193_s25 + $0x318] sm:$0xf0] }
  0x6e   : > { %1194 = vmatpush.bf16.msra.mxu0 %v1470_v33  ;;  %v2071_v33 = vld [vmem:[%s2193_s25 + $0x354] sm:$0xf]  ;;  %v1907_v24 = vld [vmem:[%s2193_s25 + $0x398] sm:$0xf0] }
  0x6f   : > { %1207 = vmatpush.bf16.msra.mxu1 %v1534_v34  ;;  %v1875_v34 = vld [vmem:[%s2193_s25 + $0x358] sm:$0xf0]  ;;  %v2079_v23 = vld [vmem:[%s2193_s25 + $0x394] sm:$0xf] }
  0x70   : > { %1220 = vmatpush.bf16.msra.mxu2 %v1598_v35  ;;  %v2087_v35 = vld [vmem:[%s2193_s25 + $0x3d4] sm:$0xf]  ;;  %v1878_v38 = vor.u32 %v2071_v33, %v1875_v34  ;;  %v2061_v33 = vld [vmem:[%s2193_s25 + $0x304] sm:$0xf]  ;;  %v1835_v34 = vld [vmem:[%s2193_s25 + $0x308] sm:$0xf0] }
  0x71   : > { %1233 = vmatpush.bf16.msra.mxu3 %v1662_v40  ;;  %v2037_v40 = vld [vmem:[%s2193_s25 + $0x244] sm:$0xf]  ;;  %v1942_v44 = vor.u32 %v2087_v35, %v1939_v36  ;;  %v1899_v36 = vld [vmem:[%s2193_s25 + $0x388] sm:$0xf0] }
  0x72   : > { %1195 = vmatpush.bf16.msra.mxu0 %v1462_v49  ;;  %v2077_v35 = vld [vmem:[%s2193_s25 + $0x384] sm:$0xf] }
  0x73   : > { %1208 = vmatpush.bf16.msra.mxu1 %v1526_v52  ;;  %v2035_v52 = vld [vmem:[%s2193_s25 + $0x234] sm:$0xf] }
  0x74   : > { %1221 = vmatpush.bf16.msra.mxu2 %v1590_v53  ;;  %v1731_v53 = vld [vmem:[%s2193_s25 + $0x238] sm:$0xf0] }
  0x75   : > { %1234 = vmatpush.bf16.msra.mxu3 %v1654_v57  ;;  %v2067_v57 = vld [vmem:[%s2193_s25 + $0x334] sm:$0xf]  ;;  %v1734_v61 = vor.u32 %v2035_v52, %v1731_v53 }
  0x76   : > { %1196 = vmatpush.bf16.msra.mxu0 %v1454_v0  ;;  %v1862_v63 = vor.u32 %v2067_v57, %v1859_v58  ;;  %v2033_v0 = vld [vmem:[%s2193_s25 + $0x224] sm:$0xf] }
  0x77   : > { %1209 = vmatpush.bf16.msra.mxu1 %v1518_v4  ;;  %v1787_v4 = vld [vmem:[%s2193_s25 + $0x2a8] sm:$0xf0] }
  0x78   : > { %1222 = vmatpush.bf16.msra.mxu2 %v1582_v6  ;;  %v2065_v6 = vld [vmem:[%s2193_s25 + $0x324] sm:$0xf] }
  0x79   : > { %1235 = vmatpush.bf16.msra.mxu3 %v1646_v10  ;;  %1197 = vmatmul.bf16.vlgmr.msra.gmra.mxu0 %v2299_v21  ;;  %v2069_v21 = vld [vmem:[%s2193_s25 + $0x344] sm:$0xf]  ;;  %v1915_v10 = vld [vmem:[%s2193_s25 + $0x3a8] sm:$0xf0] }
  0x7a   : > { %1241 = vmatpush.bf16.msrb.mxu0 %v1766_v11  ;;  %1210 = vmatmul.bf16.vlgmr.msra.gmra.mxu1 %v2302_v22  ;;  %v1931_v22 = vld [vmem:[%s2193_s25 + $0x3c8] sm:$0xf0]  ;;  %v1870_v51 = vor.u32 %v2069_v21, %v1867_v47  ;;  %v1726_v11 = vor.u32 %v2033_v0, %v1723_v1 }
  0x7b   : > { %1254 = vmatpush.bf16.msrb.mxu1 %v1830_v12  ;;  %1223 = vmatmul.bf16.vlgmr.msra.gmra.mxu2 %v2285_v5  ;;  %v1814_v5 = vor.u32 %v2055_v30, %v1811_v32  ;;  %v1934_v55 = vor.u32 %v2085_v48, %v1931_v22  ;;  %v1790_v12 = vor.u32 %v2049_v2, %v1787_v4  ;;  %v2045_v30 = vld [vmem:[%s2193_s25 + $0x284] sm:$0xf]  ;;  %v1771_v32 = vld [vmem:[%s2193_s25 + $0x288] sm:$0xf0] }
  0x7c   : > { %1267 = vmatpush.bf16.msrb.mxu2 %v1894_v13  ;;  %1236 = vmatmul.bf16.vlgmr.msra.gmra.mxu3 %v2288_v7  ;;  %v1739_v7 = vld [vmem:[%s2193_s25 + $0x248] sm:$0xf0]  ;;  %v1854_v13 = vor.u32 %v2065_v6, %v1851_v8 }
  0x7d   : > { %1280 = vmatpush.bf16.msrb.mxu3 %v1958_v17  ;;  %v1742_v49 = vor.u32 %v2037_v40, %v1739_v7  ;;  %v1918_v17 = vor.u32 %v2081_v9, %v1915_v10  ;;  %v1902_v40 = vor.u32 %v2077_v35, %v1899_v36 }
  0x7e   : > { %1242 = vmatpush.bf16.msrb.mxu0 %v1758_v25  ;;  %v1718_v25 = vor.u32 %v2031_v14, %v1715_v15 }
  0x7f   : > { %1255 = vmatpush.bf16.msrb.mxu1 %v1822_v26  ;;  %v1782_v26 = vor.u32 %v2047_v16, %v1779_v18 }
  0x80   : > { %1268 = vmatpush.bf16.msrb.mxu2 %v1886_v27  ;;  %v1846_v27 = vor.u32 %v2063_v19, %v1843_v20  ;;  %v284_v19 = vld [vmem:[#allocation2 + $0x8] sm:$0xff] }
  0x81   : > { %1281 = vmatpush.bf16.msrb.mxu3 %v1950_v31  ;;  %v1910_v31 = vor.u32 %v2079_v23, %v1907_v24 }
  0x82   : > { %1243 = vmatpush.bf16.msrb.mxu0 %v1750_v37  ;;  %v1710_v37 = vor.u32 %v2029_v28, %v1707_v29 }
  0x83   : > { %1256 = vmatpush.bf16.msrb.mxu1 %v1814_v5  ;;  %v1774_v5 = vor.u32 %v2045_v30, %v1771_v32 }
  0x84   : > { %1269 = vmatpush.bf16.msrb.mxu2 %v1878_v38  ;;  %v1838_v38 = vor.u32 %v2061_v33, %v1835_v34 }
  0x85   : > { %1282 = vmatpush.bf16.msrb.mxu3 %v1942_v44 }
  0x86   : > { %1244 = vmatpush.bf16.msrb.mxu0 %v1742_v49 }
  0x87   : > { %1257 = vmatpush.bf16.msrb.mxu1 %v1806_v50 }
  0x88   : > { %1270 = vmatpush.bf16.msrb.mxu2 %v1870_v51 }
  0x89   : > { %1283 = vmatpush.bf16.msrb.mxu3 %v1934_v55 }
  0x8a   : > { %1245 = vmatpush.bf16.msrb.mxu0 %v1734_v61 }
  0x8b   : > { %1258 = vmatpush.bf16.msrb.mxu1 %v1798_v62 }
  0x8c   : > { %1271 = vmatpush.bf16.msrb.mxu2 %v1862_v63 }
  0x8d   : > { %1284 = vmatpush.bf16.msrb.mxu3 %v1926_v3 }
  0x8e   : > { %1246 = vmatpush.bf16.msrb.mxu0 %v1726_v11 }
  0x8f   : > { %1259 = vmatpush.bf16.msrb.mxu1 %v1790_v12 }
  0x90   : > { %1272 = vmatpush.bf16.msrb.mxu2 %v1854_v13 }
  0x91   : > { %1285 = vmatpush.bf16.msrb.mxu3 %v1918_v17 }
  0x92   : > { %1247 = vmatpush.bf16.msrb.mxu0 %v1718_v25 }
  0x93   : > { %1260 = vmatpush.bf16.msrb.mxu1 %v1782_v26 }
  0x94   : > { %1273 = vmatpush.bf16.msrb.mxu2 %v1846_v27 }
  0x95   : > { %1286 = vmatpush.bf16.msrb.mxu3 %v1910_v31 }
  0x96   : > { %1248 = vmatpush.bf16.msrb.mxu0 %v1710_v37 }
  0x97   : > { %1261 = vmatpush.bf16.msrb.mxu1 %v1774_v5 }
  0x98   : > { %1274 = vmatpush.bf16.msrb.mxu2 %v1838_v38 }
  0x99   : > { %1287 = vmatpush.bf16.msrb.mxu3 %v1902_v40  ;;  %1249 = vmatmul.bf16.vlgmr.msrb.gmra.mxu0 %v2358_v42 }
  0x9a   : > { %1262 = vmatmul.bf16.vlgmr.msrb.gmra.mxu1 %v2362_v45 }
  0x9b   : > { %1275 = vmatmul.bf16.vlgmr.msrb.gmra.mxu2 %v2354_v39 }
  0x9c   : > { %1288 = vmatmul.bf16.vlgmr.msrb.gmra.mxu3 %v2360_v43 }
  0xb6   : > { %v1094_v7 = vpop.f32.mrf.mxu0 }
  0xb7   : > { %v1107_v41 = vpop.f32.mrf.mxu1 }
  0xb8   : > { %v1108_v49 = vadd.f32 %v1107_v41, %v1094_v7 }
  0xbe   : > { %v1120_v44 = vpop.f32.mrf.mxu2  ;;  %v1096_v21 = vpop.f32.mrf.mxu0 }
  0xbf   : > { %v1133_v46 = vpop.f32.mrf.mxu3  ;;  %v1109_v47 = vpop.f32.mrf.mxu1  ;;  %v1121_v50 = vadd.f32 %v1120_v44, %v1108_v49 }
  0xc1   : > { %v1134_v51 = vadd.f32 %v1133_v46, %v1121_v50 }
  0xc6   : > { %v1122_v48 = vpop.f32.mrf.mxu2 }
  0xc7   : > { %v1135_v22 = vpop.f32.mrf.mxu3 }
  0xd6   : > { %v1146_v52 = vpop.f32.mrf.mxu0 }
  0xd7   : > { %v1147_v53 = vadd.f32 %v1146_v52, %v1134_v51  ;;  %v1159_v42 = vpop.f32.mrf.mxu1 }
  0xd9   : > { %v1160_v54 = vadd.f32 %v1159_v42, %v1147_v53 }
  0xde   : > { %v1172_v45 = vpop.f32.mrf.mxu2  ;;  %v1148_v57 = vpop.f32.mrf.mxu0 }
  0xdf   : > { %v1173_v55 = vadd.f32 %v1172_v45, %v1160_v54  ;;  %v1185_v39 = vpop.f32.mrf.mxu3  ;;  %v1161_v58 = vpop.f32.mrf.mxu1 }
  0xe1   : > { %v1186_v43 = vadd.f32 %v1185_v39, %v1173_v55 }
  0xe3   : > { %v1293_v59 = vadd.f32 %v1186_v43, %v283_v56 }
  0xe5   : > { %1295 = vst [vmem:[#allocation2] sm:$0xff] %v1293_v59 }
  0xe6   : > { %v1174_v60 = vpop.f32.mrf.mxu2 }
  0xe7   : > { %v1187_v61 = vpop.f32.mrf.mxu3 }
  0xf6   : > { %v1198_v62 = vpop.f32.mrf.mxu0 }
  0xf7   : > { %v1211_v63 = vpop.f32.mrf.mxu1 }
  0xf8   : > { %v1212_v8 = vadd.f32 %v1211_v63, %v1198_v62 }
  0xfe   : > { %v1224_v0 = vpop.f32.mrf.mxu2  ;;  %v1200_v2 = vpop.f32.mrf.mxu0 }
  0xff   : > { %v1237_v1 = vpop.f32.mrf.mxu3  ;;  %v1213_v3 = vpop.f32.mrf.mxu1  ;;  %v1225_v9 = vadd.f32 %v1224_v0, %v1212_v8 }
 0x101   : > { %v1238_v10 = vadd.f32 %v1237_v1, %v1225_v9 }
 0x106   : > { %v1226_v4 = vpop.f32.mrf.mxu2 }
 0x107   : > { %v1239_v6 = vpop.f32.mrf.mxu3 }
 0x116   : > { %v1250_v11 = vpop.f32.mrf.mxu0 }
 0x117   : > { %v1263_v12 = vpop.f32.mrf.mxu1  ;;  %v1251_v13 = vadd.f32 %v1250_v11, %v1238_v10 }
 0x119   : > { %v1264_v14 = vadd.f32 %v1263_v12, %v1251_v13 }
 0x11e   : > { %v1276_v15 = vpop.f32.mrf.mxu2  ;;  %v1252_v18 = vpop.f32.mrf.mxu0 }
 0x11f   : > { %v1277_v16 = vadd.f32 %v1276_v15, %v1264_v14  ;;  %v1289_v17 = vpop.f32.mrf.mxu3  ;;  %v1265_v20 = vpop.f32.mrf.mxu1 }
 0x121   : > { %v1290_v23 = vadd.f32 %v1289_v17, %v1277_v16 }
 0x123   : > { %v1294_v24 = vadd.f32 %v1290_v23, %v284_v19  ;;  %1300 = sbr.rel (%p1959_p7) target bundleno = 307 (0x133), region = 40 }
 0x125   : > { %1296 = vst [vmem:[#allocation2 + $0x8] sm:$0xff] %v1294_v24 }
 0x126   : > { %v1278_v25 = vpop.f32.mrf.mxu2 }
 0x127   : > { %v1291_v26 = vpop.f32.mrf.mxu3 }
 0x128   : > { %v1301_v27 = vld [vmem:[#allocation2] sm:$0xff] }
 0x129   : > { %v1303_v28 = vld [vmem:[%s2509_s2] sm:$0x3] }
 0x12a   : > { %v1305_v30 = vperm.slane %v1303_v28, 0  ;;  %v1306_v31 = vperm.slane %v1303_v28, 1 }
 0x12c   : > { %v1302_v29 = vld [vmem:[#allocation2 + $0x8] sm:$0xff]  ;;  %v1309_v32 = vadd.f32 %v1305_v30, %v1301_v27 }
 0x12d   : > { %v1310_v33 = vadd.f32 %v1306_v31, %v1302_v29 }
 0x12e   : > { %vm1311_vm0 = vcmp.ge.f32.partialorder %v1309_v32, 0.0  ;;  %v1313_v34 = vmul.f32 0.01, %v1309_v32 }
 0x12f   : > { %vm1312_vm1 = vcmp.ge.f32.partialorder %v1310_v33, 0.0  ;;  %v1314_v35 = vmul.f32 0.01, %v1310_v33 }
 0x130   : > { %v1315_v36 = vsel %vm1311_vm0, %v1309_v32, %v1313_v34 }
 0x131   : > { %v1316_v37 = vsel %vm1312_vm1, %v1310_v33, %v1314_v35  ;;  %1317 = vst [vmem:[%s2510_s3] sm:$0xff] %v1315_v36 }
 0x132   : > { %1318 = vst [vmem:[%s2510_s3 + $0x8] sm:$0xff] %v1316_v37 }
 0x133 PF: > { %s13_s14 = sadd.s32 1, %s2140_s14   ;;  %s2511_s12 = smov %s2136_s13 }
 0x134   : > { %p10_p8 = scmp.ge.s32.totalorder %s13_s14, 4   ;;  %s2512_s13 = smov %s2514_s15 }
 0x136   :  { %12 = sbr.rel (!%p10_p8) target bundleno = 2 (0x2), region = 76 }

</bundles_post_ra>
